<compile_context>
chip_gen: v7x
topology: tpu7x:2x2x1
jax: 0.10.0
libtpu: 0.0.40
codegen_flags: <defaults>
</compile_context>

<pallas_src>
import functools

import jax
import jax.numpy as jnp
import numpy as np
from jax.experimental import pallas as pl
from jax.experimental.pallas import tpu as pltpu

NEG_SLOPE = 0.2


# ------------------------------ Pallas kernel -------------------------------

def fused_gat_kernel(
        x_ref, adj_flat_ref, ew_flat_ref, st_src_ref, st_dst_ref, s_dst_ref,
        wl1_ref, bl1_ref, wr1_ref, br1_ref, we1_ref, att1_ref, bias1_ref,
        wlp_ref, blp_ref, wrp_ref, brp_ref, wep_ref, attp_ref, biasp_ref,
        w1_ref, b1_ref, w2_ref, b2_ref, wva1_ref, bva1_ref, wva2_ref, bva2_ref,
        out_ref, h_vmem,
        *, num_gat_layers, sel_nodes, gat_channels, num_actions):
    adj_flat = adj_flat_ref[...]     # [N*N, 1]  (dst-major flattening, f = i*N + j)
    ew_flat = ew_flat_ref[...]       # [N*N, 1]
    st_src = st_src_ref[...]         # [N*N, N]  st_src[f, j] = 1  iff f % N == j
    st_dst = st_dst_ref[...]         # [N*N, N]  st_dst[f, i] = 1  iff f // N == i
    s_dst = s_dst_ref[...]           # [N, N*N]  = st_dst.T  (per-dst segment sums)

    def gatv2(h, wl, bl, wr, br, wedge, att_col, bias):
        xl = jnp.dot(h, wl, preferred_element_type=jnp.float32) + bl        # [N, C]
        xr = jnp.dot(h, wr, preferred_element_type=jnp.float32) + br        # [N, C]
        # Flattened pair features [N*N, C] built with MXU selector matmuls
        # (no [N, N, C] intermediate, no reshapes inside the kernel).
        xl_rep = jnp.dot(st_src, xl, preferred_element_type=jnp.float32)    # xl[j]
        xr_rep = jnp.dot(st_dst, xr, preferred_element_type=jnp.float32)    # xr[i]
        pre = xl_rep + xr_rep + ew_flat * wedge                             # [N*N, C]
        act = jnp.where(pre > 0, pre, NEG_SLOPE * pre)                      # leaky_relu
        logit = jnp.dot(act, att_col, preferred_element_type=jnp.float32)   # [N*N, 1]
        # Global max shift: per-row softmax is invariant to any per-row constant,
        # so a single global shift is exact and avoids per-segment maxima.
        g = jnp.max(logit, keepdims=True)
        e = jnp.exp(logit - g) * adj_flat                                   # mask once
        denom = jnp.dot(s_dst, e, preferred_element_type=jnp.float32)       # [N, 1]
        inv = pl.reciprocal(jnp.maximum(denom, 1e-30), approx=True)         # EUP
        alpha = e * jnp.dot(st_dst, inv, preferred_element_type=jnp.float32)
        return jnp.dot(s_dst, alpha * xl_rep,
                       preferred_element_type=jnp.float32) + bias           # [N, C]

    # First GAT layer (in_channels=5), then shared propaGAT layers (unrolled).
    h = gatv2(x_ref[...], wl1_ref[...], bl1_ref[...], wr1_ref[...], br1_ref[...],
              we1_ref[...], att1_ref[...], bias1_ref[...])
    wlp, blp = wlp_ref[...], blp_ref[...]
    wrp, brp = wrp_ref[...], brp_ref[...]
    wep, attp, biasp = wep_ref[...], attp_ref[...], biasp_ref[...]
    for _ in range(num_gat_layers):
        h = gatv2(h, wlp, blp, wrp, brp, wep, attp, biasp)

    # Agent/action gather fused into the first FC:
    #   emb @ W1 = sum_k h[sel_k] @ W1[k*C:(k+1)*C]
    h_vmem[...] = h
    C = gat_channels
    x1 = b1_ref[...]
    for k, node in enumerate(sel_nodes):
        x1 = x1 + jnp.dot(h_vmem[pl.ds(node, 1), :],
                          w1_ref[pl.ds(k * C, C), :],
                          preferred_element_type=jnp.float32)
    x1 = jnp.maximum(x1, 0.0)                                                # fc1+relu
    x2 = jnp.maximum(jnp.dot(x1, w2_ref[...], preferred_element_type=jnp.float32)
                     + b2_ref[...], 0.0)                                     # fc2+relu
    # Fused value/advantage branches: one [128,256] matmul, then one block-diag
    # [256, A+1] matmul (cols 0..A-1 = advantages, col A = value).
    va1 = jnp.maximum(jnp.dot(x2, wva1_ref[...], preferred_element_type=jnp.float32)
                      + bva1_ref[...], 0.0)
    va2 = jnp.dot(va1, wva2_ref[...], preferred_element_type=jnp.float32) + bva2_ref[...]
    a = va2[:, 0:num_actions]                                                # [1, A]
    lane = jax.lax.broadcasted_iota(jnp.int32, (1, num_actions + 1), 1)
    v = jnp.sum(jnp.where(lane == num_actions, va2, 0.0), axis=1, keepdims=True)
    out_ref[...] = a + (v - jnp.mean(a, keepdims=True))                      # dueling


# ------------------------------ JAX wrapper ---------------------------------

_VMEM = pl.BlockSpec(memory_space=pltpu.MemorySpace.VMEM)


def gat_forward(x, adj, ew, agent_nodes, actions, gat1, gatp, head, num_gat_layers):
    N = x.shape[0]
    C = gat1["wl"].shape[1]
    num_actions = head["wva2"].shape[1] - 1
    sel_nodes = tuple(int(n) for n in agent_nodes) + tuple(int(n) for n in actions)

    # Constant selector matrices (dst-major flattening f = i*N + j), built once.
    flat = np.arange(N * N)
    cols = np.arange(N)
    st_dst = jnp.asarray((flat[:, None] // N == cols[None, :]).astype(np.float32))
    st_src = jnp.asarray((flat[:, None] % N == cols[None, :]).astype(np.float32))
    s_dst = jnp.asarray((flat[None, :] // N == cols[:, None]).astype(np.float32))
    adj_flat = adj.reshape(N * N, 1)
    ew_flat = ew.reshape(N * N, 1)

    kernel = functools.partial(
        fused_gat_kernel, num_gat_layers=num_gat_layers, sel_nodes=sel_nodes,
        gat_channels=C, num_actions=num_actions)

    out = pl.pallas_call(
        kernel,
        out_shape=jax.ShapeDtypeStruct((1, num_actions), jnp.float32),
        in_specs=[_VMEM] * 28,
        out_specs=_VMEM,
        scratch_shapes=[pltpu.VMEM((N, C), jnp.float32)],
    )(x, adj_flat, ew_flat, st_src, st_dst, s_dst,
      gat1["wl"], gat1["bl"], gat1["wr"], gat1["br"],
      gat1["wedge"], gat1["att_col"], gat1["bias"],
      gatp["wl"], gatp["bl"], gatp["wr"], gatp["br"],
      gatp["wedge"], gatp["att_col"], gatp["bias"],
      head["w1"], head["b1"], head["w2"], head["b2"],
      head["wva1"], head["bva1"], head["wva2"], head["bva2"])
    return out[0]                                                # [num_actions]


# ------------------------------ init helpers --------------------------------

def glorot(key, shape):
    fan_in, fan_out = shape[0], shape[-1]
    limit = (6.0 / (fan_in + fan_out)) ** 0.5
    return jax.random.uniform(key, shape, jnp.float32, -limit, limit)


def make_gat_params(key, cin, cout):
    ks = jax.random.split(key, 4)
    return dict(
        wl=glorot(ks[0], (cin, cout)), bl=jnp.zeros((1, cout), jnp.float32),
        wr=glorot(ks[1], (cin, cout)), br=jnp.zeros((1, cout), jnp.float32),
        wedge=glorot(ks[2], (1, cout)),               # lin_edge (no bias)
        att_col=glorot(ks[3], (1, cout)).T,           # stored as [cout, 1] column
        bias=jnp.zeros((1, cout), jnp.float32),
    )


def make_head_params(key, d_in, num_actions):
    ks = jax.random.split(key, 6)
    wv1 = glorot(ks[2], (128, 128))
    wa1 = glorot(ks[4], (128, 128))
    wv2 = glorot(ks[3], (128, 1))
    wa2 = glorot(ks[5], (128, num_actions))
    # Fused V/A branches: wva1 = [wv1 | wa1]; wva2 block-diagonal so that
    # va2[:, :A] = adv2(adv1(x)) and va2[:, A] = val2(val1(x)).
    wva1 = jnp.concatenate([wv1, wa1], axis=1)                    # [128, 256]
    wva2 = jnp.zeros((256, num_actions + 1), jnp.float32)
    wva2 = wva2.at[128:, :num_actions].set(wa2).at[:128, num_actions:].set(wv2)
    return dict(
        w1=glorot(ks[0], (d_in, 128)), b1=jnp.zeros((1, 128), jnp.float32),
        w2=glorot(ks[1], (128, 128)),  b2=jnp.zeros((1, 128), jnp.float32),
        wva1=wva1, bva1=jnp.zeros((1, 256), jnp.float32),
        wva2=wva2, bva2=jnp.zeros((1, num_actions + 1), jnp.float32),
    )


# --------------------------------- main --------------------------------------

if __name__ == "__main__":
    key = jax.random.PRNGKey(0)
    k_x, k_len, k_g1, k_gp, k_head = jax.random.split(key, 5)

    N = 12                 # number of graph nodes
    IN_FEATS = 5
    C = 16                 # gat_out_channels
    NUM_AGENTS = 2
    NUM_ACTIONS = 4
    NUM_GAT_LAYERS = 2

    # Node features (data.x)
    x = jax.random.normal(k_x, (N, IN_FEATS), jnp.float32)

    # Deterministic edge structure: bidirectional ring + a few chords
    edges = []
    for i in range(N):
        edges.append((i, (i + 1) % N))
        edges.append(((i + 1) % N, i))
    edges += [(0, 5), (5, 0), (3, 9), (9, 3)]
    src = jnp.array([e[0] for e in edges], jnp.int32)
    dst = jnp.array([e[1] for e in edges], jnp.int32)
    E = len(edges)

    # data.length -> normalized edge weights
    lengths = jax.random.uniform(k_len, (E,), jnp.float32, 0.5, 2.0)
    w = lengths / jnp.max(lengths)

    # Densify graph (dst rows, src cols) + self loops with fill_value='mean'
    adj = jnp.zeros((N, N), jnp.float32).at[dst, src].set(1.0)
    ew = jnp.zeros((N, N), jnp.float32).at[dst, src].set(w)
    inc_sum = jnp.zeros((N,), jnp.float32).at[dst].add(w)
    inc_cnt = jnp.zeros((N,), jnp.float32).at[dst].add(1.0)
    self_w = jnp.where(inc_cnt > 0, inc_sum / jnp.maximum(inc_cnt, 1.0), 0.0)
    diag = jnp.arange(N)
    adj = adj.at[diag, diag].set(1.0)
    ew = ew.at[diag, diag].set(self_w)

    # Static indices for embedding gather (fused into the kernel)
    agent_nodes = (0, 3)            # num_agents = 2
    actions = (1, 4, 7, 10)         # num_actions = 4

    # Parameters
    gat1 = make_gat_params(k_g1, IN_FEATS, C)
    gatp = make_gat_params(k_gp, C, C)
    head = make_head_params(k_head, C * (NUM_ACTIONS + NUM_AGENTS), NUM_ACTIONS)

    out = gat_forward(x, adj, ew, agent_nodes, actions,
                      gat1, gatp, head, NUM_GAT_LAYERS)
    out = jax.block_until_ready(out)
    assert out.shape == (NUM_ACTIONS,)
    assert bool(jnp.all(jnp.isfinite(out)))
    print("KERNEL_OK")
</pallas_src>

<mosaic_0001>
module attributes {stable_mosaic.version = 11 : i64} {
  func.func @fused_gat_kernel(%arg0: memref<12x5xf32, #tpu.memory_space<vmem>>, %arg1: memref<144x1xf32, #tpu.memory_space<vmem>>, %arg2: memref<144x1xf32, #tpu.memory_space<vmem>>, %arg3: memref<144x12xf32, #tpu.memory_space<vmem>>, %arg4: memref<144x12xf32, #tpu.memory_space<vmem>>, %arg5: memref<12x144xf32, #tpu.memory_space<vmem>>, %arg6: memref<5x16xf32, #tpu.memory_space<vmem>>, %arg7: memref<1x16xf32, #tpu.memory_space<vmem>>, %arg8: memref<5x16xf32, #tpu.memory_space<vmem>>, %arg9: memref<1x16xf32, #tpu.memory_space<vmem>>, %arg10: memref<1x16xf32, #tpu.memory_space<vmem>>, %arg11: memref<16x1xf32, #tpu.memory_space<vmem>>, %arg12: memref<1x16xf32, #tpu.memory_space<vmem>>, %arg13: memref<16x16xf32, #tpu.memory_space<vmem>>, %arg14: memref<1x16xf32, #tpu.memory_space<vmem>>, %arg15: memref<16x16xf32, #tpu.memory_space<vmem>>, %arg16: memref<1x16xf32, #tpu.memory_space<vmem>>, %arg17: memref<1x16xf32, #tpu.memory_space<vmem>>, %arg18: memref<16x1xf32, #tpu.memory_space<vmem>>, %arg19: memref<1x16xf32, #tpu.memory_space<vmem>>, %arg20: memref<96x128xf32, #tpu.memory_space<vmem>>, %arg21: memref<1x128xf32, #tpu.memory_space<vmem>>, %arg22: memref<128x128xf32, #tpu.memory_space<vmem>>, %arg23: memref<1x128xf32, #tpu.memory_space<vmem>>, %arg24: memref<128x256xf32, #tpu.memory_space<vmem>>, %arg25: memref<1x256xf32, #tpu.memory_space<vmem>>, %arg26: memref<256x5xf32, #tpu.memory_space<vmem>>, %arg27: memref<1x5xf32, #tpu.memory_space<vmem>>, %arg28: memref<1x4xf32, #tpu.memory_space<vmem>>, %arg29: memref<12x16xf32, #tpu.memory_space<vmem>>) attributes {dimension_semantics = [], scalar_prefetch = 0 : i64, scratch_operands = 1 : i64, tpu.core_type = #tpu.core_type<tc>} {
    %c0 = arith.constant 0 : index
    %c0_0 = arith.constant 0 : index
    %0 = vector.load %arg1[%c0, %c0_0] : memref<144x1xf32, #tpu.memory_space<vmem>>, vector<144x1xf32>
    %c0_1 = arith.constant 0 : index
    %c0_2 = arith.constant 0 : index
    %1 = vector.load %arg2[%c0_1, %c0_2] : memref<144x1xf32, #tpu.memory_space<vmem>>, vector<144x1xf32>
    %c0_3 = arith.constant 0 : index
    %c0_4 = arith.constant 0 : index
    %2 = vector.load %arg3[%c0_3, %c0_4] : memref<144x12xf32, #tpu.memory_space<vmem>>, vector<144x12xf32>
    %c0_5 = arith.constant 0 : index
    %c0_6 = arith.constant 0 : index
    %3 = vector.load %arg4[%c0_5, %c0_6] : memref<144x12xf32, #tpu.memory_space<vmem>>, vector<144x12xf32>
    %c0_7 = arith.constant 0 : index
    %c0_8 = arith.constant 0 : index
    %4 = vector.load %arg5[%c0_7, %c0_8] : memref<12x144xf32, #tpu.memory_space<vmem>>, vector<12x144xf32>
    %c0_9 = arith.constant 0 : index
    %c0_10 = arith.constant 0 : index
    %5 = vector.load %arg0[%c0_9, %c0_10] : memref<12x5xf32, #tpu.memory_space<vmem>>, vector<12x5xf32>
    %c0_11 = arith.constant 0 : index
    %c0_12 = arith.constant 0 : index
    %6 = vector.load %arg6[%c0_11, %c0_12] : memref<5x16xf32, #tpu.memory_space<vmem>>, vector<5x16xf32>
    %c0_13 = arith.constant 0 : index
    %c0_14 = arith.constant 0 : index
    %7 = vector.load %arg7[%c0_13, %c0_14] : memref<1x16xf32, #tpu.memory_space<vmem>>, vector<1x16xf32>
    %c0_15 = arith.constant 0 : index
    %c0_16 = arith.constant 0 : index
    %8 = vector.load %arg8[%c0_15, %c0_16] : memref<5x16xf32, #tpu.memory_space<vmem>>, vector<5x16xf32>
    %c0_17 = arith.constant 0 : index
    %c0_18 = arith.constant 0 : index
    %9 = vector.load %arg9[%c0_17, %c0_18] : memref<1x16xf32, #tpu.memory_space<vmem>>, vector<1x16xf32>
    %c0_19 = arith.constant 0 : index
    %c0_20 = arith.constant 0 : index
    %10 = vector.load %arg10[%c0_19, %c0_20] : memref<1x16xf32, #tpu.memory_space<vmem>>, vector<1x16xf32>
    %c0_21 = arith.constant 0 : index
    %c0_22 = arith.constant 0 : index
    %11 = vector.load %arg11[%c0_21, %c0_22] : memref<16x1xf32, #tpu.memory_space<vmem>>, vector<16x1xf32>
    %c0_23 = arith.constant 0 : index
    %c0_24 = arith.constant 0 : index
    %12 = vector.load %arg12[%c0_23, %c0_24] : memref<1x16xf32, #tpu.memory_space<vmem>>, vector<1x16xf32>
    %cst = arith.constant dense<0.000000e+00> : vector<12x16xf32>
    %13 = tpu.matmul %5, %6, %cst {dimension_numbers = #tpu.dot_dimension_numbers<[1], [0], [0], [1], [0, 0, 1, 1], [], []>} : vector<12x5xf32>, vector<5x16xf32>, vector<12x16xf32> -> vector<12x16xf32>
    %14 = vector.broadcast %7 : vector<1x16xf32> to vector<12x16xf32>
    %15 = arith.addf %13, %14 : vector<12x16xf32>
    %cst_25 = arith.constant dense<0.000000e+00> : vector<12x16xf32>
    %16 = tpu.matmul %5, %8, %cst_25 {dimension_numbers = #tpu.dot_dimension_numbers<[1], [0], [0], [1], [0, 0, 1, 1], [], []>} : vector<12x5xf32>, vector<5x16xf32>, vector<12x16xf32> -> vector<12x16xf32>
    %17 = vector.broadcast %9 : vector<1x16xf32> to vector<12x16xf32>
    %18 = arith.addf %16, %17 : vector<12x16xf32>
    %cst_26 = arith.constant dense<0.000000e+00> : vector<144x16xf32>
    %19 = tpu.matmul %2, %15, %cst_26 {dimension_numbers = #tpu.dot_dimension_numbers<[1], [0], [0], [1], [0, 0, 1, 1], [], []>} : vector<144x12xf32>, vector<12x16xf32>, vector<144x16xf32> -> vector<144x16xf32>
    %cst_27 = arith.constant dense<0.000000e+00> : vector<144x16xf32>
    %20 = tpu.matmul %3, %18, %cst_27 {dimension_numbers = #tpu.dot_dimension_numbers<[1], [0], [0], [1], [0, 0, 1, 1], [], []>} : vector<144x12xf32>, vector<12x16xf32>, vector<144x16xf32> -> vector<144x16xf32>
    %21 = arith.addf %19, %20 : vector<144x16xf32>
    %22 = vector.broadcast %1 : vector<144x1xf32> to vector<144x16xf32>
    %23 = vector.broadcast %10 : vector<1x16xf32> to vector<144x16xf32>
    %24 = arith.mulf %22, %23 : vector<144x16xf32>
    %25 = arith.addf %21, %24 : vector<144x16xf32>
    %cst_28 = arith.constant 0.000000e+00 : f32
    %26 = vector.broadcast %cst_28 : f32 to vector<144x16xf32>
    %27 = arith.cmpf ogt, %25, %26 : vector<144x16xf32>
    %cst_29 = arith.constant 2.000000e-01 : f32
    %28 = vector.broadcast %cst_29 : f32 to vector<144x16xf32>
    %29 = arith.mulf %28, %25 : vector<144x16xf32>
    %30 = arith.select %27, %25, %29 : vector<144x16xi1>, vector<144x16xf32>
    %cst_30 = arith.constant dense<0.000000e+00> : vector<144x1xf32>
    %31 = tpu.matmul %30, %11, %cst_30 {dimension_numbers = #tpu.dot_dimension_numbers<[1], [0], [0], [1], [0, 0, 1, 1], [], []>} : vector<144x16xf32>, vector<16x1xf32>, vector<144x1xf32> -> vector<144x1xf32>
    %32 = vector.shape_cast %31 : vector<144x1xf32> to vector<1x144x1xf32>
    %cst_31 = arith.constant dense<0xFF800000> : vector<1xf32>
    %33 = vector.multi_reduction <maximumf>, %32, %cst_31 [1, 2] : vector<1x144x1xf32> to vector<1xf32>
    %34 = vector.shape_cast %33 : vector<1xf32> to vector<1x1x1xf32>
    %35 = vector.extract %34[0, 0, 0] : f32 from vector<1x1x1xf32>
    %36 = vector.broadcast %35 : f32 to vector<1x1xf32>
    %37 = vector.broadcast %36 : vector<1x1xf32> to vector<144x1xf32>
    %38 = arith.subf %31, %37 : vector<144x1xf32>
    %39 = math.exp %38 : vector<144x1xf32>
    %40 = arith.mulf %39, %0 : vector<144x1xf32>
    %cst_32 = arith.constant dense<0.000000e+00> : vector<12x1xf32>
    %41 = tpu.matmul %4, %40, %cst_32 {dimension_numbers = #tpu.dot_dimension_numbers<[1], [0], [0], [1], [0, 0, 1, 1], [], []>} : vector<12x144xf32>, vector<144x1xf32>, vector<12x1xf32> -> vector<12x1xf32>
    %cst_33 = arith.constant 1.000000e-30 : f32
    %42 = vector.broadcast %cst_33 : f32 to vector<12x1xf32>
    %43 = arith.maximumf %41, %42 : vector<12x1xf32>
    %44 = tpu.reciprocal %43 {approx = true} : vector<12x1xf32> -> vector<12x1xf32>
    %cst_34 = arith.constant dense<0.000000e+00> : vector<144x1xf32>
    %45 = tpu.matmul %3, %44, %cst_34 {dimension_numbers = #tpu.dot_dimension_numbers<[1], [0], [0], [1], [0, 0, 1, 1], [], []>} : vector<144x12xf32>, vector<12x1xf32>, vector<144x1xf32> -> vector<144x1xf32>
    %46 = arith.mulf %40, %45 : vector<144x1xf32>
    %47 = vector.broadcast %46 : vector<144x1xf32> to vector<144x16xf32>
    %48 = arith.mulf %47, %19 : vector<144x16xf32>
    %cst_35 = arith.constant dense<0.000000e+00> : vector<12x16xf32>
    %49 = tpu.matmul %4, %48, %cst_35 {dimension_numbers = #tpu.dot_dimension_numbers<[1], [0], [0], [1], [0, 0, 1, 1], [], []>} : vector<12x144xf32>, vector<144x16xf32>, vector<12x16xf32> -> vector<12x16xf32>
    %50 = vector.broadcast %12 : vector<1x16xf32> to vector<12x16xf32>
    %51 = arith.addf %49, %50 : vector<12x16xf32>
    %c0_36 = arith.constant 0 : index
    %c0_37 = arith.constant 0 : index
    %52 = vector.load %arg13[%c0_36, %c0_37] : memref<16x16xf32, #tpu.memory_space<vmem>>, vector<16x16xf32>
    %c0_38 = arith.constant 0 : index
    %c0_39 = arith.constant 0 : index
    %53 = vector.load %arg14[%c0_38, %c0_39] : memref<1x16xf32, #tpu.memory_space<vmem>>, vector<1x16xf32>
    %c0_40 = arith.constant 0 : index
    %c0_41 = arith.constant 0 : index
    %54 = vector.load %arg15[%c0_40, %c0_41] : memref<16x16xf32, #tpu.memory_space<vmem>>, vector<16x16xf32>
    %c0_42 = arith.constant 0 : index
    %c0_43 = arith.constant 0 : index
    %55 = vector.load %arg16[%c0_42, %c0_43] : memref<1x16xf32, #tpu.memory_space<vmem>>, vector<1x16xf32>
    %c0_44 = arith.constant 0 : index
    %c0_45 = arith.constant 0 : index
    %56 = vector.load %arg17[%c0_44, %c0_45] : memref<1x16xf32, #tpu.memory_space<vmem>>, vector<1x16xf32>
    %c0_46 = arith.constant 0 : index
    %c0_47 = arith.constant 0 : index
    %57 = vector.load %arg18[%c0_46, %c0_47] : memref<16x1xf32, #tpu.memory_space<vmem>>, vector<16x1xf32>
    %c0_48 = arith.constant 0 : index
    %c0_49 = arith.constant 0 : index
    %58 = vector.load %arg19[%c0_48, %c0_49] : memref<1x16xf32, #tpu.memory_space<vmem>>, vector<1x16xf32>
    %cst_50 = arith.constant dense<0.000000e+00> : vector<12x16xf32>
    %59 = tpu.matmul %51, %52, %cst_50 {dimension_numbers = #tpu.dot_dimension_numbers<[1], [0], [0], [1], [0, 0, 1, 1], [], []>} : vector<12x16xf32>, vector<16x16xf32>, vector<12x16xf32> -> vector<12x16xf32>
    %60 = vector.broadcast %53 : vector<1x16xf32> to vector<12x16xf32>
    %61 = arith.addf %59, %60 : vector<12x16xf32>
    %cst_51 = arith.constant dense<0.000000e+00> : vector<12x16xf32>
    %62 = tpu.matmul %51, %54, %cst_51 {dimension_numbers = #tpu.dot_dimension_numbers<[1], [0], [0], [1], [0, 0, 1, 1], [], []>} : vector<12x16xf32>, vector<16x16xf32>, vector<12x16xf32> -> vector<12x16xf32>
    %63 = vector.broadcast %55 : vector<1x16xf32> to vector<12x16xf32>
    %64 = arith.addf %62, %63 : vector<12x16xf32>
    %cst_52 = arith.constant dense<0.000000e+00> : vector<144x16xf32>
    %65 = tpu.matmul %2, %61, %cst_52 {dimension_numbers = #tpu.dot_dimension_numbers<[1], [0], [0], [1], [0, 0, 1, 1], [], []>} : vector<144x12xf32>, vector<12x16xf32>, vector<144x16xf32> -> vector<144x16xf32>
    %cst_53 = arith.constant dense<0.000000e+00> : vector<144x16xf32>
    %66 = tpu.matmul %3, %64, %cst_53 {dimension_numbers = #tpu.dot_dimension_numbers<[1], [0], [0], [1], [0, 0, 1, 1], [], []>} : vector<144x12xf32>, vector<12x16xf32>, vector<144x16xf32> -> vector<144x16xf32>
    %67 = arith.addf %65, %66 : vector<144x16xf32>
    %68 = vector.broadcast %1 : vector<144x1xf32> to vector<144x16xf32>
    %69 = vector.broadcast %56 : vector<1x16xf32> to vector<144x16xf32>
    %70 = arith.mulf %68, %69 : vector<144x16xf32>
    %71 = arith.addf %67, %70 : vector<144x16xf32>
    %cst_54 = arith.constant 0.000000e+00 : f32
    %72 = vector.broadcast %cst_54 : f32 to vector<144x16xf32>
    %73 = arith.cmpf ogt, %71, %72 : vector<144x16xf32>
    %cst_55 = arith.constant 2.000000e-01 : f32
    %74 = vector.broadcast %cst_55 : f32 to vector<144x16xf32>
    %75 = arith.mulf %74, %71 : vector<144x16xf32>
    %76 = arith.select %73, %71, %75 : vector<144x16xi1>, vector<144x16xf32>
    %cst_56 = arith.constant dense<0.000000e+00> : vector<144x1xf32>
    %77 = tpu.matmul %76, %57, %cst_56 {dimension_numbers = #tpu.dot_dimension_numbers<[1], [0], [0], [1], [0, 0, 1, 1], [], []>} : vector<144x16xf32>, vector<16x1xf32>, vector<144x1xf32> -> vector<144x1xf32>
    %78 = vector.shape_cast %77 : vector<144x1xf32> to vector<1x144x1xf32>
    %cst_57 = arith.constant dense<0xFF800000> : vector<1xf32>
    %79 = vector.multi_reduction <maximumf>, %78, %cst_57 [1, 2] : vector<1x144x1xf32> to vector<1xf32>
    %80 = vector.shape_cast %79 : vector<1xf32> to vector<1x1x1xf32>
    %81 = vector.extract %80[0, 0, 0] : f32 from vector<1x1x1xf32>
    %82 = vector.broadcast %81 : f32 to vector<1x1xf32>
    %83 = vector.broadcast %82 : vector<1x1xf32> to vector<144x1xf32>
    %84 = arith.subf %77, %83 : vector<144x1xf32>
    %85 = math.exp %84 : vector<144x1xf32>
    %86 = arith.mulf %85, %0 : vector<144x1xf32>
    %cst_58 = arith.constant dense<0.000000e+00> : vector<12x1xf32>
    %87 = tpu.matmul %4, %86, %cst_58 {dimension_numbers = #tpu.dot_dimension_numbers<[1], [0], [0], [1], [0, 0, 1, 1], [], []>} : vector<12x144xf32>, vector<144x1xf32>, vector<12x1xf32> -> vector<12x1xf32>
    %cst_59 = arith.constant 1.000000e-30 : f32
    %88 = vector.broadcast %cst_59 : f32 to vector<12x1xf32>
    %89 = arith.maximumf %87, %88 : vector<12x1xf32>
    %90 = tpu.reciprocal %89 {approx = true} : vector<12x1xf32> -> vector<12x1xf32>
    %cst_60 = arith.constant dense<0.000000e+00> : vector<144x1xf32>
    %91 = tpu.matmul %3, %90, %cst_60 {dimension_numbers = #tpu.dot_dimension_numbers<[1], [0], [0], [1], [0, 0, 1, 1], [], []>} : vector<144x12xf32>, vector<12x1xf32>, vector<144x1xf32> -> vector<144x1xf32>
    %92 = arith.mulf %86, %91 : vector<144x1xf32>
    %93 = vector.broadcast %92 : vector<144x1xf32> to vector<144x16xf32>
    %94 = arith.mulf %93, %65 : vector<144x16xf32>
    %cst_61 = arith.constant dense<0.000000e+00> : vector<12x16xf32>
    %95 = tpu.matmul %4, %94, %cst_61 {dimension_numbers = #tpu.dot_dimension_numbers<[1], [0], [0], [1], [0, 0, 1, 1], [], []>} : vector<12x144xf32>, vector<144x16xf32>, vector<12x16xf32> -> vector<12x16xf32>
    %96 = vector.broadcast %58 : vector<1x16xf32> to vector<12x16xf32>
    %97 = arith.addf %95, %96 : vector<12x16xf32>
    %cst_62 = arith.constant dense<0.000000e+00> : vector<12x16xf32>
    %98 = tpu.matmul %97, %52, %cst_62 {dimension_numbers = #tpu.dot_dimension_numbers<[1], [0], [0], [1], [0, 0, 1, 1], [], []>} : vector<12x16xf32>, vector<16x16xf32>, vector<12x16xf32> -> vector<12x16xf32>
    %99 = vector.broadcast %53 : vector<1x16xf32> to vector<12x16xf32>
    %100 = arith.addf %98, %99 : vector<12x16xf32>
    %cst_63 = arith.constant dense<0.000000e+00> : vector<12x16xf32>
    %101 = tpu.matmul %97, %54, %cst_63 {dimension_numbers = #tpu.dot_dimension_numbers<[1], [0], [0], [1], [0, 0, 1, 1], [], []>} : vector<12x16xf32>, vector<16x16xf32>, vector<12x16xf32> -> vector<12x16xf32>
    %102 = vector.broadcast %55 : vector<1x16xf32> to vector<12x16xf32>
    %103 = arith.addf %101, %102 : vector<12x16xf32>
    %cst_64 = arith.constant dense<0.000000e+00> : vector<144x16xf32>
    %104 = tpu.matmul %2, %100, %cst_64 {dimension_numbers = #tpu.dot_dimension_numbers<[1], [0], [0], [1], [0, 0, 1, 1], [], []>} : vector<144x12xf32>, vector<12x16xf32>, vector<144x16xf32> -> vector<144x16xf32>
    %cst_65 = arith.constant dense<0.000000e+00> : vector<144x16xf32>
    %105 = tpu.matmul %3, %103, %cst_65 {dimension_numbers = #tpu.dot_dimension_numbers<[1], [0], [0], [1], [0, 0, 1, 1], [], []>} : vector<144x12xf32>, vector<12x16xf32>, vector<144x16xf32> -> vector<144x16xf32>
    %106 = arith.addf %104, %105 : vector<144x16xf32>
    %107 = vector.broadcast %1 : vector<144x1xf32> to vector<144x16xf32>
    %108 = vector.broadcast %56 : vector<1x16xf32> to vector<144x16xf32>
    %109 = arith.mulf %107, %108 : vector<144x16xf32>
    %110 = arith.addf %106, %109 : vector<144x16xf32>
    %cst_66 = arith.constant 0.000000e+00 : f32
    %111 = vector.broadcast %cst_66 : f32 to vector<144x16xf32>
    %112 = arith.cmpf ogt, %110, %111 : vector<144x16xf32>
    %cst_67 = arith.constant 2.000000e-01 : f32
    %113 = vector.broadcast %cst_67 : f32 to vector<144x16xf32>
    %114 = arith.mulf %113, %110 : vector<144x16xf32>
    %115 = arith.select %112, %110, %114 : vector<144x16xi1>, vector<144x16xf32>
    %cst_68 = arith.constant dense<0.000000e+00> : vector<144x1xf32>
    %116 = tpu.matmul %115, %57, %cst_68 {dimension_numbers = #tpu.dot_dimension_numbers<[1], [0], [0], [1], [0, 0, 1, 1], [], []>} : vector<144x16xf32>, vector<16x1xf32>, vector<144x1xf32> -> vector<144x1xf32>
    %117 = vector.shape_cast %116 : vector<144x1xf32> to vector<1x144x1xf32>
    %cst_69 = arith.constant dense<0xFF800000> : vector<1xf32>
    %118 = vector.multi_reduction <maximumf>, %117, %cst_69 [1, 2] : vector<1x144x1xf32> to vector<1xf32>
    %119 = vector.shape_cast %118 : vector<1xf32> to vector<1x1x1xf32>
    %120 = vector.extract %119[0, 0, 0] : f32 from vector<1x1x1xf32>
    %121 = vector.broadcast %120 : f32 to vector<1x1xf32>
    %122 = vector.broadcast %121 : vector<1x1xf32> to vector<144x1xf32>
    %123 = arith.subf %116, %122 : vector<144x1xf32>
    %124 = math.exp %123 : vector<144x1xf32>
    %125 = arith.mulf %124, %0 : vector<144x1xf32>
    %cst_70 = arith.constant dense<0.000000e+00> : vector<12x1xf32>
    %126 = tpu.matmul %4, %125, %cst_70 {dimension_numbers = #tpu.dot_dimension_numbers<[1], [0], [0], [1], [0, 0, 1, 1], [], []>} : vector<12x144xf32>, vector<144x1xf32>, vector<12x1xf32> -> vector<12x1xf32>
    %cst_71 = arith.constant 1.000000e-30 : f32
    %127 = vector.broadcast %cst_71 : f32 to vector<12x1xf32>
    %128 = arith.maximumf %126, %127 : vector<12x1xf32>
    %129 = tpu.reciprocal %128 {approx = true} : vector<12x1xf32> -> vector<12x1xf32>
    %cst_72 = arith.constant dense<0.000000e+00> : vector<144x1xf32>
    %130 = tpu.matmul %3, %129, %cst_72 {dimension_numbers = #tpu.dot_dimension_numbers<[1], [0], [0], [1], [0, 0, 1, 1], [], []>} : vector<144x12xf32>, vector<12x1xf32>, vector<144x1xf32> -> vector<144x1xf32>
    %131 = arith.mulf %125, %130 : vector<144x1xf32>
    %132 = vector.broadcast %131 : vector<144x1xf32> to vector<144x16xf32>
    %133 = arith.mulf %132, %104 : vector<144x16xf32>
    %cst_73 = arith.constant dense<0.000000e+00> : vector<12x16xf32>
    %134 = tpu.matmul %4, %133, %cst_73 {dimension_numbers = #tpu.dot_dimension_numbers<[1], [0], [0], [1], [0, 0, 1, 1], [], []>} : vector<12x144xf32>, vector<144x16xf32>, vector<12x16xf32> -> vector<12x16xf32>
    %135 = vector.broadcast %58 : vector<1x16xf32> to vector<12x16xf32>
    %136 = arith.addf %134, %135 : vector<12x16xf32>
    %c0_74 = arith.constant 0 : index
    %c0_75 = arith.constant 0 : index
    %137 = vector.load %arg29[%c0_74, %c0_75] : memref<12x16xf32, #tpu.memory_space<vmem>>, vector<12x16xf32>
    tpu.vector_store %arg29[%c0_74, %c0_75], %136 {strides = array<i32>} : memref<12x16xf32, #tpu.memory_space<vmem>>, vector<12x16xf32>,
    %c0_76 = arith.constant 0 : index
    %c0_77 = arith.constant 0 : index
    %138 = vector.load %arg21[%c0_76, %c0_77] : memref<1x128xf32, #tpu.memory_space<vmem>>, vector<1x128xf32>
    %c0_78 = arith.constant 0 : index
    %c0_79 = arith.constant 0 : index
    %139 = vector.load %arg29[%c0_78, %c0_79] : memref<12x16xf32, #tpu.memory_space<vmem>>, vector<1x16xf32>
    %c0_80 = arith.constant 0 : index
    %c0_81 = arith.constant 0 : index
    %140 = vector.load %arg20[%c0_80, %c0_81] : memref<96x128xf32, #tpu.memory_space<vmem>>, vector<16x128xf32>
    %cst_82 = arith.constant dense<0.000000e+00> : vector<1x128xf32>
    %141 = tpu.matmul %139, %140, %cst_82 {dimension_numbers = #tpu.dot_dimension_numbers<[1], [0], [0], [1], [0, 0, 1, 1], [], []>} : vector<1x16xf32>, vector<16x128xf32>, vector<1x128xf32> -> vector<1x128xf32>
    %142 = arith.addf %138, %141 : vector<1x128xf32>
    %c3 = arith.constant 3 : index
    %c0_83 = arith.constant 0 : index
    %143 = vector.load %arg29[%c3, %c0_83] : memref<12x16xf32, #tpu.memory_space<vmem>>, vector<1x16xf32>
    %c16 = arith.constant 16 : index
    %c0_84 = arith.constant 0 : index
    %144 = vector.load %arg20[%c16, %c0_84] : memref<96x128xf32, #tpu.memory_space<vmem>>, vector<16x128xf32>
    %cst_85 = arith.constant dense<0.000000e+00> : vector<1x128xf32>
    %145 = tpu.matmul %143, %144, %cst_85 {dimension_numbers = #tpu.dot_dimension_numbers<[1], [0], [0], [1], [0, 0, 1, 1], [], []>} : vector<1x16xf32>, vector<16x128xf32>, vector<1x128xf32> -> vector<1x128xf32>
    %146 = arith.addf %142, %145 : vector<1x128xf32>
    %c1 = arith.constant 1 : index
    %c0_86 = arith.constant 0 : index
    %147 = vector.load %arg29[%c1, %c0_86] : memref<12x16xf32, #tpu.memory_space<vmem>>, vector<1x16xf32>
    %c32 = arith.constant 32 : index
    %c0_87 = arith.constant 0 : index
    %148 = vector.load %arg20[%c32, %c0_87] : memref<96x128xf32, #tpu.memory_space<vmem>>, vector<16x128xf32>
    %cst_88 = arith.constant dense<0.000000e+00> : vector<1x128xf32>
    %149 = tpu.matmul %147, %148, %cst_88 {dimension_numbers = #tpu.dot_dimension_numbers<[1], [0], [0], [1], [0, 0, 1, 1], [], []>} : vector<1x16xf32>, vector<16x128xf32>, vector<1x128xf32> -> vector<1x128xf32>
    %150 = arith.addf %146, %149 : vector<1x128xf32>
    %c4 = arith.constant 4 : index
    %c0_89 = arith.constant 0 : index
    %151 = vector.load %arg29[%c4, %c0_89] : memref<12x16xf32, #tpu.memory_space<vmem>>, vector<1x16xf32>
    %c48 = arith.constant 48 : index
    %c0_90 = arith.constant 0 : index
    %152 = vector.load %arg20[%c48, %c0_90] : memref<96x128xf32, #tpu.memory_space<vmem>>, vector<16x128xf32>
    %cst_91 = arith.constant dense<0.000000e+00> : vector<1x128xf32>
    %153 = tpu.matmul %151, %152, %cst_91 {dimension_numbers = #tpu.dot_dimension_numbers<[1], [0], [0], [1], [0, 0, 1, 1], [], []>} : vector<1x16xf32>, vector<16x128xf32>, vector<1x128xf32> -> vector<1x128xf32>
    %154 = arith.addf %150, %153 : vector<1x128xf32>
    %c7 = arith.constant 7 : index
    %c0_92 = arith.constant 0 : index
    %155 = vector.load %arg29[%c7, %c0_92] : memref<12x16xf32, #tpu.memory_space<vmem>>, vector<1x16xf32>
    %c64 = arith.constant 64 : index
    %c0_93 = arith.constant 0 : index
    %156 = vector.load %arg20[%c64, %c0_93] : memref<96x128xf32, #tpu.memory_space<vmem>>, vector<16x128xf32>
    %cst_94 = arith.constant dense<0.000000e+00> : vector<1x128xf32>
    %157 = tpu.matmul %155, %156, %cst_94 {dimension_numbers = #tpu.dot_dimension_numbers<[1], [0], [0], [1], [0, 0, 1, 1], [], []>} : vector<1x16xf32>, vector<16x128xf32>, vector<1x128xf32> -> vector<1x128xf32>
    %158 = arith.addf %154, %157 : vector<1x128xf32>
    %c10 = arith.constant 10 : index
    %c0_95 = arith.constant 0 : index
    %159 = vector.load %arg29[%c10, %c0_95] : memref<12x16xf32, #tpu.memory_space<vmem>>, vector<1x16xf32>
    %c80 = arith.constant 80 : index
    %c0_96 = arith.constant 0 : index
    %160 = vector.load %arg20[%c80, %c0_96] : memref<96x128xf32, #tpu.memory_space<vmem>>, vector<16x128xf32>
    %cst_97 = arith.constant dense<0.000000e+00> : vector<1x128xf32>
    %161 = tpu.matmul %159, %160, %cst_97 {dimension_numbers = #tpu.dot_dimension_numbers<[1], [0], [0], [1], [0, 0, 1, 1], [], []>} : vector<1x16xf32>, vector<16x128xf32>, vector<1x128xf32> -> vector<1x128xf32>
    %162 = arith.addf %158, %161 : vector<1x128xf32>
    %cst_98 = arith.constant 0.000000e+00 : f32
    %163 = vector.broadcast %cst_98 : f32 to vector<1x128xf32>
    %164 = arith.maximumf %162, %163 : vector<1x128xf32>
    %c0_99 = arith.constant 0 : index
    %c0_100 = arith.constant 0 : index
    %165 = vector.load %arg22[%c0_99, %c0_100] : memref<128x128xf32, #tpu.memory_space<vmem>>, vector<128x128xf32>
    %cst_101 = arith.constant dense<0.000000e+00> : vector<1x128xf32>
    %166 = tpu.matmul %164, %165, %cst_101 {dimension_numbers = #tpu.dot_dimension_numbers<[1], [0], [0], [1], [0, 0, 1, 1], [], []>} : vector<1x128xf32>, vector<128x128xf32>, vector<1x128xf32> -> vector<1x128xf32>
    %c0_102 = arith.constant 0 : index
    %c0_103 = arith.constant 0 : index
    %167 = vector.load %arg23[%c0_102, %c0_103] : memref<1x128xf32, #tpu.memory_space<vmem>>, vector<1x128xf32>
    %168 = arith.addf %166, %167 : vector<1x128xf32>
    %cst_104 = arith.constant 0.000000e+00 : f32
    %169 = vector.broadcast %cst_104 : f32 to vector<1x128xf32>
    %170 = arith.maximumf %168, %169 : vector<1x128xf32>
    %c0_105 = arith.constant 0 : index
    %c0_106 = arith.constant 0 : index
    %171 = vector.load %arg24[%c0_105, %c0_106] : memref<128x256xf32, #tpu.memory_space<vmem>>, vector<128x256xf32>
    %cst_107 = arith.constant dense<0.000000e+00> : vector<1x256xf32>
    %172 = tpu.matmul %170, %171, %cst_107 {dimension_numbers = #tpu.dot_dimension_numbers<[1], [0], [0], [1], [0, 0, 1, 1], [], []>} : vector<1x128xf32>, vector<128x256xf32>, vector<1x256xf32> -> vector<1x256xf32>
    %c0_108 = arith.constant 0 : index
    %c0_109 = arith.constant 0 : index
    %173 = vector.load %arg25[%c0_108, %c0_109] : memref<1x256xf32, #tpu.memory_space<vmem>>, vector<1x256xf32>
    %174 = arith.addf %172, %173 : vector<1x256xf32>
    %cst_110 = arith.constant 0.000000e+00 : f32
    %175 = vector.broadcast %cst_110 : f32 to vector<1x256xf32>
    %176 = arith.maximumf %174, %175 : vector<1x256xf32>
    %c0_111 = arith.constant 0 : index
    %c0_112 = arith.constant 0 : index
    %177 = vector.load %arg26[%c0_111, %c0_112] : memref<256x5xf32, #tpu.memory_space<vmem>>, vector<256x5xf32>
    %cst_113 = arith.constant dense<0.000000e+00> : vector<1x5xf32>
    %178 = tpu.matmul %176, %177, %cst_113 {dimension_numbers = #tpu.dot_dimension_numbers<[1], [0], [0], [1], [0, 0, 1, 1], [], []>} : vector<1x256xf32>, vector<256x5xf32>, vector<1x5xf32> -> vector<1x5xf32>
    %c0_114 = arith.constant 0 : index
    %c0_115 = arith.constant 0 : index
    %179 = vector.load %arg27[%c0_114, %c0_115] : memref<1x5xf32, #tpu.memory_space<vmem>>, vector<1x5xf32>
    %180 = arith.addf %178, %179 : vector<1x5xf32>
    %181 = vector.extract_strided_slice %180 {offsets = [0, 0], sizes = [1, 4], strides = [1, 1]} : vector<1x5xf32> to vector<1x4xf32>
    %182 = tpu.iota {dimensions = array<i32: 1>} : vector<1x5xi32>
    %c4_i32 = arith.constant 4 : i32
    %183 = vector.broadcast %c4_i32 : i32 to vector<1x5xi32>
    %184 = arith.cmpi eq, %182, %183 : vector<1x5xi32>
    %cst_116 = arith.constant 0.000000e+00 : f32
    %185 = vector.broadcast %cst_116 : f32 to vector<1x5xf32>
    %186 = arith.select %184, %180, %185 : vector<1x5xi1>, vector<1x5xf32>
    %cst_117 = arith.constant dense<0.000000e+00> : vector<1xf32>
    %187 = vector.multi_reduction <add>, %186, %cst_117 [1] : vector<1x5xf32> to vector<1xf32>
    %188 = vector.shape_cast %187 : vector<1xf32> to vector<1x1xf32>
    %189 = vector.shape_cast %181 : vector<1x4xf32> to vector<1x1x4xf32>
    %cst_118 = arith.constant dense<0.000000e+00> : vector<1xf32>
    %190 = vector.multi_reduction <add>, %189, %cst_118 [1, 2] : vector<1x1x4xf32> to vector<1xf32>
    %191 = vector.shape_cast %190 : vector<1xf32> to vector<1x1x1xf32>
    %192 = vector.extract %191[0, 0, 0] : f32 from vector<1x1x1xf32>
    %193 = vector.broadcast %192 : f32 to vector<1x1xf32>
    %cst_119 = arith.constant 4.000000e+00 : f32
    %194 = vector.broadcast %cst_119 : f32 to vector<1x1xf32>
    %195 = arith.divf %193, %194 : vector<1x1xf32>
    %196 = arith.subf %188, %195 : vector<1x1xf32>
    %197 = vector.broadcast %196 : vector<1x1xf32> to vector<1x4xf32>
    %198 = arith.addf %181, %197 : vector<1x4xf32>
    %c0_120 = arith.constant 0 : index
    %c0_121 = arith.constant 0 : index
    %199 = vector.load %arg28[%c0_120, %c0_121] : memref<1x4xf32, #tpu.memory_space<vmem>>, vector<1x4xf32>
    tpu.vector_store %arg28[%c0_120, %c0_121], %198 {strides = array<i32>} : memref<1x4xf32, #tpu.memory_space<vmem>>, vector<1x4xf32>,
    return
  }
}

</mosaic_0001>

<bundles_post_ra>
// kernel: tpu_custom_call.1
= control target key start
LH: loop header
LB: loop body
LE: loop exit
PB: predicated region body
PF: predicated region fallthrough
CT: control target
= control target key end

     0   :  { %s9697_s0 = inlined_call_operand.vmem [shape: f32[12,5], index: 0, kind: input, shape index: {}]   ;;  %s9698_s1 = inlined_call_operand.vmem [shape: f32[144,1], index: 1, kind: input, shape index: {}]   ;;  %s9699_s2 = inlined_call_operand.vmem [shape: f32[144,1], index: 2, kind: input, shape index: {}]   ;;  %s9700_s3 = inlined_call_operand.vmem [shape: f32[144,12], index: 3, kind: input, shape index: {}]   ;;  %s9701_s4 = inlined_call_operand.vmem [shape: f32[144,12], index: 4, kind: input, shape index: {}]   ;;  %s9702_s5 = inlined_call_operand.vmem [shape: f32[12,144], index: 5, kind: input, shape index: {}]   ;;  %s9703_s6 = inlined_call_operand.vmem [shape: f32[5,16], index: 6, kind: input, shape index: {}]   ;;  %s9704_s7 = inlined_call_operand.vmem [shape: f32[1,16], index: 7, kind: input, shape index: {}]   ;;  %s9705_s8 = inlined_call_operand.vmem [shape: f32[5,16], index: 8, kind: input, shape index: {}]   ;;  %s9706_s9 = inlined_call_operand.vmem [shape: f32[1,16], index: 9, kind: input, shape index: {}]   ;;  %s9707_s10 = inlined_call_operand.vmem [shape: f32[1,16], index: 10, kind: input, shape index: {}]   ;;  %s9708_s11 = inlined_call_operand.vmem [shape: f32[16,1], index: 11, kind: input, shape index: {}]   ;;  %s9709_s12 = inlined_call_operand.vmem [shape: f32[1,16], index: 12, kind: input, shape index: {}]   ;;  %s9710_s13 = inlined_call_operand.vmem [shape: f32[16,16], index: 13, kind: input, shape index: {}]   ;;  %s9711_s14 = inlined_call_operand.vmem [shape: f32[1,16], index: 14, kind: input, shape index: {}]   ;;  %s9712_s15 = inlined_call_operand.vmem [shape: f32[16,16], index: 15, kind: input, shape index: {}]   ;;  %s9713_s16 = inlined_call_operand.vmem [shape: f32[1,16], index: 16, kind: input, shape index: {}]   ;;  %s9714_s17 = inlined_call_operand.vmem [shape: f32[1,16], index: 17, kind: input, shape index: {}]   ;;  %s9715_s18 = inlined_call_operand.vmem [shape: f32[16,1], index: 18, kind: input, shape index: {}]   ;;  %s9716_s19 = inlined_call_operand.vmem [shape: f32[1,16], index: 19, kind: input, shape index: {}]   ;;  %s9717_s20 = inlined_call_operand.vmem [shape: f32[96,128], index: 20, kind: input, shape index: {}]   ;;  %s9718_s21 = inlined_call_operand.vmem [shape: f32[1,128], index: 21, kind: input, shape index: {}]   ;;  %s9719_s22 = inlined_call_operand.vmem [shape: f32[128,128], index: 22, kind: input, shape index: {}]   ;;  %s9720_s23 = inlined_call_operand.vmem [shape: f32[1,128], index: 23, kind: input, shape index: {}]   ;;  %s9721_s24 = inlined_call_operand.vmem [shape: f32[128,256], index: 24, kind: input, shape index: {}]   ;;  %s9722_s25 = inlined_call_operand.vmem [shape: f32[1,256], index: 25, kind: input, shape index: {}]   ;;  %s9723_s26 = inlined_call_operand.vmem [shape: f32[256,5], index: 26, kind: input, shape index: {}]   ;;  %s9724_s27 = inlined_call_operand.vmem [shape: f32[1,5], index: 27, kind: input, shape index: {}]   ;;  %s9725_s28 = inlined_call_operand.hbm [shape: f32[1,4], index: 28, kind: output, shape index: {}]  }
   0x1   :  { %9804 = sst [smem:[#allocation38_spill]] %s9697_s0 }
   0x2   :  { %9805 = sst [smem:[#allocation39_spill]] %s9698_s1 }
   0x3   :  { %9806 = sst [smem:[#allocation40_spill]] %s9699_s2 }
   0x4   :  { %9807 = sst [smem:[#allocation41_spill]] %s9700_s3 }
   0x5   :  { %9808 = sst [smem:[#allocation42_spill]] %s9701_s4 }
   0x6   :  { %9809 = sst [smem:[#allocation43_spill]] %s9702_s5 }
   0x7   :  { %9810 = sst [smem:[#allocation44_spill]] %s9703_s6 }
   0x8   :  { %9811 = sst [smem:[#allocation45_spill]] %s9704_s7 }
   0x9   :  { %9812 = sst [smem:[#allocation46_spill]] %s9705_s8 }
   0xa   :  { %9813 = sst [smem:[#allocation47_spill]] %s9706_s9 }
   0xb   :  { %9814 = sst [smem:[#allocation48_spill]] %s9707_s10 }
   0xc   :  { %9815 = sst [smem:[#allocation49_spill]] %s9708_s11 }
   0xd   :  { %9816 = sst [smem:[#allocation50_spill]] %s9709_s12 }
   0xe   :  { %s9817_s9 = sld [smem:[#allocation44_spill]]  ;;  %vm189_vm0 = vcmask 1044480   ;;  %s9818_s6 = sld [smem:[#allocation38_spill]]  ;;  %vm182_vm1 = vcmask 39936  }
   0xf   :  { %s9819_s2 = sld [smem:[#allocation46_spill]] }
  0x14   :  { %v168_v0 = vld [vmem:[%s9817_s9] sm:$0x1f]  ;;  %v167_v2 = vld [vmem:[%s9818_s6 + $0x8] sm:$0xf] }
  0x15   :  { %v166_v1 = vld [vmem:[%s9818_s6] sm:$0xff]  ;;  %5875 = vmatprep.subr.msk.mxu0 %vm189_vm0, %v168_v0 }
  0x16   :  { %5877 = vmatprep.mubr.msk.f32.mxu0 %vm182_vm1, %v166_v1  ;;  %v170_v3 = vld [vmem:[%s9819_s2] sm:$0x1f] }
  0x17   :  { %33 = vsyncpa [#allocation4], 0  ;;  %5876 = vmatpush3.msk.msra.mxu0 %vm189_vm0, %v168_v0  ;;  %5880 = vmatprep.subr.msk.mxu1 %vm189_vm0, %v170_v3  ;;  %s9820_s1 = sld [smem:[#allocation41_spill]]  ;;  %vm352_vm2 = vcmask 97280   ;;  %s9821_s30 = sld [smem:[#allocation40_spill]]  ;;  %v7004_v8 = vmov 0  }
  0x18   :  { %5878 = vmatmul.mubr.msk.f32.vlgmr.msra.gmra.mrb[0].mxu0 %vm182_vm1, %v167_v2  ;;  %5881 = vmatpush3.msk.msra.mxu1 %vm189_vm0, %v170_v3  ;;  %s9822_s8 = sld [smem:[#allocation45_spill]]  ;;  %s9823_s3 = sld [smem:[#allocation47_spill]]  ;;  %vm407_vm3 = vcmask 1043456   ;;  %vm7005_vm4 = vmmov 1   ;;  %vm982_vm6 = vcmask 130048  }
  0x19   :  { %5882 = vmatprep.mubr.msk.f32.mxu1 %vm182_vm1, %v166_v1  ;;  %6739 = vset.pattern.permute.xlu0 %v7004_v8  ;;  %s9824_s0 = sld [smem:[#allocation49_spill]]  ;;  %vm7241_vm5 = vmpackc.low %vm407_vm3, %vm7005_vm4  ;;  %s9827_s29 = sld [smem:[#allocation42_spill]] }
  0x1a   :  { %5883 = vmatmul.mubr.msk.f32.vlgmr.msra.gmra.mrb[0].mxu1 %vm182_vm1, %v167_v2  ;;  %6740 = vset.pattern.permute.xlu1 %v7004_v8  ;;  %s9854_s11 = sld [smem:[#allocation39_spill]] }
  0x1d   :  { %v140_v4 = vld [vmem:[%s9820_s1 + $0x70] sm:$0xff]  ;;  %v126_v5 = vld [vmem:[%s9820_s1] sm:$0xff]  ;;  %v109_v9 = vld [vmem:[%s9821_s30 + $0x8] sm:$0xff] }
  0x1e   :  { %5910 = vmatprep.mubr.msk.f32.mxu1 %vm352_vm2, %v140_v4  ;;  %5889 = vmatprep.mubr.msk.f32.mxu0 %vm352_vm2, %v126_v5  ;;  %v108_v6 = vld [vmem:[%s9821_s30] sm:$0xff]  ;;  %v110_v7 = vld [vmem:[%s9821_s30 + $0x10] sm:$0xff]  ;;  %v111_v10 = vld [vmem:[%s9821_s30 + $0x18] sm:$0xff] }
  0x1f   :  { %798 = vperm.xlu0 %6739, %v108_v6   ;;  %808 = vperm.xlu1 %6740, %v110_v7   ;;  %v112_v11 = vld [vmem:[%s9821_s30 + $0x20] sm:$0xff]  ;;  %v113_v12 = vld [vmem:[%s9821_s30 + $0x28] sm:$0xff]  ;;  %v114_v13 = vld [vmem:[%s9821_s30 + $0x30] sm:$0xff] }
  0x20   :  { %v115_v14 = vld [vmem:[%s9821_s30 + $0x38] sm:$0xff]  ;;  %v116_v15 = vld [vmem:[%s9821_s30 + $0x40] sm:$0xff]  ;;  %v117_v16 = vld [vmem:[%s9821_s30 + $0x48] sm:$0xff] }
  0x21   :  { %v118_v17 = vld [vmem:[%s9821_s30 + $0x50] sm:$0xff]  ;;  %v119_v18 = vld [vmem:[%s9821_s30 + $0x58] sm:$0xff]  ;;  %v120_v19 = vld [vmem:[%s9821_s30 + $0x60] sm:$0xff] }
  0x22   :  { %v121_v20 = vld [vmem:[%s9821_s30 + $0x68] sm:$0xff]  ;;  %v122_v21 = vld [vmem:[%s9821_s30 + $0x70] sm:$0xff]  ;;  %v123_v22 = vld [vmem:[%s9821_s30 + $0x78] sm:$0xff] }
  0x23   :  { %803 = vperm.xlu0 %6739, %v109_v9   ;;  %813 = vperm.xlu1 %6740, %v111_v10   ;;  %v124_v23 = vld [vmem:[%s9821_s30 + $0x80] sm:$0xff]  ;;  %v125_v24 = vld [vmem:[%s9821_s30 + $0x88] sm:$0xff]  ;;  %v141_v41 = vld [vmem:[%s9820_s1 + $0x78] sm:$0xff] }
  0x24   :  { %v5278_v25 = vld [vmem:[%s9822_s8] ss:$0 sm:$0xff]  ;;  %v174_v31 = vld [vmem:[%s9824_s0 + $0x8] sm:$0xff]  ;;  %v128_v44 = vld [vmem:[%s9820_s1 + $0x10] sm:$0xff]  ;;  %s9840_s8 = sld [smem:[#allocation48_spill]] }
  0x25   :  { %v5282_v27 = vld [vmem:[%s9823_s3] ss:$0 sm:$0xff]  ;;  %v127_v42 = vld [vmem:[%s9820_s1 + $0x8] sm:$0xff]  ;;  %v129_v46 = vld [vmem:[%s9820_s1 + $0x18] sm:$0xff]  ;;  %s9853_s3 = sld [smem:[#allocation43_spill]] }
  0x26   :  { %v173_v30 = vld [vmem:[%s9824_s0] sm:$0xff]  ;;  %v143_v45 = vld [vmem:[%s9820_s1 + $0x88] sm:$0xff]  ;;  %v7303_v51 = vld [vmem:[%s9827_s29 + $0x10] sm:$0xff] }
  0x27   :  { %818 = vperm.xlu0 %6739, %v112_v11   ;;  %823 = vperm.xlu1 %6740, %v113_v12   ;;  %v6374_v39 = vpack.c.bf16 %v174_v31, %v173_v30  ;;  %v142_v43 = vld [vmem:[%s9820_s1 + $0x80] sm:$0xff]  ;;  %v7294_v49 = vld [vmem:[%s9827_s29 + $0x8] sm:$0xff]  ;;  %v132_v52 = vld [vmem:[%s9820_s1 + $0x30] sm:$0xff] }
  0x28   :  { %v7281_v47 = vld [vmem:[%s9827_s29] sm:$0xff]  ;;  %v131_v50 = vld [vmem:[%s9820_s1 + $0x28] sm:$0xff]  ;;  %v7316_v53 = vld [vmem:[%s9827_s29 + $0x18] sm:$0xff] }
  0x29   :  { %v130_v48 = vld [vmem:[%s9820_s1 + $0x20] sm:$0xff]  ;;  %v133_v54 = vld [vmem:[%s9820_s1 + $0x38] sm:$0xff]  ;;  %v7338_v57 = vld [vmem:[%s9827_s29 + $0x28] sm:$0xff] }
  0x2a   :  { %v7325_v55 = vld [vmem:[%s9827_s29 + $0x20] sm:$0xff]  ;;  %v135_v58 = vld [vmem:[%s9820_s1 + $0x48] sm:$0xff]  ;;  %v7347_v59 = vld [vmem:[%s9827_s29 + $0x30] sm:$0xff] }
  0x2b   :  { %828 = vperm.xlu0 %6739, %v114_v13   ;;  %833 = vperm.xlu1 %6740, %v115_v14   ;;  %v134_v56 = vld [vmem:[%s9820_s1 + $0x40] sm:$0xff]  ;;  %v136_v60 = vld [vmem:[%s9820_s1 + $0x50] sm:$0xff]  ;;  %v7360_v61 = vld [vmem:[%s9827_s29 + $0x38] sm:$0xff] }
  0x2c   :  { %v137_v62 = vld [vmem:[%s9820_s1 + $0x58] sm:$0xff]  ;;  %v7369_v63 = vld [vmem:[%s9827_s29 + $0x40] sm:$0xff]  ;;  %v7382_v1 = vld [vmem:[%s9827_s29 + $0x48] sm:$0xff] }
  0x2d   :  { %v138_v0 = vld [vmem:[%s9820_s1 + $0x60] sm:$0xff]  ;;  %v139_v2 = vld [vmem:[%s9820_s1 + $0x68] sm:$0xff]  ;;  %v7391_v3 = vld [vmem:[%s9827_s29 + $0x50] sm:$0xff] }
  0x2e   :  { %v7401_v4 = vld [vmem:[%s9827_s29 + $0x58] sm:$0xff]  ;;  %v7406_v5 = vld [vmem:[%s9827_s29 + $0x60] sm:$0xff]  ;;  %v7415_v6 = vld [vmem:[%s9827_s29 + $0x68] sm:$0xff] }
  0x2f   :  { %838 = vperm.xlu0 %6739, %v116_v15   ;;  %843 = vperm.xlu1 %6740, %v117_v16   ;;  %v7420_v7 = vld [vmem:[%s9827_s29 + $0x70] sm:$0xff]  ;;  %v7429_v8 = vld [vmem:[%s9827_s29 + $0x78] sm:$0xff]  ;;  %v7434_v9 = vld [vmem:[%s9827_s29 + $0x80] sm:$0xff] }
  0x30   :  { %v7443_v10 = vld [vmem:[%s9827_s29 + $0x88] sm:$0xff] }
  0x33   :  { %848 = vperm.xlu0 %6739, %v118_v17   ;;  %853 = vperm.xlu1 %6740, %v119_v18  }
  0x37   :  { %858 = vperm.xlu0 %6739, %v120_v19   ;;  %863 = vperm.xlu1 %6740, %v121_v20  }
  0x3b   :  { %868 = vperm.xlu0 %6739, %v122_v21   ;;  %873 = vperm.xlu1 %6740, %v123_v22  }
  0x3f   :  { %878 = vperm.xlu0 %6739, %v124_v23   ;;  %883 = vperm.xlu1 %6740, %v125_v24  }
  0x9e   :  { %v7447_v11 = vpop.permute.xlu0 %798  ;;  %v7449_v12 = vpop.permute.xlu1 %808 }
  0x9f   :  { %9828 = vst [vmem:[#allocation6_spill] sm:$0xff] %v7447_v11  ;;  %9829 = vst [vmem:[#allocation7_spill] sm:$0xff] %v7449_v12 }
  0xa2   :  { %v7451_v13 = vpop.permute.xlu0 %803  ;;  %v7453_v14 = vpop.permute.xlu1 %813 }
  0xa3   :  { %9830 = vst [vmem:[#allocation8_spill] sm:$0xff] %v7451_v13  ;;  %9831 = vst [vmem:[#allocation9_spill] sm:$0xff] %v7453_v14 }
  0xa6   :  { %v7455_v15 = vpop.permute.xlu0 %818  ;;  %v7457_v16 = vpop.permute.xlu1 %823 }
  0xa7   :  { %9832 = vst [vmem:[#allocation10_spill] sm:$0xff] %v7455_v15  ;;  %9833 = vst [vmem:[#allocation11_spill] sm:$0xff] %v7457_v16 }
  0xaa   :  { %v7459_v17 = vpop.permute.xlu0 %828  ;;  %v7469_v22 = vpop.permute.xlu1 %833 }
  0xab   :  { %9834 = vst [vmem:[#allocation12_spill] sm:$0xff] %v7459_v17  ;;  %9837 = vst [vmem:[#allocation15_spill] sm:$0xff] %v7469_v22 }
  0xeb   :  { %v5879_v26 = vpop.f32.mrb[0].mxu0 }
  0xec   :  { %v265_v28 = vadd.f32 %v5879_v26, %v5278_v25  ;;  %v259_v29 = vpop.f32.mrb[1].mxu0 }
  0xed   :  { %v260_v32 = vadd.f32 %v5278_v25, %v259_v29  ;;  %v5884_v33 = vpop.f32.mrb[0].mxu1 }
  0xee   :  { %v349_v34 = vadd.f32 %v5884_v33, %v5282_v27  ;;  %v343_v36 = vpop.f32.mrb[1].mxu1 }
  0xef   :  { %v6362_v37 = vpack.c.bf16 %v265_v28, %v260_v32  ;;  %v344_v38 = vadd.f32 %v5282_v27, %v343_v36  ;;  %v7482_v27 = vld [vmem:[%s9840_s8] ss:$0 sm:$0xff]  ;;  %v7484_v28 = vpop.permute.xlu0 %838  ;;  %s9862_s8 = sld [smem:[#allocation50_spill]] }
  0xf0   :  { %9841 = vst [vmem:[#allocation18_spill] sm:$0xff] %v7484_v28  ;;  %v893_v31 = vmul.f32 %v7482_v27, %v7451_v13  ;;  %v892_v36 = vmul.f32 %v7482_v27, %v7447_v11 }
  0xf1   :  { %6364 = vmatprep.subr.msk.bf16.mxu0 %vm7241_vm5, %v6362_v37  ;;  %6712 = vmatprep.subr.msk.bf16.mxu1 %vm7241_vm5, %v6362_v37  ;;  %v6368_v40 = vpack.c.bf16 %v349_v34, %v344_v38  ;;  %v7496_v38 = vpop.permute.xlu1 %843 }
  0xf2   :  { %6367 = vmatpush3.bf16.msk.msra.mxu0 %vm7241_vm5, %v6362_v37  ;;  %6713 = vmatpush3.bf16.msk.msra.mxu1 %vm7241_vm5, %v6362_v37  ;;  %9842 = vst [vmem:[#allocation19_spill] sm:$0xff] %v7496_v38 }
  0xf3   :  { %6370 = vmatprep.subr.msk.bf16.mxu1 %vm7241_vm5, %v6368_v40  ;;  %6375 = vmatprep.subr.bf16.mxu0 %v6374_v39 }
  0xf5   :  { %5911 = vmatmul.mubr.msk.f32.vlgmr.msra.gmra.mrb[2].mxu1 %vm352_vm2, %v141_v41  ;;  %5890 = vmatmul.mubr.msk.f32.vlgmr.msra.gmra.mrb[2].mxu0 %vm352_vm2, %v127_v42 }
  0xf6   :  { %5913 = vmatprep.mubr.msk.f32.mxu1 %vm352_vm2, %v142_v43  ;;  %6373 = vmatpush3.bf16.msk.msra.mxu1 %vm7241_vm5, %v6368_v40  ;;  %v894_v40 = vmul.f32 %v7482_v27, %v7449_v12 }
  0xf7   :  { %5892 = vmatprep.mubr.msk.f32.mxu0 %vm352_vm2, %v128_v44  ;;  %6377 = vmatpush3.bf16.msra.mxu0 %v6374_v39  ;;  %v895_v44 = vmul.f32 %v7482_v27, %v7453_v14 }
  0xf9   :  { %5914 = vmatmul.mubr.msk.f32.gmra.mrb[4].mxu1 %vm352_vm2, %v143_v45  ;;  %5893 = vmatmul.mubr.msk.f32.gmra.mrb[4].mxu0 %vm352_vm2, %v129_v46 }
  0xfa   :  { %5920 = vmatprep.mubr.msk.f32.mxu1 %vm352_vm2, %v7281_v47  ;;  %5895 = vmatprep.mubr.msk.f32.mxu0 %vm352_vm2, %v130_v48 }
  0xfd   :  { %5921 = vmatmul.mubr.msk.f32.vlgmr.msra.gmra.mrb[6].mxu1 %vm352_vm2, %v7294_v49  ;;  %5896 = vmatmul.mubr.msk.f32.gmra.mrb[6].mxu0 %vm352_vm2, %v131_v50 }
  0xfe   :  { %5923 = vmatprep.mubr.msk.f32.mxu1 %vm352_vm2, %v7303_v51  ;;  %5898 = vmatprep.mubr.msk.f32.mxu0 %vm352_vm2, %v132_v52 }
 0x101   :  { %5924 = vmatmul.mubr.msk.f32.gmra.mrb[8].mxu1 %vm352_vm2, %v7316_v53  ;;  %5899 = vmatmul.mubr.msk.f32.gmra.mrb[8].mxu0 %vm352_vm2, %v133_v54 }
 0x102   :  { %5926 = vmatprep.mubr.msk.f32.mxu1 %vm352_vm2, %v7325_v55  ;;  %5901 = vmatprep.mubr.msk.f32.mxu0 %vm352_vm2, %v134_v56  ;;  %v7508_v56 = vpop.permute.xlu0 %848 }
 0x103   :  { %9843 = vst [vmem:[#allocation20_spill] sm:$0xff] %v7508_v56 }
 0x105   :  { %5927 = vmatmul.mubr.msk.f32.gmra.mrb[10].mxu1 %vm352_vm2, %v7338_v57  ;;  %5902 = vmatmul.mubr.msk.f32.gmra.mrb[10].mxu0 %vm352_vm2, %v135_v58 }
 0x106   :  { %5929 = vmatprep.mubr.msk.f32.mxu1 %vm352_vm2, %v7347_v59  ;;  %5904 = vmatprep.mubr.msk.f32.mxu0 %vm352_vm2, %v136_v60  ;;  %v896_v60 = vmul.f32 %v7482_v27, %v7455_v15 }
 0x109   :  { %5930 = vmatmul.mubr.msk.f32.gmra.mrb[12].mxu1 %vm352_vm2, %v7360_v61  ;;  %5905 = vmatmul.mubr.msk.f32.gmra.mrb[12].mxu0 %vm352_vm2, %v137_v62 }
 0x10a   :  { %5932 = vmatprep.mubr.msk.f32.mxu1 %vm352_vm2, %v7369_v63  ;;  %5907 = vmatprep.mubr.msk.f32.mxu0 %vm352_vm2, %v138_v0 }
 0x10d   :  { %5933 = vmatmul.mubr.msk.f32.gmra.mrb[14].mxu1 %vm352_vm2, %v7382_v1  ;;  %5908 = vmatmul.mubr.msk.f32.gmra.mrb[14].mxu0 %vm352_vm2, %v139_v2 }
 0x10e   :  { %5935 = vmatprep.mubr.msk.f32.mxu1 %vm352_vm2, %v7391_v3 }
 0x111   :  { %5936 = vmatmul.mubr.msk.f32.gmra.mrb[16].mxu1 %vm352_vm2, %v7401_v4 }
 0x112   :  { %5938 = vmatprep.mubr.msk.f32.mxu1 %vm352_vm2, %v7406_v5 }
 0x115   :  { %5939 = vmatmul.mubr.msk.f32.gmra.mrb[18].mxu1 %vm352_vm2, %v7415_v6 }
 0x116   :  { %5941 = vmatprep.mubr.msk.f32.mxu1 %vm352_vm2, %v7420_v7 }
 0x119   :  { %5942 = vmatmul.mubr.msk.f32.gmra.mrb[20].mxu1 %vm352_vm2, %v7429_v8 }
 0x11a   :  { %5944 = vmatprep.mubr.msk.f32.mxu1 %vm352_vm2, %v7434_v9 }
 0x11d   :  { %5945 = vmatmul.mubr.msk.f32.gmra.mrb[22].mxu1 %vm352_vm2, %v7443_v10 }
 0x1c8   :  { %v7461_v18 = vpop.f32.mrb[2].mxu1  ;;  %v7463_v19 = vpop.f32.mrb[2].mxu0 }
 0x1c9   :  { %9835 = vst [vmem:[#allocation13_spill] sm:$0xff] %v7461_v18  ;;  %v7465_v20 = vpop.f32.mrb[3].mxu1  ;;  %v7467_v21 = vpop.f32.mrb[3].mxu0 }
 0x1ca   :  { %9836 = vst [vmem:[#allocation14_spill] sm:$0xff] %v7465_v20 }
 0x1cc   :  { %v7471_v23 = vpop.f32.mrb[4].mxu1  ;;  %v7473_v24 = vpop.f32.mrb[4].mxu0 }
 0x1cd   :  { %9838 = vst [vmem:[#allocation16_spill] sm:$0xff] %v7471_v23  ;;  %v7475_v25 = vpop.f32.mrb[5].mxu1  ;;  %v7477_v26 = vpop.f32.mrb[5].mxu0 }
 0x1ce   :  { %9839 = vst [vmem:[#allocation17_spill] sm:$0xff] %v7475_v25 }
 0x1d0   :  { %v5922_v29 = vpop.f32.mrb[6].mxu1  ;;  %v7486_v30 = vpop.f32.mrb[6].mxu0 }
 0x1d1   :  { %v779_v32 = vadd.f32 %v5922_v29, %v7463_v19  ;;  %v689_v33 = vpop.f32.mrb[7].mxu1  ;;  %v7491_v34 = vpop.f32.mrb[7].mxu0 }
 0x1d2   :  { %v778_v37 = vadd.f32 %v689_v33, %v7467_v21 }
 0x1d3   :  { %v911_v39 = vadd.f32 %v893_v31, %v779_v32  ;;  %v897_v31 = vmul.f32 %v7482_v27, %v7457_v16 }
 0x1d4   :  { %v910_v41 = vadd.f32 %v892_v36, %v778_v37  ;;  %v5925_v42 = vpop.f32.mrb[8].mxu1  ;;  %v7500_v43 = vpop.f32.mrb[8].mxu0 }
 0x1d5   :  { %v947_v45 = vmul.f32 0.2, %v911_v39  ;;  %v781_v46 = vadd.f32 %v5925_v42, %v7473_v24  ;;  %v699_v48 = vpop.f32.mrb[9].mxu1  ;;  %v7505_v50 = vpop.f32.mrb[9].mxu0  ;;  %vm929_vm7 = vcmp.gt.f32.partialorder %v911_v39, 0.0 }
 0x1d6   :  { %v946_v52 = vmul.f32 0.2, %v910_v41  ;;  %v780_v54 = vadd.f32 %v699_v48, %v7477_v26  ;;  %vm928_vm8 = vcmp.gt.f32.partialorder %v910_v41, 0.0 }
 0x1d7   :  { %v913_v58 = vadd.f32 %v895_v44, %v781_v46  ;;  %v965_v32 = vsel %vm929_vm7, %v911_v39, %v947_v45  ;;  %v898_v39 = vmul.f32 %v7482_v27, %v7459_v17 }
 0x1d8   :  { %v912_v62 = vadd.f32 %v894_v40, %v780_v54  ;;  %v5928_v0 = vpop.f32.mrb[10].mxu1  ;;  %v964_v2 = vsel %vm928_vm8, %v910_v41, %v946_v52  ;;  %v7512_v29 = vpop.f32.mrb[10].mxu0 }
 0x1d9   :  { %v949_v33 = vmul.f32 0.2, %v913_v58  ;;  %v783_v36 = vadd.f32 %v5928_v0, %v7486_v30  ;;  %v709_v37 = vpop.f32.mrb[11].mxu1  ;;  %5951 = vmatprep.mubr.msk.f32.mxu0 %vm982_vm6, %v964_v2  ;;  %v7518_v42 = vpop.f32.mrb[11].mxu0  ;;  %vm931_vm10 = vcmp.gt.f32.partialorder %v913_v58, 0.0  ;;  %v899_v0 = vmul.f32 %v7482_v27, %v7469_v22 }
 0x1da   :  { %v948_v44 = vmul.f32 0.2, %v912_v62  ;;  %v782_v46 = vadd.f32 %v709_v37, %v7491_v34  ;;  %5952 = vmatmul.mubr.msk.f32.vlgmr.msra.gmra.mrb[16].mxu0 %vm982_vm6, %v965_v32  ;;  %vm930_vm9 = vcmp.gt.f32.partialorder %v912_v62, 0.0  ;;  %v7522_v40 = vpop.permute.xlu1 %853 }
 0x1db   :  { %9844 = vst [vmem:[#allocation21_spill] sm:$0xff] %v7522_v40  ;;  %v915_v41 = vadd.f32 %v897_v31, %v783_v36  ;;  %v967_v16 = vsel %vm931_vm10, %v913_v58, %v949_v33  ;;  %v901_v58 = vmul.f32 %v7482_v27, %v7496_v38 }
 0x1dc   :  { %v914_v45 = vadd.f32 %v896_v60, %v782_v46  ;;  %v5931_v48 = vpop.f32.mrb[12].mxu1  ;;  %v966_v52 = vsel %vm930_vm9, %v912_v62, %v948_v44  ;;  %v7526_v54 = vpop.f32.mrb[12].mxu0  ;;  %v900_v44 = vmul.f32 %v7482_v27, %v7484_v28 }
 0x1dd   :  { %v951_v2 = vmul.f32 0.2, %v915_v41  ;;  %v785_v37 = vadd.f32 %v5931_v48, %v7500_v43  ;;  %v719_v32 = vpop.f32.mrb[13].mxu1  ;;  %5954 = vmatprep.mubr.msk.f32.mxu0 %vm982_vm6, %v966_v52  ;;  %v7532_v15 = vpop.f32.mrb[13].mxu0  ;;  %vm933_vm12 = vcmp.gt.f32.partialorder %v915_v41, 0.0 }
 0x1de   :  { %v950_v31 = vmul.f32 0.2, %v914_v45  ;;  %v784_v36 = vadd.f32 %v719_v32, %v7505_v50  ;;  %5955 = vmatmul.mubr.msk.f32.gmra.mrb[18].mxu0 %vm982_vm6, %v967_v16  ;;  %vm932_vm11 = vcmp.gt.f32.partialorder %v914_v45, 0.0  ;;  %v7536_v60 = vpop.permute.xlu0 %858 }
 0x1df   :  { %9845 = vst [vmem:[#allocation22_spill] sm:$0xff] %v7536_v60  ;;  %v917_v62 = vadd.f32 %v899_v0, %v785_v37  ;;  %v969_v17 = vsel %vm933_vm12, %v915_v41, %v951_v2  ;;  %v7548_v0 = vpop.permute.xlu1 %863  ;;  %vm1192_vm12 = vcmask 7168  }
 0x1e0   :  { %v916_v46 = vadd.f32 %v898_v39, %v784_v36  ;;  %v5934_v48 = vpop.f32.mrb[14].mxu1  ;;  %v968_v22 = vsel %vm932_vm11, %v914_v45, %v950_v31  ;;  %v7540_v52 = vpop.f32.mrb[14].mxu0  ;;  %9848 = vst [vmem:[#allocation25_spill] sm:$0xff] %v7548_v0  ;;  %v902_v31 = vmul.f32 %v7482_v27, %v7508_v56 }
 0x1e1   :  { %9846 = vst [vmem:[#allocation23_spill] sm:$0xff] %v7540_v52  ;;  %v953_v33 = vmul.f32 0.2, %v917_v62  ;;  %v787_v32 = vadd.f32 %v5934_v48, %v7512_v29  ;;  %v729_v16 = vpop.f32.mrb[15].mxu1  ;;  %5957 = vmatprep.mubr.msk.f32.mxu0 %vm982_vm6, %v968_v22  ;;  %v7546_v14 = vpop.f32.mrb[15].mxu0  ;;  %vm935_vm14 = vcmp.gt.f32.partialorder %v917_v62, 0.0  ;;  %v903_v22 = vmul.f32 %v7482_v27, %v7522_v40 }
 0x1e2   :  { %9847 = vst [vmem:[#allocation24_spill] sm:$0xff] %v7546_v14  ;;  %v952_v37 = vmul.f32 0.2, %v916_v46  ;;  %v786_v39 = vadd.f32 %v729_v16, %v7518_v42  ;;  %5958 = vmatmul.mubr.msk.f32.gmra.mrb[20].mxu0 %vm982_vm6, %v969_v17  ;;  %vm934_vm13 = vcmp.gt.f32.partialorder %v916_v46, 0.0 }
 0x1e3   :  { %v919_v45 = vadd.f32 %v901_v58, %v787_v32  ;;  %v971_v16 = vsel %vm935_vm14, %v917_v62, %v953_v33  ;;  %v904_v58 = vmul.f32 %v7482_v27, %v7536_v60  ;;  %v7564_v32 = vpop.permute.xlu1 %873 }
 0x1e4   :  { %v918_v36 = vadd.f32 %v900_v44, %v786_v39  ;;  %v5937_v48 = vpop.f32.mrb[16].mxu1  ;;  %v970_v38 = vsel %vm934_vm13, %v916_v46, %v952_v37  ;;  %v7560_v44 = vpop.permute.xlu0 %868  ;;  %9850 = vst [vmem:[#allocation27_spill] sm:$0xff] %v7564_v32 }
 0x1e5   :  { %v955_v41 = vmul.f32 0.2, %v919_v45  ;;  %v789_v2 = vadd.f32 %v5937_v48, %v7526_v54  ;;  %v739_v28 = vpop.f32.mrb[17].mxu1  ;;  %5960 = vmatprep.mubr.msk.f32.mxu0 %vm982_vm6, %v970_v38  ;;  %vm937_vm0 = vcmp.gt.f32.partialorder %v919_v45, 0.0  ;;  %9849 = vst [vmem:[#allocation26_spill] sm:$0xff] %v7560_v44  ;;  %v905_v38 = vmul.f32 %v7482_v27, %v7548_v0 }
 0x1e6   :  { %v954_v17 = vmul.f32 0.2, %v918_v36  ;;  %v788_v12 = vadd.f32 %v739_v28, %v7532_v15  ;;  %5961 = vmatmul.mubr.msk.f32.gmra.mrb[22].mxu0 %vm982_vm6, %v971_v16  ;;  %vm936_vm15 = vcmp.gt.f32.partialorder %v918_v36, 0.0 }
 0x1e7   :  { %v921_v46 = vadd.f32 %v903_v22, %v789_v2  ;;  %v973_v16 = vsel %vm937_vm0, %v919_v45, %v955_v41 }
 0x1e8   :  { %v920_v37 = vadd.f32 %v902_v31, %v788_v12  ;;  %v5940_v39 = vpop.f32.mrb[18].mxu1  ;;  %v972_v48 = vsel %vm936_vm15, %v918_v36, %v954_v17  ;;  %v906_v31 = vmul.f32 %v7482_v27, %v7560_v44  ;;  %v7576_v0 = vpop.permute.xlu0 %878 }
 0x1e9   :  { %v957_v62 = vmul.f32 0.2, %v921_v46  ;;  %v791_v28 = vadd.f32 %v5940_v39, %v7540_v52  ;;  %v749_v33 = vpop.f32.mrb[19].mxu1  ;;  %5963 = vmatprep.mubr.msk.f32.mxu0 %vm982_vm6, %v972_v48  ;;  %vm939_vm3 = vcmp.gt.f32.partialorder %v921_v46, 0.0  ;;  %v907_v39 = vmul.f32 %v7482_v27, %v7564_v32  ;;  %9851 = vst [vmem:[#allocation28_spill] sm:$0xff] %v7576_v0 }
 0x1ea   :  { %v956_v40 = vmul.f32 0.2, %v920_v37  ;;  %v790_v22 = vadd.f32 %v749_v33, %v7546_v14  ;;  %5964 = vmatmul.mubr.msk.f32.gmra.mrb[24].mxu0 %vm982_vm6, %v973_v16  ;;  %vm938_vm1 = vcmp.gt.f32.partialorder %v920_v37, 0.0  ;;  %v7580_v16 = vpop.permute.xlu1 %883 }
 0x1eb   :  { %v923_v12 = vadd.f32 %v905_v38, %v791_v28  ;;  %v975_v33 = vsel %vm939_vm3, %v921_v46, %v957_v62  ;;  %9852 = vst [vmem:[#allocation29_spill] sm:$0xff] %v7580_v16 }
 0x1ec   :  { %v922_v36 = vadd.f32 %v904_v58, %v790_v22  ;;  %v5943_v2 = vpop.f32.mrb[20].mxu1  ;;  %v974_v17 = vsel %vm938_vm1, %v920_v37, %v956_v40  ;;  %v908_v58 = vmul.f32 %v7482_v27, %v7576_v0 }
 0x1ed   :  { %v959_v45 = vmul.f32 0.2, %v923_v12  ;;  %v793_v41 = vadd.f32 %v5943_v2, %v7461_v18  ;;  %v759_v48 = vpop.f32.mrb[21].mxu1  ;;  %5966 = vmatprep.mubr.msk.f32.mxu0 %vm982_vm6, %v974_v17  ;;  %vm941_vm7 = vcmp.gt.f32.partialorder %v923_v12, 0.0  ;;  %v909_v17 = vmul.f32 %v7482_v27, %v7580_v16 }
 0x1ee   :  { %v958_v38 = vmul.f32 0.2, %v922_v36  ;;  %v792_v28 = vadd.f32 %v759_v48, %v7465_v20  ;;  %5967 = vmatmul.mubr.msk.f32.gmra.mrb[26].mxu0 %vm982_vm6, %v975_v33  ;;  %vm940_vm4 = vcmp.gt.f32.partialorder %v922_v36, 0.0 }
 0x1ef   :  { %v925_v40 = vadd.f32 %v907_v39, %v793_v41  ;;  %v977_v48 = vsel %vm941_vm7, %v923_v12, %v959_v45 }
 0x1f0   :  { %v924_v37 = vadd.f32 %v906_v31, %v792_v28  ;;  %v5946_v22 = vpop.f32.mrb[22].mxu1  ;;  %v976_v2 = vsel %vm940_vm4, %v922_v36, %v958_v38 }
 0x1f1   :  { %v961_v46 = vmul.f32 0.2, %v925_v40  ;;  %v795_v62 = vadd.f32 %v5946_v22, %v7471_v23  ;;  %v769_v32 = vpop.f32.mrb[23].mxu1  ;;  %5969 = vmatprep.mubr.msk.f32.mxu0 %vm982_vm6, %v976_v2  ;;  %vm943_vm9 = vcmp.gt.f32.partialorder %v925_v40, 0.0 }
 0x1f2   :  { %v960_v33 = vmul.f32 0.2, %v924_v37  ;;  %v794_v44 = vadd.f32 %v769_v32, %v7475_v25  ;;  %5970 = vmatmul.mubr.msk.f32.gmra.mrb[28].mxu0 %vm982_vm6, %v977_v48  ;;  %vm942_vm8 = vcmp.gt.f32.partialorder %v924_v37, 0.0 }
 0x1f3   :  { %v927_v31 = vadd.f32 %v909_v17, %v795_v62  ;;  %v979_v27 = vsel %vm943_vm9, %v925_v40, %v961_v46 }
 0x1f4   :  { %v926_v39 = vadd.f32 %v908_v58, %v794_v44  ;;  %v978_v36 = vsel %vm942_vm8, %v924_v37, %v960_v33 }
 0x1f5   :  { %v963_v41 = vmul.f32 0.2, %v927_v31  ;;  %5972 = vmatprep.mubr.msk.f32.mxu0 %vm982_vm6, %v978_v36  ;;  %vm945_vm11 = vcmp.gt.f32.partialorder %v927_v31, 0.0 }
 0x1f6   :  { %v962_v38 = vmul.f32 0.2, %v926_v39  ;;  %5973 = vmatmul.mubr.msk.f32.gmra.mrb[30].mxu0 %vm982_vm6, %v979_v27  ;;  %vm944_vm10 = vcmp.gt.f32.partialorder %v926_v39, 0.0 }
 0x1f7   :  { %v981_v32 = vsel %vm945_vm11, %v927_v31, %v963_v41 }
 0x1f8   :  { %v980_v12 = vsel %vm944_vm10, %v926_v39, %v962_v38 }
 0x1f9   :  { %5975 = vmatprep.mubr.msk.f32.mxu0 %vm982_vm6, %v980_v12 }
 0x1fa   :  { %5976 = vmatmul.mubr.msk.f32.gmra.mrb[32].mxu0 %vm982_vm6, %v981_v32 }
 0x2ad   :  { %v7596_v45 = vpop.f32.mrb[16].mxu0 }
 0x2ae   :  { %v7598_v28 = vpop.f32.mrb[17].mxu0  ;;  %v1194_v37 = vsel %vm1192_vm12, %v7596_v45, -inf }
 0x2af   :  { %v1193_v17 = vsel %vm1192_vm12, %v7598_v28, -inf }
 0x2b1   :  { %v7600_v44 = vpop.f32.mrb[18].mxu0 }
 0x2b2   :  { %v7602_v58 = vpop.f32.mrb[19].mxu0  ;;  %v1196_v31 = vsel %vm1192_vm12, %v7600_v44, -inf }
 0x2b3   :  { %v1195_v41 = vsel %vm1192_vm12, %v7602_v58, -inf }
 0x2b5   :  { %v7604_v40 = vpop.f32.mrb[20].mxu0 }
 0x2b6   :  { %v1199_v22 = vsel %vm1192_vm12, %v7604_v40, -inf  ;;  %v7610_v2 = vpop.f32.mrb[21].mxu0 }
 0x2b7   :  { %v1200_v46 = vmax.f32 %v1194_v37, %v1199_v22  ;;  %v1197_v62 = vsel %vm1192_vm12, %v7610_v2, -inf }
 0x2b8   :  { %v1198_v48 = vmax.f32 %v1193_v17, %v1197_v62 }
 0x2b9   :  { %v7616_v33 = vpop.f32.mrb[22].mxu0 }
 0x2ba   :  { %v1203_v39 = vsel %vm1192_vm12, %v7616_v33, -inf  ;;  %v7622_v36 = vpop.f32.mrb[23].mxu0 }
 0x2bb   :  { %v1204_v27 = vmax.f32 %v1196_v31, %v1203_v39  ;;  %v1201_v38 = vsel %vm1192_vm12, %v7622_v36, -inf }
 0x2bc   :  { %v1202_v12 = vmax.f32 %v1195_v41, %v1201_v38 }
 0x2bd   :  { %v7628_v32 = vpop.f32.mrb[24].mxu0 }
 0x2be   :  { %v1207_v37 = vsel %vm1192_vm12, %v7628_v32, -inf  ;;  %v7632_v22 = vpop.f32.mrb[25].mxu0 }
 0x2bf   :  { %v1208_v17 = vmax.f32 %v1200_v46, %v1207_v37  ;;  %v1205_v62 = vsel %vm1192_vm12, %v7632_v22, -inf }
 0x2c0   :  { %v1206_v16 = vmax.f32 %v1198_v48, %v1205_v62 }
 0x2c1   :  { %v7636_v0 = vpop.f32.mrb[26].mxu0 }
 0x2c2   :  { %v1211_v31 = vsel %vm1192_vm12, %v7636_v0, -inf  ;;  %v7640_v39 = vpop.f32.mrb[27].mxu0 }
 0x2c3   :  { %v1212_v41 = vmax.f32 %v1204_v27, %v1211_v31  ;;  %v1209_v38 = vsel %vm1192_vm12, %v7640_v39, -inf }
 0x2c4   :  { %v1210_v60 = vmax.f32 %v1202_v12, %v1209_v38 }
 0x2c5   :  { %v7644_v56 = vpop.f32.mrb[28].mxu0 }
 0x2c6   :  { %v1215_v46 = vsel %vm1192_vm12, %v7644_v56, -inf  ;;  %v7648_v37 = vpop.f32.mrb[29].mxu0 }
 0x2c7   :  { %v1216_v48 = vmax.f32 %v1208_v17, %v1215_v46  ;;  %v1213_v62 = vsel %vm1192_vm12, %v7648_v37, -inf }
 0x2c8   :  { %v1214_v11 = vmax.f32 %v1206_v16, %v1213_v62 }
 0x2c9   :  { %v7652_v13 = vpop.f32.mrb[30].mxu0 }
 0x2ca   :  { %v1219_v27 = vsel %vm1192_vm12, %v7652_v13, -inf  ;;  %v7656_v31 = vpop.f32.mrb[31].mxu0 }
 0x2cb   :  { %v1220_v12 = vmax.f32 %v1212_v41, %v1219_v27  ;;  %v1217_v38 = vsel %vm1192_vm12, %v7656_v31, -inf  ;;  %v9757_v41 = vmov 0.0|0.0  }
 0x2cc   :  { %v1218_v25 = vmax.f32 %v1210_v60, %v1217_v38  ;;  %6378 = vmatprep.subr.bf16.mxu1 %v9757_v41  ;;  %6411 = vmatprep.subr.bf16.mxu0 %v9757_v41  ;;  %v7673_v60 = vld [vmem:[%s9853_s3 + $0x8] sm:$0xff] }
 0x2cd   :  { %v7660_v23 = vpop.f32.mrb[32].mxu0  ;;  %5343 = vmatprep.mubr.msk.f32.mxu1 %vm982_vm6, %v7673_v60  ;;  %5365 = vmatprep.mubr.msk.f32.mxu0 %vm982_vm6, %v7673_v60 }
 0x2ce   :  { %v1223_v17 = vsel %vm1192_vm12, %v7660_v23, -inf  ;;  %v7664_v46 = vpop.f32.mrb[33].mxu0  ;;  %v1226_v16 = vmax.f32 %v1218_v25, %v1220_v12 }
 0x2cf   :  { %v1224_v62 = vmax.f32 %v1216_v48, %v1223_v17  ;;  %v1221_v20 = vsel %vm1192_vm12, %v7664_v46, -inf }
 0x2d0   :  { %v1222_v18 = vmax.f32 %v1214_v11, %v1221_v20 }
 0x2d2   :  { %v1225_v14 = vmax.f32 %v1222_v18, %v1224_v62 }
 0x2d4   :  { %v1227_v52 = vmax.f32 %v1225_v14, %v1226_v16 }
 0x2d6   :  { %1228 = vmax.xlane.f32.xlu0 %v1227_v52 }
 0x363   :  { %v1229_v11 = vpop.xlane.xlu0 %1228 }
 0x364   :  { %v1230_v18 = vrot.slane %v1229_v11, 4 }
 0x366   :  { %v1231_v14 = vmax.f32 %v1229_v11, %v1230_v18 }
 0x368   :  { %v1232_v20 = vrot.slane %v1231_v14, 2 }
 0x36a   :  { %v1233_v25 = vmax.f32 %v1231_v14, %v1232_v20 }
 0x36c   :  { %v1234_v52 = vrot.slane %v1233_v25, 1 }
 0x36e   :  { %v1235_v48 = vmax.f32 %v1233_v25, %v1234_v52 }
 0x370   :  { %6725 = vpush %v1235_v48 }
 0x3a1   :  { %s6726_s6 = spop %6725 }
 0x3a2   :  { %v7679_v27 = vstv %s6726_s6 }
 0x3a3   :  { %v1238_v12 = vsub.f32 %v7598_v28, %v7679_v27  ;;  %v1239_v38 = vsub.f32 %v7596_v45, %v7679_v27  ;;  %v1240_v17 = vsub.f32 %v7602_v58, %v7679_v27  ;;  %v1241_v16 = vsub.f32 %v7600_v44, %v7679_v27 }
 0x3a4   :  { %v1242_v62 = vsub.f32 %v7610_v2, %v7679_v27  ;;  %v1243_v11 = vsub.f32 %v7604_v40, %v7679_v27  ;;  %v1244_v45 = vsub.f32 %v7622_v36, %v7679_v27  ;;  %v1245_v44 = vsub.f32 %v7616_v33, %v7679_v27  ;;  %v90_v36 = vld [vmem:[%s9854_s11] sm:$0xff] }
 0x3a5   :  { %v1256_v18 = vmul.f32 1.442695, %v1238_v12  ;;  %v1258_v14 = vmul.f32 1.442695, %v1239_v38  ;;  %v1260_v20 = vmul.f32 1.442695, %v1240_v17  ;;  %v1246_v40 = vsub.f32 %v7632_v22, %v7679_v27 }
 0x3a6   :  { %v1262_v25 = vmul.f32 1.442695, %v1241_v16  ;;  %v1264_v28 = vmul.f32 1.442695, %v1242_v62  ;;  %v1266_v58 = vmul.f32 1.442695, %v1243_v11  ;;  %v1247_v48 = vsub.f32 %v7628_v32, %v7679_v27 }
 0x3a7   :  { %6741 = vpow2.f32 %v1256_v18  ;;  %v1268_v2 = vmul.f32 1.442695, %v1244_v45  ;;  %v1270_v52 = vmul.f32 1.442695, %v1245_v44  ;;  %v1272_v12 = vmul.f32 1.442695, %v1246_v40 }
 0x3a8   :  { %6743 = vpow2.f32 %v1258_v14  ;;  %v1248_v33 = vsub.f32 %v7640_v39, %v7679_v27  ;;  %v91_v38 = vld [vmem:[%s9854_s11 + $0x8] sm:$0xff]  ;;  %v1274_v22 = vmul.f32 1.442695, %v1247_v48  ;;  %v1249_v17 = vsub.f32 %v7636_v0, %v7679_v27  ;;  %v92_v11 = vld [vmem:[%s9854_s11 + $0x10] sm:$0xff]  ;;  %v93_v39 = vld [vmem:[%s9854_s11 + $0x18] sm:$0xff] }
 0x3a9   :  { %6745 = vpow2.f32 %v1260_v20  ;;  %v1250_v0 = vsub.f32 %v7648_v37, %v7679_v27  ;;  %v1251_v45 = vsub.f32 %v7644_v56, %v7679_v27  ;;  %v94_v48 = vld [vmem:[%s9854_s11 + $0x20] sm:$0xff]  ;;  %v95_v37 = vld [vmem:[%s9854_s11 + $0x28] sm:$0xff] }
 0x3aa   :  { %6747 = vpow2.f32 %v1262_v25  ;;  %v1276_v20 = vmul.f32 1.442695, %v1248_v33  ;;  %v1253_v33 = vsub.f32 %v7652_v13, %v7679_v27 }
 0x3ab   :  { %6749 = vpow2.f32 %v1264_v28  ;;  %v1278_v28 = vmul.f32 1.442695, %v1249_v17  ;;  %v1280_v56 = vmul.f32 1.442695, %v1250_v0 }
 0x3ac   :  { %6751 = vpow2.f32 %v1266_v58 }
 0x3ad   :  { %6753 = vpow2.f32 %v1268_v2 }
 0x3ae   :  { %6755 = vpow2.f32 %v1270_v52 }
 0x3af   :  { %6757 = vpow2.f32 %v1272_v12  ;;  %v1282_v12 = vmul.f32 1.442695, %v1251_v45 }
 0x3b0   :  { %6759 = vpow2.f32 %v1274_v22 }
 0x3b1   :  { %v6742_v16 = vpop.eup %6741  ;;  %6761 = vpow2.f32 %v1276_v20  ;;  %v1255_v20 = vsub.f32 %v7660_v23, %v7679_v27 }
 0x3b2   :  { %v6744_v32 = vpop.eup %6743  ;;  %v7711_v62 = vmul.f32 %v6742_v16, %v90_v36  ;;  %v1252_v36 = vsub.f32 %v7656_v31, %v7679_v27  ;;  %6763 = vpow2.f32 %v1278_v28  ;;  %v96_v31 = vld [vmem:[%s9854_s11 + $0x30] sm:$0xff] }
 0x3b3   :  { %v6746_v18 = vpop.eup %6745  ;;  %v7719_v14 = vmul.f32 %v6744_v32, %v91_v38  ;;  %6765 = vpow2.f32 %v1280_v56 }
 0x3b4   :  { %v6748_v25 = vpop.eup %6747  ;;  %v7727_v2 = vmul.f32 %v6746_v18, %v92_v11  ;;  %v97_v11 = vld [vmem:[%s9854_s11 + $0x38] sm:$0xff]  ;;  %v1284_v13 = vmul.f32 1.442695, %v1252_v36  ;;  %6767 = vpow2.f32 %v1282_v12  ;;  %v1286_v18 = vmul.f32 1.442695, %v1253_v33  ;;  %v100_v12 = vld [vmem:[%s9854_s11 + $0x50] sm:$0xff] }
 0x3b5   :  { %v6750_v58 = vpop.eup %6749  ;;  %v6379_v44 = vpack.c.bf16 %v7719_v14, %v7711_v62  ;;  %v7729_v40 = vmul.f32 %v6748_v25, %v93_v39  ;;  %v1254_v39 = vsub.f32 %v7664_v46, %v7679_v27  ;;  %v98_v46 = vld [vmem:[%s9854_s11 + $0x40] sm:$0xff]  ;;  %v1290_v27 = vmul.f32 1.442695, %v1255_v20  ;;  %v101_v33 = vld [vmem:[%s9854_s11 + $0x58] sm:$0xff] }
 0x3b6   :  { %v6752_v52 = vpop.eup %6751  ;;  %v7744_v17 = vmul.f32 %v6750_v58, %v94_v48  ;;  %6769 = vpow2.f32 %v1284_v13  ;;  %v102_v13 = vld [vmem:[%s9854_s11 + $0x60] sm:$0xff] }
 0x3b7   :  { %6380 = vmatpush1.bf16.msra.mxu1 %v6379_v44  ;;  %v6754_v38 = vpop.eup %6753  ;;  %v6382_v22 = vpack.c.bf16 %v7729_v40, %v7727_v2  ;;  %v7746_v16 = vmul.f32 %v6752_v52, %v95_v37  ;;  %v99_v44 = vld [vmem:[%s9854_s11 + $0x48] sm:$0xff]  ;;  %v1288_v23 = vmul.f32 1.442695, %v1254_v39  ;;  %6771 = vpow2.f32 %v1286_v18 }
 0x3b8   :  { %6381 = vmatprep.subr.bf16.mxu1 %v9757_v41  ;;  %v6756_v32 = vpop.eup %6755  ;;  %v7761_v28 = vmul.f32 %v6754_v38, %v96_v31  ;;  %v103_v39 = vld [vmem:[%s9854_s11 + $0x68] sm:$0xff] }
 0x3b9   :  { %v6758_v0 = vpop.eup %6757  ;;  %v6385_v25 = vpack.c.bf16 %v7746_v16, %v7744_v17  ;;  %v7763_v45 = vmul.f32 %v6756_v32, %v97_v11  ;;  %6773 = vpow2.f32 %v1288_v23 }
 0x3ba   :  { %v6760_v58 = vpop.eup %6759  ;;  %v7774_v37 = vmul.f32 %v6758_v0, %v98_v46  ;;  %6775 = vpow2.f32 %v1290_v27  ;;  %v104_v46 = vld [vmem:[%s9854_s11 + $0x70] sm:$0xff] }
 0x3bb   :  { %6383 = vmatpush1.bf16.msra.mxu1 %v6382_v22  ;;  %v6762_v52 = vpop.eup %6761  ;;  %v6388_v48 = vpack.c.bf16 %v7763_v45, %v7761_v28  ;;  %v7776_v56 = vmul.f32 %v6760_v58, %v99_v44  ;;  %v105_v44 = vld [vmem:[%s9854_s11 + $0x78] sm:$0xff] }
 0x3bc   :  { %6384 = vmatprep.subr.bf16.mxu1 %v9757_v41  ;;  %v6764_v36 = vpop.eup %6763  ;;  %v7787_v32 = vmul.f32 %v6762_v52, %v100_v12  ;;  %v106_v12 = vld [vmem:[%s9854_s11 + $0x80] sm:$0xff] }
 0x3bd   :  { %v6766_v38 = vpop.eup %6765  ;;  %v6391_v22 = vpack.c.bf16 %v7776_v56, %v7774_v37  ;;  %v7789_v31 = vmul.f32 %v6764_v36, %v101_v33  ;;  %v107_v33 = vld [vmem:[%s9854_s11 + $0x88] sm:$0xff] }
 0x3be   :  { %v6768_v11 = vpop.eup %6767  ;;  %v7800_v0 = vmul.f32 %v6766_v38, %v102_v13 }
 0x3bf   :  { %6386 = vmatpush1.bf16.msra.mxu1 %v6385_v25  ;;  %v6394_v20 = vpack.c.bf16 %v7789_v31, %v7787_v32  ;;  %v7802_v25 = vmul.f32 %v6768_v11, %v103_v39  ;;  %v7836_v39 = vld [vmem:[%s9853_s3] sm:$0xff] }
 0x3c0   :  { %6387 = vmatprep.subr.bf16.mxu1 %v9757_v41  ;;  %v6770_v18 = vpop.eup %6769 }
 0x3c1   :  { %v6772_v58 = vpop.eup %6771  ;;  %v6397_v27 = vpack.c.bf16 %v7802_v25, %v7800_v0  ;;  %v7813_v52 = vmul.f32 %v6770_v18, %v104_v46  ;;  %v7841_v18 = vld [vmem:[%s9853_s3 + $0x18] sm:$0xf] }
 0x3c3   :  { %6389 = vmatpush1.bf16.msra.mxu1 %v6388_v48  ;;  %v6774_v23 = vpop.eup %6773  ;;  %v7815_v48 = vmul.f32 %v6772_v58, %v105_v44 }
 0x3c4   :  { %6390 = vmatprep.subr.bf16.mxu1 %v9757_v41  ;;  %v6776_v36 = vpop.eup %6775 }
 0x3c5   :  { %v6400_v38 = vpack.c.bf16 %v7815_v48, %v7813_v52  ;;  %v7828_v11 = vmul.f32 %v6776_v36, %v107_v33 }
 0x3c7   :  { %6392 = vmatpush1.bf16.msra.mxu1 %v6391_v22  ;;  %v7826_v22 = vmul.f32 %v6774_v23, %v106_v12 }
 0x3c8   :  { %6393 = vmatprep.subr.bf16.mxu1 %v9757_v41 }
 0x3c9   :  { %v6403_v13 = vpack.c.bf16 %v7828_v11, %v7826_v22 }
 0x3cb   :  { %6395 = vmatpush1.bf16.msra.mxu1 %v6394_v20  ;;  %v7849_v20 = vld [vmem:[%s9853_s3 + $0x10] sm:$0xf] }
 0x3cc   :  { %6396 = vmatprep.subr.bf16.mxu1 %v9757_v41 }
 0x3cf   :  { %6398 = vmatpush1.bf16.msra.mxu1 %v6397_v27 }
 0x3d0   :  { %6399 = vmatprep.subr.bf16.mxu1 %v9757_v41 }
 0x3d3   :  { %6401 = vmatpush1.bf16.msra.mxu1 %v6400_v38 }
 0x3d4   :  { %6402 = vmatprep.subr.bf16.mxu1 %v9757_v41 }
 0x3d7   :  { %6404 = vmatpush1.bf16.msra.mxu1 %v6403_v13 }
 0x3da   :  { %1381 = vmatmul.mubr.f32.vlgmr.msra.gmra.mrb[24].mxu1 %v7836_v39 }
 0x3db   :  { %5344 = vmatprep.mubr.msk.f32.mxu1 %vm982_vm6, %v7841_v18 }
 0x3de   :  { %1386 = vmatmul.mubr.f32.gmra.mrb[26].mxu1 %v7849_v20 }
 0x3df   :  { %5982 = vmatprep.mubr.msk.f32.mxu1 %vm352_vm2, %v7281_v47 }
 0x4ad   :  { %v1382_v58 = vpop.f32.mrb[24].mxu1 }
 0x4ae   :  { %v1384_v46 = vpop.f32.mrb[25].mxu1  ;;  %v1391_v44 = vmax.f32 %v1382_v58, 1e-30 }
 0x4b0   :  { %6777 = vrcp.f32 %v1391_v44 }
 0x4b1   :  { %v1387_v23 = vpop.f32.mrb[26].mxu1 }
 0x4b2   :  { %v1392_v27 = vmax.f32 %v1387_v23, 1e-30  ;;  %v1389_v36 = vpop.f32.mrb[27].mxu1 }
 0x4b4   :  { %6779 = vrcp.f32 %v1392_v27 }
 0x4ba   :  { %v6778_v12 = vpop.eup %6777 }
 0x4be   :  { %v6780_v33 = vpop.eup %6779 }
 0x4bf   :  { %v6405_v38 = vpack.c.bf16 %v6780_v33, %v6778_v12 }
 0x4c1   :  { %6407 = vmatprep.subr.msk.bf16.mxu1 %vm7241_vm5, %v6405_v38 }
 0x4c2   :  { %6410 = vmatpush3.bf16.msk.msra.mxu1 %vm7241_vm5, %v6405_v38 }
 0x4c5   :  { %5983 = vmatmul.mubr.msk.f32.vlgmr.msra.gmra.mrb[28].mxu1 %vm352_vm2, %v7294_v49 }
 0x4c6   :  { %5985 = vmatprep.mubr.msk.f32.mxu1 %vm352_vm2, %v7303_v51 }
 0x4c9   :  { %5986 = vmatmul.mubr.msk.f32.gmra.mrb[30].mxu1 %vm352_vm2, %v7316_v53 }
 0x4ca   :  { %5988 = vmatprep.mubr.msk.f32.mxu1 %vm352_vm2, %v7325_v55 }
 0x4cd   :  { %5989 = vmatmul.mubr.msk.f32.gmra.mrb[32].mxu1 %vm352_vm2, %v7338_v57 }
 0x4ce   :  { %5991 = vmatprep.mubr.msk.f32.mxu1 %vm352_vm2, %v7347_v59 }
 0x4d1   :  { %5992 = vmatmul.mubr.msk.f32.gmra.mrb[34].mxu1 %vm352_vm2, %v7360_v61 }
 0x4d2   :  { %5994 = vmatprep.mubr.msk.f32.mxu1 %vm352_vm2, %v7369_v63 }
 0x4d5   :  { %5995 = vmatmul.mubr.msk.f32.gmra.mrb[36].mxu1 %vm352_vm2, %v7382_v1 }
 0x4d6   :  { %5997 = vmatprep.mubr.msk.f32.mxu1 %vm352_vm2, %v7391_v3 }
 0x4d9   :  { %5998 = vmatmul.mubr.msk.f32.gmra.mrb[38].mxu1 %vm352_vm2, %v7401_v4 }
 0x4da   :  { %6000 = vmatprep.mubr.msk.f32.mxu1 %vm352_vm2, %v7406_v5 }
 0x4dd   :  { %6001 = vmatmul.mubr.msk.f32.gmra.mrb[40].mxu1 %vm352_vm2, %v7415_v6 }
 0x4de   :  { %6003 = vmatprep.mubr.msk.f32.mxu1 %vm352_vm2, %v7420_v7 }
 0x4e1   :  { %6004 = vmatmul.mubr.msk.f32.gmra.mrb[42].mxu1 %vm352_vm2, %v7429_v8 }
 0x4e2   :  { %6006 = vmatprep.mubr.msk.f32.mxu1 %vm352_vm2, %v7434_v9 }
 0x4e5   :  { %6007 = vmatmul.mubr.msk.f32.gmra.mrb[44].mxu1 %vm352_vm2, %v7443_v10 }
 0x598   :  { %v5984_v47 = vpop.f32.mrb[28].mxu1 }
 0x599   :  { %v1554_v49 = vmul.f32 %v5984_v47, %v7719_v14  ;;  %v1464_v51 = vpop.f32.mrb[29].mxu1 }
 0x59a   :  { %v1553_v55 = vmul.f32 %v1464_v51, %v7711_v62 }
 0x59b   :  { %1578 = vperm.xlu1 %6740, %v1554_v49  }
 0x59c   :  { %v5987_v53 = vpop.f32.mrb[30].mxu1 }
 0x59d   :  { %v1474_v57 = vpop.f32.mrb[31].mxu1  ;;  %v1556_v61 = vmul.f32 %v5987_v53, %v7729_v40 }
 0x59e   :  { %v1555_v3 = vmul.f32 %v1474_v57, %v7727_v2 }
 0x59f   :  { %1573 = vperm.xlu1 %6740, %v1553_v55  }
 0x5a0   :  { %v5990_v59 = vpop.f32.mrb[32].mxu1 }
 0x5a1   :  { %v1484_v63 = vpop.f32.mrb[33].mxu1  ;;  %v1558_v6 = vmul.f32 %v5990_v59, %v7746_v16 }
 0x5a2   :  { %v1557_v10 = vmul.f32 %v1484_v63, %v7744_v17 }
 0x5a3   :  { %1588 = vperm.xlu1 %6740, %v1556_v61  }
 0x5a4   :  { %v5993_v1 = vpop.f32.mrb[34].mxu1 }
 0x5a5   :  { %v1494_v4 = vpop.f32.mrb[35].mxu1  ;;  %v1560_v40 = vmul.f32 %v5993_v1, %v7763_v45 }
 0x5a6   :  { %v1559_v58 = vmul.f32 %v1494_v4, %v7761_v28 }
 0x5a7   :  { %1583 = vperm.xlu1 %6740, %v1555_v3  }
 0x5a8   :  { %v5996_v5 = vpop.f32.mrb[36].mxu1 }
 0x5a9   :  { %v1504_v7 = vpop.f32.mrb[37].mxu1  ;;  %v1562_v44 = vmul.f32 %v5996_v5, %v7776_v56 }
 0x5aa   :  { %v1561_v8 = vmul.f32 %v1504_v7, %v7774_v37 }
 0x5ab   :  { %1598 = vperm.xlu1 %6740, %v1558_v6  }
 0x5ac   :  { %1613 = vperm.xlu0 %6739, %v1561_v8   ;;  %v5999_v9 = vpop.f32.mrb[38].mxu1 }
 0x5ad   :  { %v1514_v62 = vpop.f32.mrb[39].mxu1  ;;  %v1564_v45 = vmul.f32 %v5999_v9, %v7789_v31  ;;  %v1763_v31 = vld [vmem:[%s9712_s15] sm:$0xff] }
 0x5ae   :  { %v1563_v27 = vmul.f32 %v1514_v62, %v7787_v32  ;;  %v1764_v32 = vld [vmem:[%s9712_s15 + $0x8] sm:$0xff]  ;;  %v9855_v9 = vld [vmem:[#allocation23_spill] sm:$0xff] }
 0x5af   :  { %1593 = vperm.xlu1 %6740, %v1557_v10   ;;  %v9856_v62 = vld [vmem:[#allocation24_spill] sm:$0xff] }
 0x5b0   :  { %v6002_v14 = vpop.f32.mrb[40].mxu1 }
 0x5b1   :  { %v1524_v13 = vpop.f32.mrb[41].mxu1  ;;  %v1566_v28 = vmul.f32 %v6002_v14, %v7802_v25 }
 0x5b3   :  { %1608 = vperm.xlu1 %6740, %v1560_v40  }
 0x5b4   :  { %v6005_v2 = vpop.f32.mrb[42].mxu1 }
 0x5b5   :  { %v1568_v16 = vmul.f32 %v6005_v2, %v7815_v48  ;;  %v1534_v46 = vpop.f32.mrb[43].mxu1  ;;  %v1565_v48 = vmul.f32 %v1524_v13, %v7800_v0  ;;  %v9857_v2 = vld [vmem:[#allocation13_spill] sm:$0xff] }
 0x5b6   :  { %v1567_v36 = vmul.f32 %v1534_v46, %v7813_v52 }
 0x5b7   :  { %1603 = vperm.xlu1 %6740, %v1559_v58   ;;  %1648 = vperm.xlu0 %6739, %v1568_v16   ;;  %v9858_v16 = vld [vmem:[#allocation14_spill] sm:$0xff] }
 0x5b8   :  { %v6008_v37 = vpop.f32.mrb[44].mxu1 }
 0x5b9   :  { %v1570_v17 = vmul.f32 %v6008_v37, %v7828_v11  ;;  %v1544_v23 = vpop.f32.mrb[45].mxu1  ;;  %v7916_v11 = vpack.c.bf16 %v1764_v32, %v1763_v31 }
 0x5ba   :  { %v1569_v56 = vmul.f32 %v1544_v23, %v7826_v22  ;;  %v9860_v23 = vld [vmem:[#allocation17_spill] sm:$0xff] }
 0x5bb   :  { %1618 = vperm.xlu1 %6740, %v1562_v44   ;;  %1658 = vperm.xlu0 %6739, %v1570_v17   ;;  %v9859_v44 = vld [vmem:[#allocation16_spill] sm:$0xff] }
 0x5bc   :  { %6443 = vmatprep.subr.bf16.mxu1 %v7916_v11 }
 0x5bd   :  { %6445 = vmatpush3.bf16.msra.mxu1 %v7916_v11 }
 0x5bf   :  { %1628 = vperm.xlu1 %6740, %v1564_v45  }
 0x5c3   :  { %1623 = vperm.xlu1 %6740, %v1563_v27  }
 0x5c7   :  { %1638 = vperm.xlu1 %6740, %v1566_v28   ;;  %v1760_v28 = vld [vmem:[%s9710_s13] sm:$0xff] }
 0x5cb   :  { %1633 = vperm.xlu1 %6740, %v1565_v48   ;;  %v1761_v48 = vld [vmem:[%s9710_s13 + $0x8] sm:$0xff] }
 0x5cf   :  { %1643 = vperm.xlu1 %6740, %v1567_v36   ;;  %v7956_v36 = vpack.c.bf16 %v1761_v48, %v1760_v28  ;;  %v8187_v28 = vld [vmem:[%s9827_s29 + $0x88] sm:$0xff]  ;;  %v8196_v48 = vld [vmem:[%s9714_s17] ss:$0 sm:$0xff] }
 0x5d1   :  { %9861 = vst [vmem:[#allocation23_spill] sm:$0xff] %v7956_v36 }
 0x5d3   :  { %1653 = vperm.xlu1 %6740, %v1569_v56  }
 0x61a   :  { %v1579_v0 = vpop.permute.xlu1 %1578 }
 0x61b   :  { %v1662_v52 = vmul.f32 %v7463_v19, %v1579_v0 }
 0x61e   :  { %v1574_v25 = vpop.permute.xlu1 %1573 }
 0x61f   :  { %v1661_v22 = vmul.f32 %v1574_v25, %v7467_v21  ;;  %v6861_v25 = vld [vmem:[%s9820_s1] sm:$0xff] }
 0x621   :  { %v6412_v12 = vpack.c.bf16 %v1662_v52, %v1661_v22  ;;  %v7974_v52 = vld [vmem:[%s9827_s29] sm:$0xff] }
 0x622   :  { %v1589_v33 = vpop.permute.xlu1 %1588  ;;  %v5367_v22 = vld [vmem:[%s9711_s14] ss:$0 sm:$0xff] }
 0x623   :  { %6413 = vmatpush1.bf16.msra.mxu0 %v6412_v12  ;;  %v1664_v47 = vmul.f32 %v7473_v24, %v1589_v33  ;;  %v5370_v12 = vld [vmem:[%s9713_s16] ss:$0 sm:$0xff] }
 0x624   :  { %6414 = vmatprep.subr.bf16.mxu0 %v9757_v41 }
 0x626   :  { %v1584_v38 = vpop.permute.xlu1 %1583 }
 0x627   :  { %v1663_v49 = vmul.f32 %v1584_v38, %v7477_v26 }
 0x629   :  { %v6415_v51 = vpack.c.bf16 %v1664_v47, %v1663_v49 }
 0x62a   :  { %v1599_v53 = vpop.permute.xlu1 %1598 }
 0x62b   :  { %6416 = vmatpush1.bf16.msra.mxu0 %v6415_v51  ;;  %v1666_v19 = vmul.f32 %v7486_v30, %v1599_v53  ;;  %v1614_v63 = vpop.permute.xlu0 %1613 }
 0x62c   :  { %6417 = vmatprep.subr.bf16.mxu0 %v9757_v41  ;;  %v1669_v4 = vmul.f32 %v1614_v63, %v7518_v42  ;;  %v8009_v63 = vld [vmem:[%s9827_s29 + $0x8] sm:$0xff] }
 0x62e   :  { %v1594_v55 = vpop.permute.xlu1 %1593 }
 0x62f   :  { %v1665_v21 = vmul.f32 %v1594_v55, %v7491_v34  ;;  %v1767_v55 = vld [vmem:[%s9715_s18] sm:$0xff] }
 0x631   :  { %v6418_v57 = vpack.c.bf16 %v1666_v19, %v1665_v21  ;;  %v1768_v19 = vld [vmem:[%s9715_s18 + $0x8] sm:$0xff] }
 0x632   :  { %v1609_v59 = vpop.permute.xlu1 %1608 }
 0x633   :  { %6419 = vmatpush1.bf16.msra.mxu0 %v6418_v57  ;;  %v1668_v24 = vmul.f32 %v7500_v43, %v1609_v59 }
 0x634   :  { %6420 = vmatprep.subr.bf16.mxu0 %v9757_v41 }
 0x636   :  { %v1604_v61 = vpop.permute.xlu1 %1603  ;;  %v1649_v42 = vpop.permute.xlu0 %1648 }
 0x637   :  { %v1667_v26 = vmul.f32 %v1604_v61, %v7505_v50  ;;  %v1676_v58 = vmul.f32 %v9857_v2, %v1649_v42  ;;  %v8077_v42 = vld [vmem:[%s9827_s29 + $0x38] sm:$0xff] }
 0x638   :  { %v8121_v2 = vld [vmem:[%s9827_s29 + $0x58] sm:$0xff] }
 0x639   :  { %v6421_v1 = vpack.c.bf16 %v1668_v24, %v1667_v26  ;;  %v7990_v24 = vpack.c.bf16 %v1768_v19, %v1767_v55  ;;  %v6863_v26 = vld [vmem:[%s9820_s1 + $0x8] sm:$0xff] }
 0x63a   :  { %v1619_v3 = vpop.permute.xlu1 %1618 }
 0x63b   :  { %v1670_v5 = vmul.f32 %v7512_v29, %v1619_v3  ;;  %6422 = vmatpush1.bf16.msra.mxu0 %v6421_v1  ;;  %9863 = vst [vmem:[#allocation24_spill] sm:$0xff] %v7990_v24  ;;  %v6865_v1 = vld [vmem:[%s9820_s1 + $0x10] sm:$0xff] }
 0x63c   :  { %6423 = vmatprep.subr.bf16.mxu0 %v9757_v41  ;;  %v8020_v3 = vld [vmem:[%s9827_s29 + $0x10] sm:$0xff] }
 0x63d   :  { %v6424_v30 = vpack.c.bf16 %v1670_v5, %v1669_v4  ;;  %v6867_v4 = vld [vmem:[%s9820_s1 + $0x18] sm:$0xff] }
 0x63e   :  { %v1629_v34 = vpop.permute.xlu1 %1628  ;;  %v8033_v5 = vld [vmem:[%s9827_s29 + $0x18] sm:$0xff] }
 0x63f   :  { %6425 = vmatpush1.bf16.msra.mxu0 %v6424_v30  ;;  %v1672_v43 = vmul.f32 %v7526_v54, %v1629_v34  ;;  %v1659_v54 = vpop.permute.xlu0 %1658  ;;  %v6869_v30 = vld [vmem:[%s9820_s1 + $0x20] sm:$0xff] }
 0x640   :  { %6426 = vmatprep.subr.bf16.mxu0 %v9757_v41  ;;  %v1678_v17 = vmul.f32 %v9859_v44, %v1659_v54  ;;  %v8044_v34 = vld [vmem:[%s9827_s29 + $0x20] sm:$0xff]  ;;  %v8143_v54 = vld [vmem:[%s9827_s29 + $0x68] sm:$0xff]  ;;  %v6891_v44 = vld [vmem:[%s9820_s1 + $0x78] sm:$0xff] }
 0x642   :  { %v1624_v6 = vpop.permute.xlu1 %1623 }
 0x643   :  { %v1671_v50 = vmul.f32 %v1624_v6, %v7532_v15  ;;  %v6871_v6 = vld [vmem:[%s9820_s1 + $0x28] sm:$0xff] }
 0x645   :  { %v6427_v7 = vpack.c.bf16 %v1672_v43, %v1671_v50  ;;  %v8055_v43 = vld [vmem:[%s9827_s29 + $0x28] sm:$0xff]  ;;  %v6873_v50 = vld [vmem:[%s9820_s1 + $0x30] sm:$0xff] }
 0x646   :  { %v1639_v8 = vpop.permute.xlu1 %1638 }
 0x647   :  { %6428 = vmatpush1.bf16.msra.mxu0 %v6427_v7  ;;  %v1674_v10 = vmul.f32 %v9855_v9, %v1639_v8  ;;  %v8066_v7 = vld [vmem:[%s9827_s29 + $0x30] sm:$0xff]  ;;  %v6875_v8 = vld [vmem:[%s9820_s1 + $0x38] sm:$0xff]  ;;  %v8088_v9 = vld [vmem:[%s9827_s29 + $0x40] sm:$0xff] }
 0x648   :  { %6429 = vmatprep.subr.bf16.mxu0 %v9757_v41 }
 0x64a   :  { %v1634_v29 = vpop.permute.xlu1 %1633 }
 0x64b   :  { %v1673_v14 = vmul.f32 %v1634_v29, %v9856_v62  ;;  %v6877_v29 = vld [vmem:[%s9820_s1 + $0x40] sm:$0xff]  ;;  %v8099_v62 = vld [vmem:[%s9827_s29 + $0x48] sm:$0xff] }
 0x64d   :  { %v6430_v40 = vpack.c.bf16 %v1674_v10, %v1673_v14  ;;  %v6879_v10 = vld [vmem:[%s9820_s1 + $0x48] sm:$0xff]  ;;  %v6881_v14 = vld [vmem:[%s9820_s1 + $0x50] sm:$0xff] }
 0x64e   :  { %v1644_v13 = vpop.permute.xlu1 %1643 }
 0x64f   :  { %v1675_v46 = vmul.f32 %v1644_v13, %v9858_v16  ;;  %6431 = vmatpush1.bf16.msra.mxu0 %v6430_v40  ;;  %v8110_v40 = vld [vmem:[%s9827_s29 + $0x50] sm:$0xff]  ;;  %v6883_v13 = vld [vmem:[%s9820_s1 + $0x58] sm:$0xff]  ;;  %v8132_v16 = vld [vmem:[%s9827_s29 + $0x60] sm:$0xff] }
 0x650   :  { %6432 = vmatprep.subr.bf16.mxu0 %v9757_v41 }
 0x651   :  { %v6433_v15 = vpack.c.bf16 %v1676_v58, %v1675_v46  ;;  %v6885_v58 = vld [vmem:[%s9820_s1 + $0x60] sm:$0xff]  ;;  %v6887_v46 = vld [vmem:[%s9820_s1 + $0x68] sm:$0xff] }
 0x652   :  { %v1654_v37 = vpop.permute.xlu1 %1653 }
 0x653   :  { %v1677_v45 = vmul.f32 %v1654_v37, %v9860_v23  ;;  %6434 = vmatpush1.bf16.msra.mxu0 %v6433_v15  ;;  %v6889_v15 = vld [vmem:[%s9820_s1 + $0x70] sm:$0xff]  ;;  %v6893_v23 = vld [vmem:[%s9820_s1 + $0x80] sm:$0xff] }
 0x654   :  { %6435 = vmatprep.subr.bf16.mxu0 %v9757_v41  ;;  %v8154_v37 = vld [vmem:[%s9827_s29 + $0x70] sm:$0xff] }
 0x655   :  { %v6436_v27 = vpack.c.bf16 %v1678_v17, %v1677_v45  ;;  %v8165_v17 = vld [vmem:[%s9827_s29 + $0x78] sm:$0xff]  ;;  %v8176_v45 = vld [vmem:[%s9827_s29 + $0x80] sm:$0xff] }
 0x657   :  { %6437 = vmatpush1.bf16.msra.mxu0 %v6436_v27  ;;  %v6895_v27 = vld [vmem:[%s9820_s1 + $0x88] sm:$0xff] }
 0x658   :  { %6439 = vmatprep.subr.bf16.mxu0 %v7956_v36 }
 0x65a   :  { %1750 = vmatmul.mubr.f32.vlgmr.msra.gmra.mrb[34].mxu0 %v7836_v39  ;;  %v5364_v39 = vld [vmem:[%s9862_s8] ss:$0 sm:$0xff] }
 0x65b   :  { %5366 = vmatprep.mubr.msk.f32.mxu0 %vm982_vm6, %v7841_v18  ;;  %6441 = vmatpush3.bf16.msra.mxu0 %v7956_v36 }
 0x65e   :  { %1755 = vmatmul.mubr.f32.gmra.mrb[36].mxu0 %v7849_v20 }
 0x72d   :  { %v1751_v18 = vpop.f32.mrb[34].mxu0 }
 0x72e   :  { %v1752_v20 = vadd.f32 %v5364_v39, %v1751_v18  ;;  %v1753_v56 = vpop.f32.mrb[35].mxu0 }
 0x730   :  { %6013 = vmatprep.mubr.msk.f32.mxu0 %vm982_vm6, %v1752_v20  ;;  %6020 = vmatprep.mubr.msk.f32.mxu1 %vm982_vm6, %v1752_v20  ;;  %v9864_v20 = vld [vmem:[#allocation8_spill] sm:$0xff] }
 0x731   :  { %v1756_v31 = vpop.f32.mrb[36].mxu0  ;;  %v8202_v56 = vmul.f32 %v8196_v48, %v9864_v20  ;;  %v9876_v20 = vld [vmem:[#allocation12_spill] sm:$0xff] }
 0x732   :  { %v1757_v32 = vadd.f32 %v5364_v39, %v1756_v31  ;;  %v1758_v0 = vpop.f32.mrb[37].mxu0 }
 0x733   :  { %9865 = vst [vmem:[#allocation13_spill] sm:$0xff] %v8202_v56 }
 0x734   :  { %6014 = vmatmul.mubr.msk.f32.vlgmr.msra.gmra.mrb[38].mxu0 %vm982_vm6, %v1757_v32  ;;  %6021 = vmatmul.mubr.msk.f32.vlgmr.msra.gmra.mrb[46].mxu1 %vm982_vm6, %v1757_v32 }
 0x735   :  { %6027 = vmatprep.mubr.msk.f32.mxu0 %vm352_vm2, %v6861_v25  ;;  %6058 = vmatprep.mubr.msk.f32.mxu1 %vm352_vm2, %v7974_v52  ;;  %v9866_v25 = vld [vmem:[#allocation6_spill] sm:$0xff] }
 0x807   :  { %v6015_v33 = vpop.f32.mrb[38].mxu0  ;;  %v6022_v38 = vpop.f32.mrb[46].mxu1 }
 0x808   :  { %v1854_v47 = vadd.f32 %v6015_v33, %v5367_v22  ;;  %v1935_v49 = vadd.f32 %v6022_v38, %v5370_v12  ;;  %v1848_v51 = vpop.f32.mrb[39].mxu0  ;;  %v1929_v53 = vpop.f32.mrb[47].mxu1 }
 0x809   :  { %v1849_v21 = vadd.f32 %v5367_v22, %v1848_v51  ;;  %v1930_v57 = vadd.f32 %v5370_v12, %v1929_v53  ;;  %v9870_v53 = vld [vmem:[#allocation9_spill] sm:$0xff] }
 0x80a   :  { %v8222_v55 = vmul.f32 %v8196_v48, %v9870_v53 }
 0x80b   :  { %v6446_v59 = vpack.c.bf16 %v1854_v47, %v1849_v21  ;;  %v6452_v61 = vpack.c.bf16 %v1935_v49, %v1930_v57  ;;  %v9868_v49 = vld [vmem:[#allocation7_spill] sm:$0xff] }
 0x80c   :  { %v8218_v51 = vmul.f32 %v8196_v48, %v9868_v49  ;;  %9871 = vst [vmem:[#allocation17_spill] sm:$0xff] %v8222_v55 }
 0x80d   :  { %6448 = vmatprep.subr.msk.bf16.mxu0 %vm7241_vm5, %v6446_v59  ;;  %6454 = vmatprep.subr.msk.bf16.mxu1 %vm7241_vm5, %v6452_v61 }
 0x80e   :  { %6451 = vmatpush3.bf16.msk.msra.mxu0 %vm7241_vm5, %v6446_v59  ;;  %6457 = vmatpush3.bf16.msk.msra.mxu1 %vm7241_vm5, %v6452_v61  ;;  %9869 = vst [vmem:[#allocation16_spill] sm:$0xff] %v8218_v51 }
 0x80f   :  { %6459 = vmatprep.subr.bf16.mxu0 %v7990_v24  ;;  %6462 = vmatprep.subr.bf16.mxu1 %v9757_v41 }
 0x811   :  { %6028 = vmatmul.mubr.msk.f32.vlgmr.msra.gmra.mrb[40].mxu0 %vm352_vm2, %v6863_v26  ;;  %6059 = vmatmul.mubr.msk.f32.vlgmr.msra.gmra.mrb[48].mxu1 %vm352_vm2, %v8009_v63 }
 0x812   :  { %6030 = vmatprep.mubr.msk.f32.mxu0 %vm352_vm2, %v6865_v1  ;;  %6061 = vmatprep.mubr.msk.f32.mxu1 %vm352_vm2, %v8020_v3 }
 0x813   :  { %6461 = vmatpush3.bf16.msra.mxu0 %v7990_v24 }
 0x814   :  { %6495 = vmatprep.subr.bf16.mxu0 %v9757_v41 }
 0x815   :  { %6031 = vmatmul.mubr.msk.f32.gmra.mrb[42].mxu0 %vm352_vm2, %v6867_v4  ;;  %6062 = vmatmul.mubr.msk.f32.gmra.mrb[50].mxu1 %vm352_vm2, %v8033_v5  ;;  %v9872_v4 = vld [vmem:[#allocation10_spill] sm:$0xff] }
 0x816   :  { %6033 = vmatprep.mubr.msk.f32.mxu0 %vm352_vm2, %v6869_v30  ;;  %6064 = vmatprep.mubr.msk.f32.mxu1 %vm352_vm2, %v8044_v34  ;;  %v8231_v30 = vmul.f32 %v8196_v48, %v9872_v4 }
 0x818   :  { %9873 = vst [vmem:[#allocation8_spill] sm:$0xff] %v8231_v30 }
 0x819   :  { %6034 = vmatmul.mubr.msk.f32.gmra.mrb[44].mxu0 %vm352_vm2, %v6871_v6  ;;  %6065 = vmatmul.mubr.msk.f32.gmra.mrb[52].mxu1 %vm352_vm2, %v8055_v43 }
 0x81a   :  { %6036 = vmatprep.mubr.msk.f32.mxu0 %vm352_vm2, %v6873_v50  ;;  %6067 = vmatprep.mubr.msk.f32.mxu1 %vm352_vm2, %v8066_v7 }
 0x81d   :  { %6037 = vmatmul.mubr.msk.f32.gmra.mrb[46].mxu0 %vm352_vm2, %v6875_v8  ;;  %6068 = vmatmul.mubr.msk.f32.gmra.mrb[54].mxu1 %vm352_vm2, %v8077_v42 }
 0x81e   :  { %6039 = vmatprep.mubr.msk.f32.mxu0 %vm352_vm2, %v6877_v29  ;;  %6070 = vmatprep.mubr.msk.f32.mxu1 %vm352_vm2, %v8088_v9 }
 0x821   :  { %6040 = vmatmul.mubr.msk.f32.gmra.mrb[48].mxu0 %vm352_vm2, %v6879_v10  ;;  %6071 = vmatmul.mubr.msk.f32.gmra.mrb[56].mxu1 %vm352_vm2, %v8099_v62  ;;  %v9874_v10 = vld [vmem:[#allocation11_spill] sm:$0xff] }
 0x822   :  { %6042 = vmatprep.mubr.msk.f32.mxu0 %vm352_vm2, %v6881_v14  ;;  %6073 = vmatprep.mubr.msk.f32.mxu1 %vm352_vm2, %v8110_v40  ;;  %v8238_v14 = vmul.f32 %v8196_v48, %v9874_v10 }
 0x824   :  { %9875 = vst [vmem:[#allocation6_spill] sm:$0xff] %v8238_v14 }
 0x825   :  { %6043 = vmatmul.mubr.msk.f32.gmra.mrb[50].mxu0 %vm352_vm2, %v6883_v13  ;;  %6074 = vmatmul.mubr.msk.f32.gmra.mrb[58].mxu1 %vm352_vm2, %v8121_v2 }
 0x826   :  { %6045 = vmatprep.mubr.msk.f32.mxu0 %vm352_vm2, %v6885_v58  ;;  %6076 = vmatprep.mubr.msk.f32.mxu1 %vm352_vm2, %v8132_v16 }
 0x829   :  { %6046 = vmatmul.mubr.msk.f32.gmra.mrb[52].mxu0 %vm352_vm2, %v6887_v46  ;;  %6077 = vmatmul.mubr.msk.f32.gmra.mrb[60].mxu1 %vm352_vm2, %v8143_v54 }
 0x82a   :  { %6048 = vmatprep.mubr.msk.f32.mxu0 %vm352_vm2, %v6889_v15  ;;  %6079 = vmatprep.mubr.msk.f32.mxu1 %vm352_vm2, %v8154_v37 }
 0x82d   :  { %6049 = vmatmul.mubr.msk.f32.gmra.mrb[54].mxu0 %vm352_vm2, %v6891_v44  ;;  %6080 = vmatmul.mubr.msk.f32.gmra.mrb[62].mxu1 %vm352_vm2, %v8165_v17 }
 0x82e   :  { %6051 = vmatprep.mubr.msk.f32.mxu0 %vm352_vm2, %v6893_v23  ;;  %6082 = vmatprep.mubr.msk.f32.mxu1 %vm352_vm2, %v8176_v45 }
 0x831   :  { %6052 = vmatmul.mubr.msk.f32.gmra.mrb[56].mxu0 %vm352_vm2, %v6895_v27  ;;  %6083 = vmatmul.mubr.msk.f32.gmra.mrb[64].mxu1 %vm352_vm2, %v8187_v28 }
 0x832   :  { %5430 = vmatprep.mubr.msk.f32.mxu1 %vm982_vm6, %v7673_v60  ;;  %v8209_v60 = vmul.f32 %v8196_v48, %v9866_v25 }
 0x834   :  { %9867 = vst [vmem:[#allocation14_spill] sm:$0xff] %v8209_v60 }
 0x8e4   :  { %v8198_v39 = vpop.f32.mrb[40].mxu0  ;;  %v6060_v18 = vpop.f32.mrb[48].mxu1 }
 0x8e5   :  { %v2255_v31 = vadd.f32 %v6060_v18, %v8198_v39  ;;  %v8205_v32 = vpop.f32.mrb[41].mxu0  ;;  %v2165_v0 = vpop.f32.mrb[49].mxu1 }
 0x8e6   :  { %v2254_v22 = vadd.f32 %v2165_v0, %v8205_v32 }
 0x8e7   :  { %v2297_v12 = vadd.f32 %v8202_v56, %v2255_v31  ;;  %v8249_v31 = vmul.f32 %v8196_v48, %v9876_v20 }
 0x8e8   :  { %v2296_v33 = vadd.f32 %v8209_v60, %v2254_v22  ;;  %v8214_v38 = vpop.f32.mrb[42].mxu0  ;;  %v6063_v47 = vpop.f32.mrb[50].mxu1 }
 0x8e9   :  { %v2333_v19 = vmul.f32 0.2, %v2297_v12  ;;  %v2257_v21 = vadd.f32 %v6063_v47, %v8214_v38  ;;  %v8225_v57 = vpop.f32.mrb[43].mxu0  ;;  %v2175_v59 = vpop.f32.mrb[51].mxu1  ;;  %vm2315_vm13 = vcmp.gt.f32.partialorder %v2297_v12, 0.0  ;;  %9877 = vst [vmem:[#allocation7_spill] sm:$0xff] %v8249_v31 }
 0x8ea   :  { %v2332_v61 = vmul.f32 0.2, %v2296_v33  ;;  %v2256_v26 = vadd.f32 %v2175_v59, %v8225_v57  ;;  %vm2314_vm14 = vcmp.gt.f32.partialorder %v2296_v33, 0.0 }
 0x8eb   :  { %v2299_v1 = vadd.f32 %v8222_v55, %v2257_v21  ;;  %v2351_v13 = vsel %vm2315_vm13, %v2297_v12, %v2333_v19 }
 0x8ec   :  { %v2298_v6 = vadd.f32 %v8218_v51, %v2256_v26  ;;  %v8234_v50 = vpop.f32.mrb[44].mxu0  ;;  %v6066_v8 = vpop.f32.mrb[52].mxu1  ;;  %v2350_v29 = vsel %vm2314_vm14, %v2296_v33, %v2332_v61  ;;  %v9878_v33 = vld [vmem:[#allocation15_spill] sm:$0xff] }
 0x8ed   :  { %v2335_v58 = vmul.f32 0.2, %v2299_v1  ;;  %v2259_v46 = vadd.f32 %v6066_v8, %v8234_v50  ;;  %v8241_v15 = vpop.f32.mrb[45].mxu0  ;;  %v2185_v44 = vpop.f32.mrb[53].mxu1  ;;  %6089 = vmatprep.mubr.msk.f32.mxu0 %vm982_vm6, %v2350_v29  ;;  %vm2317_vm0 = vcmp.gt.f32.partialorder %v2299_v1, 0.0  ;;  %v8256_v47 = vmul.f32 %v8196_v48, %v9878_v33 }
 0x8ee   :  { %v2334_v23 = vmul.f32 0.2, %v2298_v6  ;;  %v2258_v27 = vadd.f32 %v2185_v44, %v8241_v15  ;;  %6090 = vmatmul.mubr.msk.f32.vlgmr.msra.gmra.mrb[58].mxu0 %vm982_vm6, %v2351_v13  ;;  %vm2316_vm15 = vcmp.gt.f32.partialorder %v2298_v6, 0.0 }
 0x8ef   :  { %v2301_v18 = vadd.f32 %v8238_v14, %v2259_v46  ;;  %9879 = vst [vmem:[#allocation9_spill] sm:$0xff] %v8256_v47  ;;  %v2353_v59 = vsel %vm2317_vm0, %v2299_v1, %v2335_v58  ;;  %v9884_v1 = vld [vmem:[#allocation19_spill] sm:$0xff] }
 0x8f0   :  { %v2300_v0 = vadd.f32 %v8231_v30, %v2258_v27  ;;  %v8252_v25 = vpop.f32.mrb[46].mxu0  ;;  %v6069_v22 = vpop.f32.mrb[54].mxu1  ;;  %v2352_v12 = vsel %vm2316_vm15, %v2298_v6, %v2334_v23  ;;  %v9881_v6 = vld [vmem:[#allocation18_spill] sm:$0xff]  ;;  %v8274_v58 = vmul.f32 %v8196_v48, %v9884_v1 }
 0x8f1   :  { %v2337_v49 = vmul.f32 0.2, %v2301_v18  ;;  %v2261_v53 = vadd.f32 %v6069_v22, %v8252_v25  ;;  %v8259_v19 = vpop.f32.mrb[47].mxu0  ;;  %v2195_v21 = vpop.f32.mrb[55].mxu1  ;;  %6092 = vmatprep.mubr.msk.f32.mxu0 %vm982_vm6, %v2352_v12  ;;  %vm2319_vm3 = vcmp.gt.f32.partialorder %v2301_v18, 0.0  ;;  %v8267_v8 = vmul.f32 %v8196_v48, %v9881_v6 }
 0x8f2   :  { %9880 = vst [vmem:[#allocation10_spill] sm:$0xff] %v8259_v19  ;;  %v2336_v61 = vmul.f32 0.2, %v2300_v0  ;;  %v2260_v26 = vadd.f32 %v2195_v21, %v8259_v19  ;;  %6093 = vmatmul.mubr.msk.f32.gmra.mrb[60].mxu0 %vm982_vm6, %v2353_v59  ;;  %vm2318_vm1 = vcmp.gt.f32.partialorder %v2300_v0, 0.0  ;;  %9885 = vst [vmem:[#allocation15_spill] sm:$0xff] %v8274_v58 }
 0x8f3   :  { %v2303_v4 = vadd.f32 %v8256_v47, %v2261_v53  ;;  %9882 = vst [vmem:[#allocation11_spill] sm:$0xff] %v8267_v8  ;;  %v2355_v22 = vsel %vm2319_vm3, %v2301_v18, %v2337_v49  ;;  %v9887_v53 = vld [vmem:[#allocation20_spill] sm:$0xff]  ;;  %v9890_v18 = vld [vmem:[#allocation21_spill] sm:$0xff] }
 0x8f4   :  { %v2302_v29 = vadd.f32 %v8249_v31, %v2260_v26  ;;  %v8270_v10 = vpop.f32.mrb[48].mxu0  ;;  %v6072_v13 = vpop.f32.mrb[56].mxu1  ;;  %v2354_v46 = vsel %vm2318_vm1, %v2300_v0, %v2336_v61  ;;  %v8285_v21 = vmul.f32 %v8196_v48, %v9887_v53  ;;  %v8292_v49 = vmul.f32 %v8196_v48, %v9890_v18 }
 0x8f5   :  { %9883 = vst [vmem:[#allocation12_spill] sm:$0xff] %v8270_v10  ;;  %v2339_v44 = vmul.f32 0.2, %v2303_v4  ;;  %v2263_v23 = vadd.f32 %v6072_v13, %v8270_v10  ;;  %v8277_v27 = vpop.f32.mrb[49].mxu0  ;;  %v2205_v20 = vpop.f32.mrb[57].mxu1  ;;  %6095 = vmatprep.mubr.msk.f32.mxu0 %vm982_vm6, %v2354_v46  ;;  %vm2321_vm7 = vcmp.gt.f32.partialorder %v2303_v4, 0.0 }
 0x8f6   :  { %9886 = vst [vmem:[#allocation18_spill] sm:$0xff] %v8277_v27  ;;  %v2338_v12 = vmul.f32 0.2, %v2302_v29  ;;  %v2262_v33 = vadd.f32 %v2205_v20, %v8277_v27  ;;  %6096 = vmatmul.mubr.msk.f32.gmra.mrb[62].mxu0 %vm982_vm6, %v2355_v22  ;;  %vm2320_vm4 = vcmp.gt.f32.partialorder %v2302_v29, 0.0  ;;  %9888 = vst [vmem:[#allocation19_spill] sm:$0xff] %v8285_v21 }
 0x8f7   :  { %v2305_v0 = vadd.f32 %v8274_v58, %v2263_v23  ;;  %9891 = vst [vmem:[#allocation21_spill] sm:$0xff] %v8292_v49  ;;  %v2357_v20 = vsel %vm2321_vm7, %v2303_v4, %v2339_v44  ;;  %v9896_v4 = vld [vmem:[#allocation25_spill] sm:$0xff] }
 0x8f8   :  { %v2304_v59 = vadd.f32 %v8267_v8, %v2262_v33  ;;  %v8288_v61 = vpop.f32.mrb[50].mxu0  ;;  %v6075_v26 = vpop.f32.mrb[58].mxu1  ;;  %v2356_v6 = vsel %vm2320_vm4, %v2302_v29, %v2338_v12  ;;  %v9893_v12 = vld [vmem:[#allocation22_spill] sm:$0xff]  ;;  %v8310_v44 = vmul.f32 %v8196_v48, %v9896_v4 }
 0x8f9   :  { %9889 = vst [vmem:[#allocation20_spill] sm:$0xff] %v8288_v61  ;;  %v2341_v13 = vmul.f32 0.2, %v2305_v0  ;;  %v2265_v46 = vadd.f32 %v6075_v26, %v8288_v61  ;;  %v8295_v1 = vpop.f32.mrb[51].mxu0  ;;  %v2215_v23 = vpop.f32.mrb[59].mxu1  ;;  %6098 = vmatprep.mubr.msk.f32.mxu0 %vm982_vm6, %v2356_v6  ;;  %vm2323_vm9 = vcmp.gt.f32.partialorder %v2305_v0, 0.0  ;;  %v8303_v53 = vmul.f32 %v8196_v48, %v9893_v12 }
 0x8fa   :  { %9892 = vst [vmem:[#allocation30_spill] sm:$0xff] %v8295_v1  ;;  %v2340_v22 = vmul.f32 0.2, %v2304_v59  ;;  %v2264_v33 = vadd.f32 %v2215_v23, %v8295_v1  ;;  %6099 = vmatmul.mubr.msk.f32.gmra.mrb[64].mxu0 %vm982_vm6, %v2357_v20  ;;  %vm2322_vm8 = vcmp.gt.f32.partialorder %v2304_v59, 0.0  ;;  %9897 = vst [vmem:[#allocation25_spill] sm:$0xff] %v8310_v44 }
 0x8fb   :  { %v2307_v29 = vadd.f32 %v8292_v49, %v2265_v46  ;;  %9894 = vst [vmem:[#allocation22_spill] sm:$0xff] %v8303_v53  ;;  %v2359_v12 = vsel %vm2323_vm9, %v2305_v0, %v2341_v13  ;;  %v9902_v0 = vld [vmem:[#allocation27_spill] sm:$0xff] }
 0x8fc   :  { %v2306_v26 = vadd.f32 %v8285_v21, %v2264_v33  ;;  %v8306_v18 = vpop.f32.mrb[52].mxu0  ;;  %v6078_v41 = vpop.f32.mrb[60].mxu1  ;;  %v2358_v6 = vsel %vm2322_vm8, %v2304_v59, %v2340_v22  ;;  %v9899_v22 = vld [vmem:[#allocation26_spill] sm:$0xff]  ;;  %v8328_v13 = vmul.f32 %v8196_v48, %v9902_v0 }
 0x8fd   :  { %9895 = vst [vmem:[#allocation31_spill] sm:$0xff] %v8306_v18  ;;  %v2343_v23 = vmul.f32 0.2, %v2307_v29  ;;  %v2267_v20 = vadd.f32 %v6078_v41, %v8306_v18  ;;  %v8313_v8 = vpop.f32.mrb[53].mxu0  ;;  %v2225_v46 = vpop.f32.mrb[61].mxu1  ;;  %6101 = vmatprep.mubr.msk.f32.mxu0 %vm982_vm6, %v2358_v6  ;;  %vm2325_vm11 = vcmp.gt.f32.partialorder %v2307_v29, 0.0  ;;  %v8321_v4 = vmul.f32 %v8196_v48, %v9899_v22 }
 0x8fe   :  { %9898 = vst [vmem:[#allocation32_spill] sm:$0xff] %v8313_v8  ;;  %v2342_v49 = vmul.f32 0.2, %v2306_v26  ;;  %v2266_v33 = vadd.f32 %v2225_v46, %v8313_v8  ;;  %6102 = vmatmul.mubr.msk.f32.gmra.mrb[66].mxu0 %vm982_vm6, %v2359_v12  ;;  %vm2324_vm10 = vcmp.gt.f32.partialorder %v2306_v26, 0.0  ;;  %9903 = vst [vmem:[#allocation27_spill] sm:$0xff] %v8328_v13 }
 0x8ff   :  { %v2309_v59 = vadd.f32 %v8310_v44, %v2267_v20  ;;  %9900 = vst [vmem:[#allocation26_spill] sm:$0xff] %v8321_v4  ;;  %v2361_v22 = vsel %vm2325_vm11, %v2307_v29, %v2343_v23  ;;  %v9908_v29 = vld [vmem:[#allocation29_spill] sm:$0xff] }
 0x900   :  { %v2308_v41 = vadd.f32 %v8303_v53, %v2266_v33  ;;  %v8324_v21 = vpop.f32.mrb[54].mxu0  ;;  %v6081_v58 = vpop.f32.mrb[62].mxu1  ;;  %v2360_v6 = vsel %vm2324_vm10, %v2306_v26, %v2342_v49  ;;  %v9905_v26 = vld [vmem:[#allocation28_spill] sm:$0xff]  ;;  %v8346_v23 = vmul.f32 %v8196_v48, %v9908_v29 }
 0x901   :  { %9901 = vst [vmem:[#allocation33_spill] sm:$0xff] %v8324_v21  ;;  %v2345_v46 = vmul.f32 0.2, %v2309_v59  ;;  %v2269_v12 = vadd.f32 %v6081_v58, %v8324_v21  ;;  %v8331_v31 = vpop.f32.mrb[55].mxu0  ;;  %v2235_v20 = vpop.f32.mrb[63].mxu1  ;;  %6104 = vmatprep.mubr.msk.f32.mxu0 %vm982_vm6, %v2360_v6  ;;  %vm2327_vm14 = vcmp.gt.f32.partialorder %v2309_v59, 0.0  ;;  %v8339_v0 = vmul.f32 %v8196_v48, %v9905_v26 }
 0x902   :  { %9904 = vst [vmem:[#allocation34_spill] sm:$0xff] %v8331_v31  ;;  %v2344_v44 = vmul.f32 0.2, %v2308_v41  ;;  %v2268_v33 = vadd.f32 %v2235_v20, %v8331_v31  ;;  %6105 = vmatmul.mubr.msk.f32.gmra.mrb[68].mxu0 %vm982_vm6, %v2361_v22  ;;  %vm2326_vm13 = vcmp.gt.f32.partialorder %v2308_v41, 0.0  ;;  %9909 = vst [vmem:[#allocation29_spill] sm:$0xff] %v8346_v23 }
 0x903   :  { %v2311_v49 = vadd.f32 %v8328_v13, %v2269_v12  ;;  %9906 = vst [vmem:[#allocation28_spill] sm:$0xff] %v8339_v0  ;;  %v2363_v26 = vsel %vm2327_vm14, %v2309_v59, %v2345_v46 }
 0x904   :  { %v2310_v58 = vadd.f32 %v8321_v4, %v2268_v33  ;;  %v8342_v53 = vpop.f32.mrb[56].mxu0  ;;  %v6084_v47 = vpop.f32.mrb[64].mxu1  ;;  %v2362_v6 = vsel %vm2326_vm13, %v2308_v41, %v2344_v44 }
 0x905   :  { %9907 = vst [vmem:[#allocation35_spill] sm:$0xff] %v8342_v53  ;;  %v2347_v20 = vmul.f32 0.2, %v2311_v49  ;;  %v2271_v22 = vadd.f32 %v6084_v47, %v8342_v53  ;;  %v8349_v30 = vpop.f32.mrb[57].mxu0  ;;  %v2245_v12 = vpop.f32.mrb[65].mxu1  ;;  %6107 = vmatprep.mubr.msk.f32.mxu0 %vm982_vm6, %v2362_v6  ;;  %vm2329_vm0 = vcmp.gt.f32.partialorder %v2311_v49, 0.0 }
 0x906   :  { %9910 = vst [vmem:[#allocation36_spill] sm:$0xff] %v8349_v30  ;;  %v2346_v13 = vmul.f32 0.2, %v2310_v58  ;;  %v2270_v33 = vadd.f32 %v2245_v12, %v8349_v30  ;;  %6108 = vmatmul.mubr.msk.f32.gmra.mrb[70].mxu0 %vm982_vm6, %v2363_v26  ;;  %vm2328_vm15 = vcmp.gt.f32.partialorder %v2310_v58, 0.0  ;;  %v8363_v6 = vld [vmem:[%s9853_s3 + $0x8] sm:$0xff] }
 0x907   :  { %v2313_v44 = vadd.f32 %v8346_v23, %v2271_v22  ;;  %v2365_v47 = vsel %vm2329_vm0, %v2311_v49, %v2347_v20  ;;  %9911 = vst [vmem:[#allocation37_spill] sm:$0xff] %v8363_v6 }
 0x908   :  { %v2312_v48 = vadd.f32 %v8339_v0, %v2270_v33  ;;  %v2364_v41 = vsel %vm2328_vm15, %v2310_v58, %v2346_v13 }
 0x909   :  { %v2349_v29 = vmul.f32 0.2, %v2313_v44  ;;  %6110 = vmatprep.mubr.msk.f32.mxu0 %vm982_vm6, %v2364_v41  ;;  %vm2331_vm3 = vcmp.gt.f32.partialorder %v2313_v44, 0.0 }
 0x90a   :  { %v2348_v4 = vmul.f32 0.2, %v2312_v48  ;;  %6111 = vmatmul.mubr.msk.f32.gmra.mrb[72].mxu0 %vm982_vm6, %v2365_v47  ;;  %vm2330_vm1 = vcmp.gt.f32.partialorder %v2312_v48, 0.0 }
 0x90b   :  { %v2367_v46 = vsel %vm2331_vm3, %v2313_v44, %v2349_v29 }
 0x90c   :  { %v2366_v59 = vsel %vm2330_vm1, %v2312_v48, %v2348_v4 }
 0x90d   :  { %6113 = vmatprep.mubr.msk.f32.mxu0 %vm982_vm6, %v2366_v59 }
 0x90e   :  { %6114 = vmatmul.mubr.msk.f32.gmra.mrb[74].mxu0 %vm982_vm6, %v2367_v46 }
 0x90f   :  { %5452 = vmatprep.mubr.msk.f32.mxu0 %vm982_vm6, %v8363_v6 }
 0x9c1   :  { %v8367_v13 = vpop.f32.mrb[58].mxu0 }
 0x9c2   :  { %v8369_v49 = vpop.f32.mrb[59].mxu0  ;;  %v2578_v22 = vsel %vm1192_vm12, %v8367_v13, -inf }
 0x9c3   :  { %v2577_v33 = vsel %vm1192_vm12, %v8369_v49, -inf }
 0x9c5   :  { %v8371_v58 = vpop.f32.mrb[60].mxu0 }
 0x9c6   :  { %v8373_v4 = vpop.f32.mrb[61].mxu0  ;;  %v2580_v47 = vsel %vm1192_vm12, %v8371_v58, -inf }
 0x9c7   :  { %v2579_v0 = vsel %vm1192_vm12, %v8373_v4, -inf }
 0x9c9   :  { %v8375_v20 = vpop.f32.mrb[62].mxu0 }
 0x9ca   :  { %v2583_v12 = vsel %vm1192_vm12, %v8375_v20, -inf  ;;  %v8381_v26 = vpop.f32.mrb[63].mxu0 }
 0x9cb   :  { %v2584_v44 = vmax.f32 %v2578_v22, %v2583_v12  ;;  %v2581_v48 = vsel %vm1192_vm12, %v8381_v26, -inf }
 0x9cc   :  { %v2582_v41 = vmax.f32 %v2577_v33, %v2581_v48 }
 0x9cd   :  { %v8387_v29 = vpop.f32.mrb[64].mxu0 }
 0x9ce   :  { %v2587_v59 = vsel %vm1192_vm12, %v8387_v29, -inf  ;;  %v8393_v46 = vpop.f32.mrb[65].mxu0 }
 0x9cf   :  { %v2588_v23 = vmax.f32 %v2580_v47, %v2587_v59  ;;  %v2585_v22 = vsel %vm1192_vm12, %v8393_v46, -inf }
 0x9d0   :  { %v2586_v12 = vmax.f32 %v2579_v0, %v2585_v22 }
 0x9d1   :  { %v8399_v14 = vpop.f32.mrb[66].mxu0 }
 0x9d2   :  { %v2591_v33 = vsel %vm1192_vm12, %v8399_v14, -inf  ;;  %v8403_v48 = vpop.f32.mrb[67].mxu0 }
 0x9d3   :  { %v2592_v51 = vmax.f32 %v2584_v44, %v2591_v33  ;;  %v2589_v55 = vsel %vm1192_vm12, %v8403_v48, -inf }
 0x9d4   :  { %v2590_v60 = vmax.f32 %v2582_v41, %v2589_v55 }
 0x9d5   :  { %v8407_v56 = vpop.f32.mrb[68].mxu0 }
 0x9d6   :  { %v2595_v47 = vsel %vm1192_vm12, %v8407_v56, -inf  ;;  %v8411_v59 = vpop.f32.mrb[69].mxu0 }
 0x9d7   :  { %v2596_v0 = vmax.f32 %v2588_v23, %v2595_v47  ;;  %v2593_v22 = vsel %vm1192_vm12, %v8411_v59, -inf }
 0x9d8   :  { %v2594_v6 = vmax.f32 %v2586_v12, %v2593_v22 }
 0x9d9   :  { %v8415_v24 = vpop.f32.mrb[70].mxu0 }
 0x9da   :  { %v2599_v44 = vsel %vm1192_vm12, %v8415_v24, -inf  ;;  %v8419_v33 = vpop.f32.mrb[71].mxu0 }
 0x9db   :  { %v2600_v55 = vmax.f32 %v2592_v51, %v2599_v44  ;;  %v2597_v41 = vsel %vm1192_vm12, %v8419_v33, -inf }
 0x9dc   :  { %v2598_v36 = vmax.f32 %v2590_v60, %v2597_v41 }
 0x9dd   :  { %v8423_v30 = vpop.f32.mrb[72].mxu0 }
 0x9de   :  { %v2603_v23 = vsel %vm1192_vm12, %v8423_v30, -inf  ;;  %v8427_v47 = vpop.f32.mrb[73].mxu0 }
 0x9df   :  { %v2604_v12 = vmax.f32 %v2596_v0, %v2603_v23  ;;  %v2601_v22 = vsel %vm1192_vm12, %v8427_v47, -inf }
 0x9e0   :  { %v2602_v53 = vmax.f32 %v2594_v6, %v2601_v22 }
 0x9e1   :  { %v8431_v31 = vpop.f32.mrb[74].mxu0 }
 0x9e2   :  { %v2607_v51 = vsel %vm1192_vm12, %v8431_v31, -inf  ;;  %v8435_v44 = vpop.f32.mrb[75].mxu0  ;;  %v2610_v60 = vmax.f32 %v2602_v53, %v2604_v12 }
 0x9e3   :  { %v2608_v41 = vmax.f32 %v2600_v55, %v2607_v51  ;;  %v2605_v21 = vsel %vm1192_vm12, %v8435_v44, -inf }
 0x9e4   :  { %v2606_v8 = vmax.f32 %v2598_v36, %v2605_v21 }
 0x9e6   :  { %v2609_v18 = vmax.f32 %v2606_v8, %v2608_v41 }
 0x9e8   :  { %v2611_v1 = vmax.f32 %v2609_v18, %v2610_v60 }
 0x9ea   :  { %2612 = vmax.xlane.f32.xlu1 %v2611_v1 }
 0xa77   :  { %v2613_v0 = vpop.xlane.xlu1 %2612 }
 0xa78   :  { %v2614_v23 = vrot.slane %v2613_v0, 4 }
 0xa7a   :  { %v2615_v61 = vmax.f32 %v2613_v0, %v2614_v23 }
 0xa7c   :  { %v2616_v6 = vrot.slane %v2615_v61, 2 }
 0xa7e   :  { %v2617_v22 = vmax.f32 %v2615_v61, %v2616_v6 }
 0xa80   :  { %v2618_v27 = vrot.slane %v2617_v22, 1 }
 0xa82   :  { %v2619_v10 = vmax.f32 %v2617_v22, %v2618_v27 }
 0xa84   :  { %6727 = vpush %v2619_v10 }
 0xab5   :  { %s6728_s8 = spop %6727 }
 0xab6   :  { %v8439_v19 = vstv %s6728_s8 }
 0xab7   :  { %v2622_v53 = vsub.f32 %v8369_v49, %v8439_v19  ;;  %v2623_v36 = vsub.f32 %v8367_v13, %v8439_v19  ;;  %v2624_v8 = vsub.f32 %v8373_v4, %v8439_v19  ;;  %v2625_v21 = vsub.f32 %v8371_v58, %v8439_v19 }
 0xab8   :  { %v2626_v61 = vsub.f32 %v8381_v26, %v8439_v19  ;;  %v2627_v10 = vsub.f32 %v8375_v20, %v8439_v19  ;;  %v2628_v13 = vsub.f32 %v8393_v46, %v8439_v19  ;;  %v2629_v58 = vsub.f32 %v8387_v29, %v8439_v19 }
 0xab9   :  { %v2640_v27 = vmul.f32 1.442695, %v2622_v53  ;;  %v2642_v1 = vmul.f32 1.442695, %v2623_v36  ;;  %v2644_v18 = vmul.f32 1.442695, %v2624_v8  ;;  %v2630_v20 = vsub.f32 %v8403_v48, %v8439_v19 }
 0xaba   :  { %v2646_v55 = vmul.f32 1.442695, %v2625_v21  ;;  %v2648_v49 = vmul.f32 1.442695, %v2626_v61  ;;  %v2650_v4 = vmul.f32 1.442695, %v2627_v10  ;;  %v2631_v51 = vsub.f32 %v8399_v14, %v8439_v19 }
 0xabb   :  { %6781 = vpow2.f32 %v2640_v27  ;;  %v2652_v26 = vmul.f32 1.442695, %v2628_v13  ;;  %v2654_v12 = vmul.f32 1.442695, %v2629_v58  ;;  %v2656_v60 = vmul.f32 1.442695, %v2630_v20 }
 0xabc   :  { %6783 = vpow2.f32 %v2642_v1  ;;  %v2632_v46 = vsub.f32 %v8411_v59, %v8439_v19  ;;  %v2658_v41 = vmul.f32 1.442695, %v2631_v51  ;;  %v2633_v29 = vsub.f32 %v8407_v56, %v8439_v19  ;;  %v6898_v48 = vld [vmem:[%s9854_s11] sm:$0xff]  ;;  %v6899_v14 = vld [vmem:[%s9854_s11 + $0x8] sm:$0xff]  ;;  %v6900_v27 = vld [vmem:[%s9854_s11 + $0x10] sm:$0xff] }
 0xabd   :  { %6785 = vpow2.f32 %v2644_v18  ;;  %v2634_v56 = vsub.f32 %v8419_v33, %v8439_v19  ;;  %v2635_v21 = vsub.f32 %v8415_v24, %v8439_v19  ;;  %v6901_v33 = vld [vmem:[%s9854_s11 + $0x18] sm:$0xff]  ;;  %v9912_v13 = vmov 0.0|0.0  }
 0xabe   :  { %6787 = vpow2.f32 %v2646_v55  ;;  %v2660_v59 = vmul.f32 1.442695, %v2632_v46  ;;  %v2662_v8 = vmul.f32 1.442695, %v2633_v29  ;;  %v2637_v58 = vsub.f32 %v8423_v30, %v8439_v19 }
 0xabf   :  { %6789 = vpow2.f32 %v2648_v49  ;;  %v2664_v24 = vmul.f32 1.442695, %v2634_v56  ;;  %v2636_v49 = vsub.f32 %v8427_v47, %v8439_v19  ;;  %v6903_v47 = vld [vmem:[%s9854_s11 + $0x28] sm:$0xff] }
 0xac0   :  { %6791 = vpow2.f32 %v2650_v4  ;;  %v2666_v4 = vmul.f32 1.442695, %v2635_v21  ;;  %v2670_v29 = vmul.f32 1.442695, %v2637_v58  ;;  %v6906_v21 = vld [vmem:[%s9854_s11 + $0x40] sm:$0xff]  ;;  %v6909_v58 = vld [vmem:[%s9854_s11 + $0x58] sm:$0xff] }
 0xac1   :  { %6793 = vpow2.f32 %v2652_v26  ;;  %v2668_v30 = vmul.f32 1.442695, %v2636_v49  ;;  %v6908_v49 = vld [vmem:[%s9854_s11 + $0x50] sm:$0xff] }
 0xac2   :  { %6795 = vpow2.f32 %v2654_v12  ;;  %v6902_v12 = vld [vmem:[%s9854_s11 + $0x20] sm:$0xff] }
 0xac3   :  { %6797 = vpow2.f32 %v2656_v60 }
 0xac4   :  { %6799 = vpow2.f32 %v2658_v41  ;;  %v2638_v41 = vsub.f32 %v8435_v44, %v8439_v19  ;;  %v6905_v44 = vld [vmem:[%s9854_s11 + $0x38] sm:$0xff] }
 0xac5   :  { %v6782_v0 = vpop.eup %6781  ;;  %6801 = vpow2.f32 %v2660_v59 }
 0xac6   :  { %v6784_v23 = vpop.eup %6783  ;;  %v8468_v6 = vmul.f32 %v6898_v48, %v6782_v0  ;;  %6803 = vpow2.f32 %v2662_v8  ;;  %v2639_v0 = vsub.f32 %v8431_v31, %v8439_v19  ;;  %v2672_v31 = vmul.f32 1.442695, %v2638_v41  ;;  %v6911_v41 = vld [vmem:[%s9854_s11 + $0x68] sm:$0xff] }
 0xac7   :  { %v6786_v22 = vpop.eup %6785  ;;  %v8473_v53 = vmul.f32 %v6899_v14, %v6784_v23  ;;  %6805 = vpow2.f32 %v2664_v24 }
 0xac8   :  { %v6788_v36 = vpop.eup %6787  ;;  %v8484_v1 = vmul.f32 %v6900_v27, %v6786_v22  ;;  %6807 = vpow2.f32 %v2666_v4  ;;  %v6904_v22 = vld [vmem:[%s9854_s11 + $0x30] sm:$0xff]  ;;  %v2674_v19 = vmul.f32 1.442695, %v2639_v0 }
 0xac9   :  { %v6790_v61 = vpop.eup %6789  ;;  %v6463_v10 = vpack.c.bf16 %v8473_v53, %v8468_v6  ;;  %v8489_v18 = vmul.f32 %v6901_v33, %v6788_v36  ;;  %6809 = vpow2.f32 %v2668_v30 }
 0xaca   :  { %v6792_v55 = vpop.eup %6791  ;;  %v8501_v51 = vmul.f32 %v6902_v12, %v6790_v61  ;;  %6811 = vpow2.f32 %v2670_v29 }
 0xacb   :  { %6464 = vmatpush1.bf16.msra.mxu1 %v6463_v10  ;;  %v6794_v26 = vpop.eup %6793  ;;  %v6466_v20 = vpack.c.bf16 %v8489_v18, %v8484_v1  ;;  %v8506_v60 = vmul.f32 %v6903_v47, %v6792_v55  ;;  %v6907_v10 = vld [vmem:[%s9854_s11 + $0x48] sm:$0xff]  ;;  %6813 = vpow2.f32 %v2672_v31 }
 0xacc   :  { %6465 = vmatprep.subr.bf16.mxu1 %v9912_v13  ;;  %v6796_v46 = vpop.eup %6795  ;;  %v8518_v14 = vmul.f32 %v6904_v22, %v6794_v26  ;;  %6815 = vpow2.f32 %v2674_v19  ;;  %v6912_v22 = vld [vmem:[%s9854_s11 + $0x70] sm:$0xff] }
 0xacd   :  { %v6798_v23 = vpop.eup %6797  ;;  %v6469_v48 = vpack.c.bf16 %v8506_v60, %v8501_v51  ;;  %v8523_v59 = vmul.f32 %v6905_v44, %v6796_v46  ;;  %v6910_v46 = vld [vmem:[%s9854_s11 + $0x60] sm:$0xff] }
 0xace   :  { %v6800_v56 = vpop.eup %6799  ;;  %v8531_v61 = vmul.f32 %v6906_v21, %v6798_v23 }
 0xacf   :  { %6467 = vmatpush1.bf16.msra.mxu1 %v6466_v20  ;;  %v6802_v36 = vpop.eup %6801  ;;  %v6472_v8 = vpack.c.bf16 %v8523_v59, %v8518_v14  ;;  %v8536_v27 = vmul.f32 %v6907_v10, %v6800_v56  ;;  %v6913_v56 = vld [vmem:[%s9854_s11 + $0x78] sm:$0xff]  ;;  %v6915_v10 = vld [vmem:[%s9854_s11 + $0x88] sm:$0xff] }
 0xad0   :  { %6468 = vmatprep.subr.bf16.mxu1 %v9912_v13  ;;  %v6804_v33 = vpop.eup %6803  ;;  %v8544_v4 = vmul.f32 %v6908_v49, %v6802_v36  ;;  %v8602_v49 = vld [vmem:[%s9853_s3 + $0x18] sm:$0xf] }
 0xad1   :  { %v6806_v55 = vpop.eup %6805  ;;  %v6475_v24 = vpack.c.bf16 %v8536_v27, %v8531_v61  ;;  %v8549_v26 = vmul.f32 %v6909_v58, %v6804_v33  ;;  %v8609_v58 = vld [vmem:[%s9853_s3 + $0x10] sm:$0xf] }
 0xad2   :  { %v6808_v20 = vpop.eup %6807  ;;  %v8557_v30 = vmul.f32 %v6910_v46, %v6806_v55 }
 0xad3   :  { %6470 = vmatpush1.bf16.msra.mxu1 %v6469_v48  ;;  %v6810_v12 = vpop.eup %6809  ;;  %v6478_v47 = vpack.c.bf16 %v8549_v26, %v8544_v4  ;;  %v8562_v29 = vmul.f32 %v6911_v41, %v6808_v20 }
 0xad4   :  { %6471 = vmatprep.subr.bf16.mxu1 %v9912_v13  ;;  %v6812_v0 = vpop.eup %6811  ;;  %v8570_v44 = vmul.f32 %v6912_v22, %v6810_v12 }
 0xad5   :  { %v6814_v23 = vpop.eup %6813  ;;  %v6481_v48 = vpack.c.bf16 %v8562_v29, %v8557_v30  ;;  %v8575_v31 = vmul.f32 %v6913_v56, %v6812_v0 }
 0xad6   :  { %v6816_v19 = vpop.eup %6815 }
 0xad7   :  { %6473 = vmatpush1.bf16.msra.mxu1 %v6472_v8  ;;  %v6484_v36 = vpack.c.bf16 %v8575_v31, %v8570_v44  ;;  %v6914_v8 = vld [vmem:[%s9854_s11 + $0x80] sm:$0xff]  ;;  %v8588_v33 = vmul.f32 %v6915_v10, %v6816_v19 }
 0xad8   :  { %6474 = vmatprep.subr.bf16.mxu1 %v9912_v13  ;;  %v8583_v21 = vmul.f32 %v6914_v8, %v6814_v23 }
 0xada   :  { %v6487_v55 = vpack.c.bf16 %v8588_v33, %v8583_v21 }
 0xadb   :  { %6476 = vmatpush1.bf16.msra.mxu1 %v6475_v24  ;;  %v8596_v24 = vld [vmem:[%s9853_s3] sm:$0xff] }
 0xadc   :  { %6477 = vmatprep.subr.bf16.mxu1 %v9912_v13 }
 0xadf   :  { %6479 = vmatpush1.bf16.msra.mxu1 %v6478_v47 }
 0xae0   :  { %6480 = vmatprep.subr.bf16.mxu1 %v9912_v13 }
 0xae3   :  { %6482 = vmatpush1.bf16.msra.mxu1 %v6481_v48 }
 0xae4   :  { %6483 = vmatprep.subr.bf16.mxu1 %v9912_v13 }
 0xae7   :  { %6485 = vmatpush1.bf16.msra.mxu1 %v6484_v36 }
 0xae8   :  { %6486 = vmatprep.subr.bf16.mxu1 %v9912_v13 }
 0xaeb   :  { %6488 = vmatpush1.bf16.msra.mxu1 %v6487_v55 }
 0xaee   :  { %2759 = vmatmul.mubr.f32.vlgmr.msra.gmra.mrb[66].mxu1 %v8596_v24 }
 0xaef   :  { %5431 = vmatprep.mubr.msk.f32.mxu1 %vm982_vm6, %v8602_v49 }
 0xaf2   :  { %2764 = vmatmul.mubr.f32.gmra.mrb[68].mxu1 %v8609_v58 }
 0xaf3   :  { %6120 = vmatprep.mubr.msk.f32.mxu1 %vm352_vm2, %v7974_v52 }
 0xbc1   :  { %v2760_v20 = vpop.f32.mrb[66].mxu1 }
 0xbc2   :  { %v2762_v12 = vpop.f32.mrb[67].mxu1  ;;  %v2769_v47 = vmax.f32 %v2760_v20, 1e-30 }
 0xbc4   :  { %6817 = vrcp.f32 %v2769_v47 }
 0xbc5   :  { %v2765_v46 = vpop.f32.mrb[68].mxu1 }
 0xbc6   :  { %v2770_v41 = vmax.f32 %v2765_v46, 1e-30  ;;  %v2767_v0 = vpop.f32.mrb[69].mxu1 }
 0xbc8   :  { %6819 = vrcp.f32 %v2770_v41 }
 0xbce   :  { %v6818_v23 = vpop.eup %6817 }
 0xbd2   :  { %v6820_v48 = vpop.eup %6819 }
 0xbd3   :  { %v6489_v22 = vpack.c.bf16 %v6820_v48, %v6818_v23 }
 0xbd5   :  { %6491 = vmatprep.subr.msk.bf16.mxu1 %vm7241_vm5, %v6489_v22 }
 0xbd6   :  { %6494 = vmatpush3.bf16.msk.msra.mxu1 %vm7241_vm5, %v6489_v22  ;;  %v9913_v22 = vld [vmem:[#allocation10_spill] sm:$0xff] }
 0xbd7   :  { %6527 = vmatprep.subr.bf16.mxu1 %v7916_v11 }
 0xbd9   :  { %6121 = vmatmul.mubr.msk.f32.vlgmr.msra.gmra.mrb[70].mxu1 %vm352_vm2, %v8009_v63 }
 0xbda   :  { %6123 = vmatprep.mubr.msk.f32.mxu1 %vm352_vm2, %v8020_v3  ;;  %6529 = vmatpush3.bf16.msra.mxu1 %v7916_v11 }
 0xbdd   :  { %6124 = vmatmul.mubr.msk.f32.gmra.mrb[72].mxu1 %vm352_vm2, %v8033_v5 }
 0xbde   :  { %6126 = vmatprep.mubr.msk.f32.mxu1 %vm352_vm2, %v8044_v34 }
 0xbe1   :  { %6127 = vmatmul.mubr.msk.f32.gmra.mrb[74].mxu1 %vm352_vm2, %v8055_v43 }
 0xbe2   :  { %6129 = vmatprep.mubr.msk.f32.mxu1 %vm352_vm2, %v8066_v7 }
 0xbe5   :  { %6130 = vmatmul.mubr.msk.f32.gmra.mrb[76].mxu1 %vm352_vm2, %v8077_v42 }
 0xbe6   :  { %6132 = vmatprep.mubr.msk.f32.mxu1 %vm352_vm2, %v8088_v9 }
 0xbe9   :  { %6133 = vmatmul.mubr.msk.f32.gmra.mrb[78].mxu1 %vm352_vm2, %v8099_v62 }
 0xbea   :  { %6135 = vmatprep.mubr.msk.f32.mxu1 %vm352_vm2, %v8110_v40 }
 0xbed   :  { %6136 = vmatmul.mubr.msk.f32.gmra.mrb[80].mxu1 %vm352_vm2, %v8121_v2 }
 0xbee   :  { %6138 = vmatprep.mubr.msk.f32.mxu1 %vm352_vm2, %v8132_v16 }
 0xbf1   :  { %6139 = vmatmul.mubr.msk.f32.gmra.mrb[82].mxu1 %vm352_vm2, %v8143_v54 }
 0xbf2   :  { %6141 = vmatprep.mubr.msk.f32.mxu1 %vm352_vm2, %v8154_v37 }
 0xbf5   :  { %6142 = vmatmul.mubr.msk.f32.gmra.mrb[84].mxu1 %vm352_vm2, %v8165_v17 }
 0xbf6   :  { %6144 = vmatprep.mubr.msk.f32.mxu1 %vm352_vm2, %v8176_v45 }
 0xbf9   :  { %6145 = vmatmul.mubr.msk.f32.gmra.mrb[86].mxu1 %vm352_vm2, %v8187_v28 }
 0xcac   :  { %v6122_v11 = vpop.f32.mrb[70].mxu1 }
 0xcad   :  { %v2932_v52 = vmul.f32 %v6122_v11, %v8473_v53  ;;  %v2842_v63 = vpop.f32.mrb[71].mxu1 }
 0xcae   :  { %v2931_v5 = vmul.f32 %v2842_v63, %v8468_v6 }
 0xcaf   :  { %2956 = vperm.xlu0 %6739, %v2932_v52  }
 0xcb0   :  { %v6125_v3 = vpop.f32.mrb[72].mxu1 }
 0xcb1   :  { %v2852_v34 = vpop.f32.mrb[73].mxu1  ;;  %v2934_v7 = vmul.f32 %v6125_v3, %v8489_v18  ;;  %v9914_v3 = vld [vmem:[#allocation12_spill] sm:$0xff] }
 0xcb2   :  { %v2933_v62 = vmul.f32 %v2852_v34, %v8484_v1  ;;  %v9915_v34 = vld [vmem:[#allocation18_spill] sm:$0xff] }
 0xcb3   :  { %2951 = vperm.xlu0 %6739, %v2931_v5  }
 0xcb4   :  { %v6128_v43 = vpop.f32.mrb[74].mxu1 }
 0xcb5   :  { %v2862_v42 = vpop.f32.mrb[75].mxu1  ;;  %v2936_v16 = vmul.f32 %v6128_v43, %v8506_v60 }
 0xcb6   :  { %v2935_v45 = vmul.f32 %v2862_v42, %v8501_v51  ;;  %v9916_v42 = vld [vmem:[#allocation20_spill] sm:$0xff] }
 0xcb7   :  { %2966 = vperm.xlu0 %6739, %v2934_v7  }
 0xcb8   :  { %v6131_v9 = vpop.f32.mrb[76].mxu1 }
 0xcb9   :  { %v2872_v40 = vpop.f32.mrb[77].mxu1  ;;  %v2938_v53 = vmul.f32 %v6131_v9, %v8523_v59  ;;  %v9917_v9 = vld [vmem:[#allocation30_spill] sm:$0xff] }
 0xcba   :  { %v2937_v56 = vmul.f32 %v2872_v40, %v8518_v14 }
 0xcbb   :  { %2961 = vperm.xlu0 %6739, %v2933_v62  }
 0xcbc   :  { %v6134_v2 = vpop.f32.mrb[78].mxu1 }
 0xcbd   :  { %v2940_v54 = vmul.f32 %v6134_v2, %v8536_v27  ;;  %v2882_v37 = vpop.f32.mrb[79].mxu1 }
 0xcbe   :  { %v2939_v36 = vmul.f32 %v2882_v37, %v8531_v61  ;;  %v9918_v37 = vld [vmem:[#allocation31_spill] sm:$0xff] }
 0xcbf   :  { %2976 = vperm.xlu0 %6739, %v2936_v16   ;;  %2996 = vperm.xlu1 %6740, %v2940_v54  }
 0xcc0   :  { %v6137_v17 = vpop.f32.mrb[80].mxu1 }
 0xcc1   :  { %v2892_v28 = vpop.f32.mrb[81].mxu1  ;;  %v2942_v59 = vmul.f32 %v6137_v17, %v8549_v26 }
 0xcc2   :  { %v2941_v10 = vmul.f32 %v2892_v28, %v8544_v4 }
 0xcc3   :  { %2971 = vperm.xlu0 %6739, %v2935_v45   ;;  %v9919_v45 = vld [vmem:[#allocation32_spill] sm:$0xff] }
 0xcc4   :  { %v6140_v6 = vpop.f32.mrb[82].mxu1 }
 0xcc5   :  { %v2902_v18 = vpop.f32.mrb[83].mxu1  ;;  %v2944_v14 = vmul.f32 %v6140_v6, %v8562_v29 }
 0xcc7   :  { %2986 = vperm.xlu0 %6739, %v2938_v53  }
 0xcc8   :  { %v6143_v1 = vpop.f32.mrb[84].mxu1 }
 0xcc9   :  { %v2946_v60 = vmul.f32 %v6143_v1, %v8575_v31  ;;  %v2912_v19 = vpop.f32.mrb[85].mxu1  ;;  %v2943_v31 = vmul.f32 %v2902_v18, %v8557_v30  ;;  %v9920_v18 = vld [vmem:[#allocation33_spill] sm:$0xff] }
 0xcca   :  { %v2945_v55 = vmul.f32 %v2912_v19, %v8570_v44 }
 0xccb   :  { %2981 = vperm.xlu0 %6739, %v2937_v56   ;;  %3026 = vperm.xlu1 %6740, %v2946_v60   ;;  %v9921_v56 = vld [vmem:[#allocation34_spill] sm:$0xff] }
 0xccc   :  { %v6146_v27 = vpop.f32.mrb[86].mxu1 }
 0xccd   :  { %v2948_v51 = vmul.f32 %v6146_v27, %v8588_v33  ;;  %v2922_v8 = vpop.f32.mrb[87].mxu1 }
 0xcce   :  { %v2947_v61 = vmul.f32 %v2922_v8, %v8583_v21 }
 0xccf   :  { %2991 = vperm.xlu0 %6739, %v2939_v36   ;;  %3036 = vperm.xlu1 %6740, %v2948_v51   ;;  %v9922_v51 = vld [vmem:[#allocation35_spill] sm:$0xff] }
 0xcd3   :  { %3006 = vperm.xlu0 %6739, %v2942_v59   ;;  %v9923_v59 = vld [vmem:[#allocation36_spill] sm:$0xff] }
 0xcd7   :  { %3001 = vperm.xlu0 %6739, %v2941_v10  }
 0xcdb   :  { %3016 = vperm.xlu0 %6739, %v2944_v14  }
 0xcdf   :  { %3011 = vperm.xlu0 %6739, %v2943_v31   ;;  %v9924_v31 = vld [vmem:[#allocation23_spill] sm:$0xff] }
 0xce3   :  { %3021 = vperm.xlu0 %6739, %v2945_v55   ;;  %v5451_v55 = vld [vmem:[%s9716_s19] ss:$0 sm:$0xff] }
 0xce7   :  { %3031 = vperm.xlu0 %6739, %v2947_v61  }
 0xd2e   :  { %v2957_v33 = vpop.permute.xlu0 %2956 }
 0xd2f   :  { %v3040_v26 = vmul.f32 %v8198_v39, %v2957_v33 }
 0xd32   :  { %v2952_v20 = vpop.permute.xlu0 %2951 }
 0xd33   :  { %v3039_v12 = vmul.f32 %v2952_v20, %v8205_v32 }
 0xd35   :  { %v6496_v4 = vpack.c.bf16 %v3040_v26, %v3039_v12 }
 0xd36   :  { %v2967_v47 = vpop.permute.xlu0 %2966 }
 0xd37   :  { %6497 = vmatpush1.bf16.msra.mxu0 %v6496_v4  ;;  %v3042_v30 = vmul.f32 %v8214_v38, %v2967_v47 }
 0xd38   :  { %6498 = vmatprep.subr.bf16.mxu0 %v9912_v13 }
 0xd3a   :  { %v2962_v29 = vpop.permute.xlu0 %2961 }
 0xd3b   :  { %v3041_v44 = vmul.f32 %v2962_v29, %v8225_v57  ;;  %v6921_v29 = vld [vmem:[%s9711_s14] ss:$0 sm:$0xff] }
 0xd3d   :  { %v6499_v46 = vpack.c.bf16 %v3042_v30, %v3041_v44  ;;  %v6922_v44 = vld [vmem:[%s9713_s16] ss:$0 sm:$0xff] }
 0xd3e   :  { %v2977_v41 = vpop.permute.xlu0 %2976  ;;  %v2997_v11 = vpop.permute.xlu1 %2996 }
 0xd3f   :  { %6500 = vmatpush1.bf16.msra.mxu0 %v6499_v46  ;;  %v3044_v39 = vmul.f32 %v8234_v50, %v2977_v41  ;;  %v3048_v5 = vmul.f32 %v9914_v3, %v2997_v11  ;;  %v8756_v11 = vld [vmem:[%s9827_s29 + $0x10] sm:$0xff]  ;;  %v6929_v3 = vld [vmem:[%s9820_s1 + $0x20] sm:$0xff] }
 0xd40   :  { %6501 = vmatprep.subr.bf16.mxu0 %v9912_v13 }
 0xd42   :  { %v2972_v21 = vpop.permute.xlu0 %2971 }
 0xd43   :  { %v3043_v32 = vmul.f32 %v2972_v21, %v8241_v15 }
 0xd45   :  { %v6502_v0 = vpack.c.bf16 %v3044_v39, %v3043_v32 }
 0xd46   :  { %v2987_v23 = vpop.permute.xlu0 %2986 }
 0xd47   :  { %6503 = vmatpush1.bf16.msra.mxu0 %v6502_v0  ;;  %v3046_v38 = vmul.f32 %v8252_v25, %v2987_v23 }
 0xd48   :  { %6504 = vmatprep.subr.bf16.mxu0 %v9912_v13 }
 0xd4a   :  { %v2982_v48 = vpop.permute.xlu0 %2981  ;;  %v3027_v16 = vpop.permute.xlu1 %3026 }
 0xd4b   :  { %v3045_v57 = vmul.f32 %v2982_v48, %v9913_v22  ;;  %v3054_v1 = vmul.f32 %v9920_v18, %v3027_v16  ;;  %v9925_v48 = vld [vmem:[#allocation24_spill] sm:$0xff]  ;;  %v8846_v16 = vld [vmem:[%s9827_s29 + $0x50] sm:$0xff] }
 0xd4c   :  { %v8745_v22 = vld [vmem:[%s9827_s29 + $0x8] sm:$0xff]  ;;  %v8890_v18 = vld [vmem:[%s9827_s29 + $0x70] sm:$0xff] }
 0xd4d   :  { %v6505_v52 = vpack.c.bf16 %v3046_v38, %v3045_v57  ;;  %v6923_v38 = vld [vmem:[%s9820_s1 + $0x8] sm:$0xff]  ;;  %v6925_v57 = vld [vmem:[%s9820_s1 + $0x10] sm:$0xff] }
 0xd4e   :  { %v2992_v63 = vpop.permute.xlu0 %2991  ;;  %v3037_v19 = vpop.permute.xlu1 %3036 }
 0xd4f   :  { %v3047_v43 = vmul.f32 %v2992_v63, %v9915_v34  ;;  %6506 = vmatpush1.bf16.msra.mxu0 %v6505_v52  ;;  %v3056_v8 = vmul.f32 %v9922_v51, %v3037_v19  ;;  %v6927_v52 = vld [vmem:[%s9820_s1 + $0x18] sm:$0xff]  ;;  %v6931_v34 = vld [vmem:[%s9820_s1 + $0x28] sm:$0xff]  ;;  %v8912_v19 = vld [vmem:[%s9827_s29 + $0x80] sm:$0xff] }
 0xd50   :  { %6507 = vmatprep.subr.bf16.mxu0 %v9912_v13  ;;  %v8769_v63 = vld [vmem:[%s9827_s29 + $0x18] sm:$0xff]  ;;  %v9926_v51 = vld [vmem:[#allocation37_spill] sm:$0xff] }
 0xd51   :  { %v6508_v50 = vpack.c.bf16 %v3048_v5, %v3047_v43  ;;  %v8780_v5 = vld [vmem:[%s9827_s29 + $0x20] sm:$0xff]  ;;  %v8791_v43 = vld [vmem:[%s9827_s29 + $0x28] sm:$0xff] }
 0xd52   :  { %v3007_v15 = vpop.permute.xlu0 %3006 }
 0xd53   :  { %6509 = vmatpush1.bf16.msra.mxu0 %v6508_v50  ;;  %v3050_v25 = vmul.f32 %v9916_v42, %v3007_v15  ;;  %v6933_v50 = vld [vmem:[%s9820_s1 + $0x30] sm:$0xff]  ;;  %v8813_v42 = vld [vmem:[%s9827_s29 + $0x38] sm:$0xff] }
 0xd54   :  { %6510 = vmatprep.subr.bf16.mxu0 %v9912_v13  ;;  %v8802_v15 = vld [vmem:[%s9827_s29 + $0x30] sm:$0xff] }
 0xd56   :  { %v3002_v7 = vpop.permute.xlu0 %3001 }
 0xd57   :  { %v3049_v62 = vmul.f32 %v3002_v7, %v9917_v9  ;;  %v6935_v7 = vld [vmem:[%s9820_s1 + $0x38] sm:$0xff]  ;;  %v8824_v9 = vld [vmem:[%s9827_s29 + $0x40] sm:$0xff] }
 0xd59   :  { %v6511_v40 = vpack.c.bf16 %v3050_v25, %v3049_v62  ;;  %v6937_v25 = vld [vmem:[%s9820_s1 + $0x40] sm:$0xff]  ;;  %v6939_v62 = vld [vmem:[%s9820_s1 + $0x48] sm:$0xff] }
 0xd5a   :  { %v3017_v2 = vpop.permute.xlu0 %3016 }
 0xd5b   :  { %6512 = vmatpush1.bf16.msra.mxu0 %v6511_v40  ;;  %v3052_v17 = vmul.f32 %v9918_v37, %v3017_v2  ;;  %v8835_v40 = vld [vmem:[%s9827_s29 + $0x48] sm:$0xff]  ;;  %v6941_v2 = vld [vmem:[%s9820_s1 + $0x50] sm:$0xff]  ;;  %v8857_v37 = vld [vmem:[%s9827_s29 + $0x58] sm:$0xff] }
 0xd5c   :  { %6513 = vmatprep.subr.bf16.mxu0 %v9912_v13 }
 0xd5e   :  { %v3012_v54 = vpop.permute.xlu0 %3011 }
 0xd5f   :  { %v3051_v28 = vmul.f32 %v3012_v54, %v9919_v45  ;;  %v6943_v54 = vld [vmem:[%s9820_s1 + $0x58] sm:$0xff]  ;;  %v8868_v45 = vld [vmem:[%s9827_s29 + $0x60] sm:$0xff] }
 0xd61   :  { %v6514_v6 = vpack.c.bf16 %v3052_v17, %v3051_v28  ;;  %v6945_v17 = vld [vmem:[%s9820_s1 + $0x60] sm:$0xff]  ;;  %v6947_v28 = vld [vmem:[%s9820_s1 + $0x68] sm:$0xff] }
 0xd62   :  { %v3022_v53 = vpop.permute.xlu0 %3021 }
 0xd63   :  { %v3053_v60 = vmul.f32 %v3022_v53, %v9921_v56  ;;  %6515 = vmatpush1.bf16.msra.mxu0 %v6514_v6  ;;  %v8879_v6 = vld [vmem:[%s9827_s29 + $0x68] sm:$0xff]  ;;  %v6949_v53 = vld [vmem:[%s9820_s1 + $0x70] sm:$0xff]  ;;  %v8901_v56 = vld [vmem:[%s9827_s29 + $0x78] sm:$0xff] }
 0xd64   :  { %6516 = vmatprep.subr.bf16.mxu0 %v9912_v13 }
 0xd65   :  { %v6517_v27 = vpack.c.bf16 %v3054_v1, %v3053_v60  ;;  %v6951_v1 = vld [vmem:[%s9820_s1 + $0x78] sm:$0xff]  ;;  %v6953_v60 = vld [vmem:[%s9820_s1 + $0x80] sm:$0xff] }
 0xd66   :  { %v3032_v36 = vpop.permute.xlu0 %3031 }
 0xd67   :  { %v3055_v10 = vmul.f32 %v3032_v36, %v9923_v59  ;;  %6518 = vmatpush1.bf16.msra.mxu0 %v6517_v27  ;;  %v6955_v27 = vld [vmem:[%s9820_s1 + $0x88] sm:$0xff] }
 0xd68   :  { %6519 = vmatprep.subr.bf16.mxu0 %v9912_v13  ;;  %v8923_v36 = vld [vmem:[%s9827_s29 + $0x88] sm:$0xff] }
 0xd69   :  { %v6520_v14 = vpack.c.bf16 %v3056_v8, %v3055_v10 }
 0xd6b   :  { %6521 = vmatpush1.bf16.msra.mxu0 %v6520_v14 }
 0xd6c   :  { %6523 = vmatprep.subr.bf16.mxu0 %v9924_v31 }
 0xd6e   :  { %3128 = vmatmul.mubr.f32.vlgmr.msra.gmra.mrb[76].mxu0 %v8596_v24 }
 0xd6f   :  { %5453 = vmatprep.mubr.msk.f32.mxu0 %vm982_vm6, %v8602_v49  ;;  %6525 = vmatpush3.bf16.msra.mxu0 %v9924_v31  ;;  %v6919_v49 = vld [vmem:[%s9820_s1] sm:$0xff] }
 0xd72   :  { %3133 = vmatmul.mubr.f32.gmra.mrb[78].mxu0 %v8609_v58  ;;  %v8718_v58 = vld [vmem:[%s9827_s29] sm:$0xff] }
 0xe41   :  { %v3129_v61 = vpop.f32.mrb[76].mxu0 }
 0xe42   :  { %v3130_v33 = vadd.f32 %v5451_v55, %v3129_v61  ;;  %v3131_v20 = vpop.f32.mrb[77].mxu0  ;;  %v9927_v61 = vld [vmem:[#allocation13_spill] sm:$0xff] }
 0xe43   :  { %v9928_v20 = vld [vmem:[#allocation14_spill] sm:$0xff] }
 0xe44   :  { %6151 = vmatprep.mubr.msk.f32.mxu0 %vm982_vm6, %v3130_v33  ;;  %6158 = vmatprep.mubr.msk.f32.mxu1 %vm982_vm6, %v3130_v33 }
 0xe45   :  { %v3134_v26 = vpop.f32.mrb[78].mxu0 }
 0xe46   :  { %v3135_v24 = vadd.f32 %v5451_v55, %v3134_v26  ;;  %v3136_v12 = vpop.f32.mrb[79].mxu0 }
 0xe48   :  { %6152 = vmatmul.mubr.msk.f32.vlgmr.msra.gmra.mrb[80].mxu0 %vm982_vm6, %v3135_v24  ;;  %6159 = vmatmul.mubr.msk.f32.vlgmr.msra.gmra.mrb[88].mxu1 %vm982_vm6, %v3135_v24 }
 0xe49   :  { %6165 = vmatprep.mubr.msk.f32.mxu0 %vm352_vm2, %v6919_v49  ;;  %6196 = vmatprep.mubr.msk.f32.mxu1 %vm352_vm2, %v8718_v58 }
 0xf1b   :  { %v6153_v4 = vpop.f32.mrb[80].mxu0  ;;  %v6160_v47 = vpop.f32.mrb[88].mxu1 }
 0xf1c   :  { %v3216_v30 = vadd.f32 %v6921_v29, %v6153_v4  ;;  %v3291_v46 = vadd.f32 %v6922_v44, %v6160_v47  ;;  %v3210_v41 = vpop.f32.mrb[81].mxu0  ;;  %v3285_v21 = vpop.f32.mrb[89].mxu1 }
 0xf1d   :  { %v3211_v39 = vadd.f32 %v6921_v29, %v3210_v41  ;;  %v3286_v32 = vadd.f32 %v6922_v44, %v3285_v21  ;;  %v9930_v21 = vld [vmem:[#allocation16_spill] sm:$0xff] }
 0xf1f   :  { %v6530_v0 = vpack.c.bf16 %v3216_v30, %v3211_v39  ;;  %v6536_v23 = vpack.c.bf16 %v3291_v46, %v3286_v32  ;;  %v9929_v46 = vld [vmem:[#allocation17_spill] sm:$0xff] }
 0xf21   :  { %6532 = vmatprep.subr.msk.bf16.mxu0 %vm7241_vm5, %v6530_v0  ;;  %6538 = vmatprep.subr.msk.bf16.mxu1 %vm7241_vm5, %v6536_v23 }
 0xf22   :  { %6535 = vmatpush3.bf16.msk.msra.mxu0 %vm7241_vm5, %v6530_v0  ;;  %6541 = vmatpush3.bf16.msk.msra.mxu1 %vm7241_vm5, %v6536_v23 }
 0xf23   :  { %6543 = vmatprep.subr.bf16.mxu0 %v9925_v48  ;;  %6546 = vmatprep.subr.bf16.mxu1 %v9912_v13 }
 0xf25   :  { %6166 = vmatmul.mubr.msk.f32.vlgmr.msra.gmra.mrb[82].mxu0 %vm352_vm2, %v6923_v38  ;;  %6197 = vmatmul.mubr.msk.f32.vlgmr.msra.gmra.mrb[90].mxu1 %vm352_vm2, %v8745_v22 }
 0xf26   :  { %6168 = vmatprep.mubr.msk.f32.mxu0 %vm352_vm2, %v6925_v57  ;;  %6199 = vmatprep.mubr.msk.f32.mxu1 %vm352_vm2, %v8756_v11 }
 0xf27   :  { %6545 = vmatpush3.bf16.msra.mxu0 %v9925_v48 }
 0xf28   :  { %6579 = vmatprep.subr.bf16.mxu0 %v9912_v13 }
 0xf29   :  { %6169 = vmatmul.mubr.msk.f32.gmra.mrb[84].mxu0 %vm352_vm2, %v6927_v52  ;;  %6200 = vmatmul.mubr.msk.f32.gmra.mrb[92].mxu1 %vm352_vm2, %v8769_v63 }
 0xf2a   :  { %6171 = vmatprep.mubr.msk.f32.mxu0 %vm352_vm2, %v6929_v3  ;;  %6202 = vmatprep.mubr.msk.f32.mxu1 %vm352_vm2, %v8780_v5 }
 0xf2d   :  { %6172 = vmatmul.mubr.msk.f32.gmra.mrb[86].mxu0 %vm352_vm2, %v6931_v34  ;;  %6203 = vmatmul.mubr.msk.f32.gmra.mrb[94].mxu1 %vm352_vm2, %v8791_v43 }
 0xf2e   :  { %6174 = vmatprep.mubr.msk.f32.mxu0 %vm352_vm2, %v6933_v50  ;;  %6205 = vmatprep.mubr.msk.f32.mxu1 %vm352_vm2, %v8802_v15 }
 0xf31   :  { %6175 = vmatmul.mubr.msk.f32.gmra.mrb[88].mxu0 %vm352_vm2, %v6935_v7  ;;  %6206 = vmatmul.mubr.msk.f32.gmra.mrb[96].mxu1 %vm352_vm2, %v8813_v42  ;;  %v9931_v7 = vld [vmem:[#allocation6_spill] sm:$0xff] }
 0xf32   :  { %6177 = vmatprep.mubr.msk.f32.mxu0 %vm352_vm2, %v6937_v25  ;;  %6208 = vmatprep.mubr.msk.f32.mxu1 %vm352_vm2, %v8824_v9 }
 0xf35   :  { %6178 = vmatmul.mubr.msk.f32.gmra.mrb[90].mxu0 %vm352_vm2, %v6939_v62  ;;  %6209 = vmatmul.mubr.msk.f32.gmra.mrb[98].mxu1 %vm352_vm2, %v8835_v40  ;;  %v9932_v62 = vld [vmem:[#allocation8_spill] sm:$0xff] }
 0xf36   :  { %6180 = vmatprep.mubr.msk.f32.mxu0 %vm352_vm2, %v6941_v2  ;;  %6211 = vmatprep.mubr.msk.f32.mxu1 %vm352_vm2, %v8846_v16 }
 0xf39   :  { %6181 = vmatmul.mubr.msk.f32.gmra.mrb[92].mxu0 %vm352_vm2, %v6943_v54  ;;  %6212 = vmatmul.mubr.msk.f32.gmra.mrb[100].mxu1 %vm352_vm2, %v8857_v37 }
 0xf3a   :  { %6183 = vmatprep.mubr.msk.f32.mxu0 %vm352_vm2, %v6945_v17  ;;  %6214 = vmatprep.mubr.msk.f32.mxu1 %vm352_vm2, %v8868_v45 }
 0xf3d   :  { %6184 = vmatmul.mubr.msk.f32.gmra.mrb[94].mxu0 %vm352_vm2, %v6947_v28  ;;  %6215 = vmatmul.mubr.msk.f32.gmra.mrb[102].mxu1 %vm352_vm2, %v8879_v6 }
 0xf3e   :  { %6186 = vmatprep.mubr.msk.f32.mxu0 %vm352_vm2, %v6949_v53  ;;  %6217 = vmatprep.mubr.msk.f32.mxu1 %vm352_vm2, %v8890_v18 }
 0xf41   :  { %6187 = vmatmul.mubr.msk.f32.gmra.mrb[96].mxu0 %vm352_vm2, %v6951_v1  ;;  %6218 = vmatmul.mubr.msk.f32.gmra.mrb[104].mxu1 %vm352_vm2, %v8901_v56 }
 0xf42   :  { %6189 = vmatprep.mubr.msk.f32.mxu0 %vm352_vm2, %v6953_v60  ;;  %6220 = vmatprep.mubr.msk.f32.mxu1 %vm352_vm2, %v8912_v19 }
 0xf45   :  { %6190 = vmatmul.mubr.msk.f32.gmra.mrb[98].mxu0 %vm352_vm2, %v6955_v27  ;;  %6221 = vmatmul.mubr.msk.f32.gmra.mrb[106].mxu1 %vm352_vm2, %v8923_v36 }
 0xf46   :  { %5514 = vmatprep.mubr.msk.f32.mxu1 %vm982_vm6, %v9926_v51 }
 0xff8   :  { %v8929_v8 = vpop.f32.mrb[82].mxu0  ;;  %v6198_v59 = vpop.f32.mrb[90].mxu1 }
 0xff9   :  { %v3611_v10 = vadd.f32 %v6198_v59, %v8929_v8  ;;  %v8932_v14 = vpop.f32.mrb[83].mxu0  ;;  %v3521_v31 = vpop.f32.mrb[91].mxu1 }
 0xffa   :  { %v3610_v55 = vadd.f32 %v3521_v31, %v8932_v14  ;;  %v9934_v31 = vld [vmem:[#allocation9_spill] sm:$0xff] }
 0xffb   :  { %v3629_v33 = vadd.f32 %v3611_v10, %v9927_v61  ;;  %v9935_v61 = vld [vmem:[#allocation7_spill] sm:$0xff] }
 0xffc   :  { %v3628_v26 = vadd.f32 %v3610_v55, %v9928_v20  ;;  %v8937_v24 = vpop.f32.mrb[84].mxu0  ;;  %v6201_v12 = vpop.f32.mrb[92].mxu1 }
 0xffd   :  { %v3665_v49 = vmul.f32 0.2, %v3629_v33  ;;  %v3613_v4 = vadd.f32 %v6201_v12, %v8937_v24  ;;  %v8940_v47 = vpop.f32.mrb[85].mxu0  ;;  %v3531_v29 = vpop.f32.mrb[93].mxu1  ;;  %vm3647_vm4 = vcmp.gt.f32.partialorder %v3629_v33, 0.0 }
 0xffe   :  { %v3664_v30 = vmul.f32 0.2, %v3628_v26  ;;  %v3612_v44 = vadd.f32 %v3531_v29, %v8940_v47  ;;  %vm3646_vm7 = vcmp.gt.f32.partialorder %v3628_v26, 0.0 }
 0xfff   :  { %v3631_v41 = vadd.f32 %v3613_v4, %v9929_v46  ;;  %v3683_v48 = vsel %vm3647_vm4, %v3629_v33, %v3665_v49 }
0x1000   :  { %v3630_v39 = vadd.f32 %v3612_v44, %v9930_v21  ;;  %v8945_v32 = vpop.f32.mrb[86].mxu0  ;;  %v6204_v0 = vpop.f32.mrb[94].mxu1  ;;  %v3682_v23 = vsel %vm3646_vm7, %v3628_v26, %v3664_v30  ;;  %v9938_v21 = vld [vmem:[#allocation15_spill] sm:$0xff] }
0x1001   :  { %v3667_v38 = vmul.f32 0.2, %v3631_v41  ;;  %v3615_v57 = vadd.f32 %v6204_v0, %v8945_v32  ;;  %v8948_v52 = vpop.f32.mrb[87].mxu0  ;;  %v3541_v3 = vpop.f32.mrb[95].mxu1  ;;  %6227 = vmatprep.mubr.msk.f32.mxu0 %vm982_vm6, %v3682_v23  ;;  %vm3649_vm9 = vcmp.gt.f32.partialorder %v3631_v41, 0.0  ;;  %v9939_v0 = vld [vmem:[#allocation11_spill] sm:$0xff] }
0x1002   :  { %v3666_v34 = vmul.f32 0.2, %v3630_v39  ;;  %v3614_v50 = vadd.f32 %v3541_v3, %v8948_v52  ;;  %6228 = vmatmul.mubr.msk.f32.vlgmr.msra.gmra.mrb[100].mxu0 %vm982_vm6, %v3683_v48  ;;  %vm3648_vm8 = vcmp.gt.f32.partialorder %v3630_v39, 0.0 }
0x1003   :  { %v3633_v25 = vadd.f32 %v3615_v57, %v9931_v7  ;;  %v3685_v51 = vsel %vm3649_vm9, %v3631_v41, %v3667_v38 }
0x1004   :  { %v3632_v2 = vadd.f32 %v3614_v50, %v9932_v62  ;;  %v8955_v54 = vpop.f32.mrb[88].mxu0  ;;  %v6207_v17 = vpop.f32.mrb[96].mxu1  ;;  %v3684_v28 = vsel %vm3648_vm8, %v3630_v39, %v3666_v34 }
0x1005   :  { %v3669_v53 = vmul.f32 0.2, %v3633_v25  ;;  %v3617_v1 = vadd.f32 %v6207_v17, %v8955_v54  ;;  %v8958_v60 = vpop.f32.mrb[89].mxu0  ;;  %v3551_v27 = vpop.f32.mrb[97].mxu1  ;;  %6230 = vmatprep.mubr.msk.f32.mxu0 %vm982_vm6, %v3684_v28  ;;  %vm3651_vm11 = vcmp.gt.f32.partialorder %v3633_v25, 0.0  ;;  %v9942_v17 = vld [vmem:[#allocation21_spill] sm:$0xff] }
0x1006   :  { %9933 = vst [vmem:[#allocation10_spill] sm:$0xff] %v8958_v60  ;;  %v3668_v59 = vmul.f32 0.2, %v3632_v2  ;;  %v3616_v10 = vadd.f32 %v3551_v27, %v8958_v60  ;;  %6231 = vmatmul.mubr.msk.f32.gmra.mrb[102].mxu0 %vm982_vm6, %v3685_v51  ;;  %vm3650_vm10 = vcmp.gt.f32.partialorder %v3632_v2, 0.0 }
0x1007   :  { %v3635_v55 = vadd.f32 %v3617_v1, %v9934_v31  ;;  %v3687_v44 = vsel %vm3651_vm11, %v3633_v25, %v3669_v53  ;;  %v9943_v53 = vld [vmem:[#allocation19_spill] sm:$0xff] }
0x1008   :  { %v3634_v33 = vadd.f32 %v3616_v10, %v9935_v61  ;;  %v8965_v20 = vpop.f32.mrb[90].mxu0  ;;  %v6210_v26 = vpop.f32.mrb[98].mxu1  ;;  %v3686_v12 = vsel %vm3650_vm10, %v3632_v2, %v3668_v59 }
0x1009   :  { %9936 = vst [vmem:[#allocation12_spill] sm:$0xff] %v8965_v20  ;;  %v3671_v49 = vmul.f32 0.2, %v3635_v55  ;;  %v3619_v4 = vadd.f32 %v6210_v26, %v8965_v20  ;;  %v8968_v29 = vpop.f32.mrb[91].mxu0  ;;  %v3561_v30 = vpop.f32.mrb[99].mxu1  ;;  %6233 = vmatprep.mubr.msk.f32.mxu0 %vm982_vm6, %v3686_v12  ;;  %vm3653_vm14 = vcmp.gt.f32.partialorder %v3635_v55, 0.0 }
0x100a   :  { %9937 = vst [vmem:[#allocation18_spill] sm:$0xff] %v8968_v29  ;;  %v3670_v46 = vmul.f32 0.2, %v3634_v33  ;;  %v3618_v41 = vadd.f32 %v3561_v30, %v8968_v29  ;;  %6234 = vmatmul.mubr.msk.f32.gmra.mrb[104].mxu0 %vm982_vm6, %v3687_v44  ;;  %vm3652_vm13 = vcmp.gt.f32.partialorder %v3634_v33, 0.0  ;;  %v9947_v30 = vld [vmem:[#allocation22_spill] sm:$0xff] }
0x100b   :  { %v3637_v39 = vadd.f32 %v3619_v4, %v9938_v21  ;;  %v3689_v25 = vsel %vm3653_vm14, %v3635_v55, %v3671_v49  ;;  %v9946_v49 = vld [vmem:[#allocation25_spill] sm:$0xff] }
0x100c   :  { %v3636_v23 = vadd.f32 %v3618_v41, %v9939_v0  ;;  %v8975_v48 = vpop.f32.mrb[92].mxu0  ;;  %v6213_v38 = vpop.f32.mrb[100].mxu1  ;;  %v3688_v57 = vsel %vm3652_vm13, %v3634_v33, %v3670_v46  ;;  %vm5243_vm13 = vcmask 32768  }
0x100d   :  { %9940 = vst [vmem:[#allocation20_spill] sm:$0xff] %v8975_v48  ;;  %v3673_v3 = vmul.f32 0.2, %v3637_v39  ;;  %v3621_v34 = vadd.f32 %v6213_v38, %v8975_v48  ;;  %v8978_v50 = vpop.f32.mrb[93].mxu0  ;;  %v3571_v7 = vpop.f32.mrb[101].mxu1  ;;  %6236 = vmatprep.mubr.msk.f32.mxu0 %vm982_vm6, %v3688_v57  ;;  %vm3655_vm0 = vcmp.gt.f32.partialorder %v3637_v39, 0.0 }
0x100e   :  { %9941 = vst [vmem:[#allocation30_spill] sm:$0xff] %v8978_v50  ;;  %v3672_v62 = vmul.f32 0.2, %v3636_v23  ;;  %v3620_v2 = vadd.f32 %v3571_v7, %v8978_v50  ;;  %6237 = vmatmul.mubr.msk.f32.gmra.mrb[106].mxu0 %vm982_vm6, %v3689_v25  ;;  %vm3654_vm15 = vcmp.gt.f32.partialorder %v3636_v23, 0.0  ;;  %v9950_v7 = vld [vmem:[#allocation27_spill] sm:$0xff] }
0x100f   :  { %v3639_v28 = vadd.f32 %v3621_v34, %v9942_v17  ;;  %v3691_v33 = vsel %vm3655_vm0, %v3637_v39, %v3673_v3 }
0x1010   :  { %v3638_v1 = vadd.f32 %v3620_v2, %v9943_v53  ;;  %v8985_v27 = vpop.f32.mrb[94].mxu0  ;;  %v6216_v51 = vpop.f32.mrb[102].mxu1  ;;  %v3690_v59 = vsel %vm3654_vm15, %v3636_v23, %v3672_v62  ;;  %v9951_v62 = vld [vmem:[#allocation26_spill] sm:$0xff] }
0x1011   :  { %9944 = vst [vmem:[#allocation31_spill] sm:$0xff] %v8985_v27  ;;  %v3675_v10 = vmul.f32 0.2, %v3639_v28  ;;  %v3623_v31 = vadd.f32 %v6216_v51, %v8985_v27  ;;  %v8988_v61 = vpop.f32.mrb[95].mxu0  ;;  %v3581_v55 = vpop.f32.mrb[103].mxu1  ;;  %6239 = vmatprep.mubr.msk.f32.mxu0 %vm982_vm6, %v3690_v59  ;;  %vm3657_vm3 = vcmp.gt.f32.partialorder %v3639_v28, 0.0 }
0x1012   :  { %9945 = vst [vmem:[#allocation32_spill] sm:$0xff] %v8988_v61  ;;  %v3674_v26 = vmul.f32 0.2, %v3638_v1  ;;  %v3622_v12 = vadd.f32 %v3581_v55, %v8988_v61  ;;  %6240 = vmatmul.mubr.msk.f32.gmra.mrb[108].mxu0 %vm982_vm6, %v3691_v33  ;;  %vm3656_vm1 = vcmp.gt.f32.partialorder %v3638_v1, 0.0 }
0x1013   :  { %v3641_v4 = vadd.f32 %v3623_v31, %v9946_v49  ;;  %v3693_v57 = vsel %vm3657_vm3, %v3639_v28, %v3675_v10  ;;  %v9955_v49 = vld [vmem:[#allocation28_spill] sm:$0xff] }
0x1014   :  { %v3640_v44 = vadd.f32 %v3622_v12, %v9947_v30  ;;  %v8995_v46 = vpop.f32.mrb[96].mxu0  ;;  %v6219_v41 = vpop.f32.mrb[104].mxu1  ;;  %v3692_v21 = vsel %vm3656_vm1, %v3638_v1, %v3674_v26  ;;  %v9954_v26 = vld [vmem:[#allocation29_spill] sm:$0xff] }
0x1015   :  { %9948 = vst [vmem:[#allocation33_spill] sm:$0xff] %v8995_v46  ;;  %v3677_v0 = vmul.f32 0.2, %v3641_v4  ;;  %v3625_v23 = vadd.f32 %v6219_v41, %v8995_v46  ;;  %v8998_v38 = vpop.f32.mrb[97].mxu0  ;;  %v3591_v39 = vpop.f32.mrb[105].mxu1  ;;  %6242 = vmatprep.mubr.msk.f32.mxu0 %vm982_vm6, %v3692_v21  ;;  %vm3659_vm7 = vcmp.gt.f32.partialorder %v3641_v4, 0.0 }
0x1016   :  { %9949 = vst [vmem:[#allocation34_spill] sm:$0xff] %v8998_v38  ;;  %v3676_v3 = vmul.f32 0.2, %v3640_v44  ;;  %v3624_v34 = vadd.f32 %v3591_v39, %v8998_v38  ;;  %6243 = vmatmul.mubr.msk.f32.gmra.mrb[110].mxu0 %vm982_vm6, %v3693_v57  ;;  %vm3658_vm4 = vcmp.gt.f32.partialorder %v3640_v44, 0.0  ;;  %v6957_v39 = vld [vmem:[%s9853_s3 + $0x8] sm:$0xff] }
0x1017   :  { %v3643_v25 = vadd.f32 %v3625_v23, %v9950_v7  ;;  %v3695_v10 = vsel %vm3659_vm7, %v3641_v4, %v3677_v0 }
0x1018   :  { %v3642_v2 = vadd.f32 %v3624_v34, %v9951_v62  ;;  %v9005_v17 = vpop.f32.mrb[98].mxu0  ;;  %v6222_v53 = vpop.f32.mrb[106].mxu1  ;;  %v3694_v1 = vsel %vm3658_vm4, %v3640_v44, %v3676_v3 }
0x1019   :  { %9952 = vst [vmem:[#allocation35_spill] sm:$0xff] %v9005_v17  ;;  %v3679_v51 = vmul.f32 0.2, %v3643_v25  ;;  %v3627_v59 = vadd.f32 %v6222_v53, %v9005_v17  ;;  %v9008_v31 = vpop.f32.mrb[99].mxu0  ;;  %v3601_v28 = vpop.f32.mrb[107].mxu1  ;;  %6245 = vmatprep.mubr.msk.f32.mxu0 %vm982_vm6, %v3694_v1  ;;  %vm3661_vm9 = vcmp.gt.f32.partialorder %v3643_v25, 0.0 }
0x101a   :  { %9953 = vst [vmem:[#allocation36_spill] sm:$0xff] %v9008_v31  ;;  %v3678_v55 = vmul.f32 0.2, %v3642_v2  ;;  %v3626_v33 = vadd.f32 %v3601_v28, %v9008_v31  ;;  %6246 = vmatmul.mubr.msk.f32.gmra.mrb[112].mxu0 %vm982_vm6, %v3695_v10  ;;  %vm3660_vm8 = vcmp.gt.f32.partialorder %v3642_v2, 0.0 }
0x101b   :  { %v3645_v12 = vadd.f32 %v3627_v59, %v9954_v26  ;;  %v3697_v21 = vsel %vm3661_vm9, %v3643_v25, %v3679_v51 }
0x101c   :  { %v3644_v30 = vadd.f32 %v3626_v33, %v9955_v49  ;;  %v3696_v44 = vsel %vm3660_vm8, %v3642_v2, %v3678_v55 }
0x101d   :  { %v3681_v41 = vmul.f32 0.2, %v3645_v12  ;;  %6248 = vmatprep.mubr.msk.f32.mxu0 %vm982_vm6, %v3696_v44  ;;  %vm3663_vm11 = vcmp.gt.f32.partialorder %v3645_v12, 0.0 }
0x101e   :  { %v3680_v23 = vmul.f32 0.2, %v3644_v30  ;;  %6249 = vmatmul.mubr.msk.f32.gmra.mrb[114].mxu0 %vm982_vm6, %v3697_v21  ;;  %vm3662_vm10 = vcmp.gt.f32.partialorder %v3644_v30, 0.0 }
0x101f   :  { %v3699_v0 = vsel %vm3663_vm11, %v3645_v12, %v3681_v41 }
0x1020   :  { %v3698_v4 = vsel %vm3662_vm10, %v3644_v30, %v3680_v23 }
0x1021   :  { %6251 = vmatprep.mubr.msk.f32.mxu0 %vm982_vm6, %v3698_v4 }
0x1022   :  { %6252 = vmatmul.mubr.msk.f32.gmra.mrb[116].mxu0 %vm982_vm6, %v3699_v0 }
0x1023   :  { %5535 = vmatprep.mubr.msk.f32.mxu0 %vm982_vm6, %v6957_v39 }
0x10d5   :  { %v9023_v57 = vpop.f32.mrb[100].mxu0 }
0x10d6   :  { %v9025_v3 = vpop.f32.mrb[101].mxu0  ;;  %v3910_v62 = vsel %vm1192_vm12, %v9023_v57, -inf }
0x10d7   :  { %v3909_v1 = vsel %vm1192_vm12, %v9025_v3, -inf }
0x10d9   :  { %v9027_v34 = vpop.f32.mrb[102].mxu0 }
0x10da   :  { %v9029_v7 = vpop.f32.mrb[103].mxu0  ;;  %v3912_v55 = vsel %vm1192_vm12, %v9027_v34, -inf }
0x10db   :  { %v3911_v12 = vsel %vm1192_vm12, %v9029_v7, -inf }
0x10dd   :  { %v9031_v25 = vpop.f32.mrb[104].mxu0 }
0x10de   :  { %v3915_v2 = vsel %vm1192_vm12, %v9031_v25, -inf  ;;  %v9037_v53 = vpop.f32.mrb[105].mxu0 }
0x10df   :  { %v3916_v51 = vmax.f32 %v3910_v62, %v3915_v2  ;;  %v3913_v59 = vsel %vm1192_vm12, %v9037_v53, -inf }
0x10e0   :  { %v3914_v28 = vmax.f32 %v3909_v1, %v3913_v59 }
0x10e1   :  { %v9043_v10 = vpop.f32.mrb[106].mxu0 }
0x10e2   :  { %v3919_v33 = vsel %vm1192_vm12, %v9043_v10, -inf  ;;  %v9049_v26 = vpop.f32.mrb[107].mxu0 }
0x10e3   :  { %v3920_v49 = vmax.f32 %v3912_v55, %v3919_v33  ;;  %v3917_v30 = vsel %vm1192_vm12, %v9049_v26, -inf }
0x10e4   :  { %v3918_v44 = vmax.f32 %v3911_v12, %v3917_v30 }
0x10e5   :  { %v9055_v41 = vpop.f32.mrb[108].mxu0 }
0x10e6   :  { %v3923_v21 = vsel %vm1192_vm12, %v9055_v41, -inf  ;;  %v9059_v23 = vpop.f32.mrb[109].mxu0 }
0x10e7   :  { %v3924_v4 = vmax.f32 %v3916_v51, %v3923_v21  ;;  %v3921_v0 = vsel %vm1192_vm12, %v9059_v23, -inf }
0x10e8   :  { %v3922_v39 = vmax.f32 %v3914_v28, %v3921_v0 }
0x10e9   :  { %v9063_v62 = vpop.f32.mrb[110].mxu0 }
0x10ea   :  { %v3927_v2 = vsel %vm1192_vm12, %v9063_v62, -inf  ;;  %v9067_v1 = vpop.f32.mrb[111].mxu0 }
0x10eb   :  { %v3928_v59 = vmax.f32 %v3920_v49, %v3927_v2  ;;  %v3925_v55 = vsel %vm1192_vm12, %v9067_v1, -inf }
0x10ec   :  { %v3926_v33 = vmax.f32 %v3918_v44, %v3925_v55 }
0x10ed   :  { %v9071_v12 = vpop.f32.mrb[112].mxu0 }
0x10ee   :  { %v3931_v51 = vsel %vm1192_vm12, %v9071_v12, -inf  ;;  %v9075_v30 = vpop.f32.mrb[113].mxu0 }
0x10ef   :  { %v3932_v28 = vmax.f32 %v3924_v4, %v3931_v51  ;;  %v3929_v21 = vsel %vm1192_vm12, %v9075_v30, -inf }
0x10f0   :  { %v3930_v0 = vmax.f32 %v3922_v39, %v3929_v21 }
0x10f1   :  { %v9079_v31 = vpop.f32.mrb[114].mxu0 }
0x10f2   :  { %v3935_v49 = vsel %vm1192_vm12, %v9079_v31, -inf  ;;  %v9083_v2 = vpop.f32.mrb[115].mxu0 }
0x10f3   :  { %v3936_v44 = vmax.f32 %v3928_v59, %v3935_v49  ;;  %v3933_v55 = vsel %vm1192_vm12, %v9083_v2, -inf }
0x10f4   :  { %v3934_v17 = vmax.f32 %v3926_v33, %v3933_v55 }
0x10f5   :  { %v9087_v38 = vpop.f32.mrb[116].mxu0 }
0x10f6   :  { %v3939_v4 = vsel %vm1192_vm12, %v9087_v38, -inf  ;;  %v9091_v51 = vpop.f32.mrb[117].mxu0  ;;  %v3942_v39 = vmax.f32 %v3934_v17, %v3936_v44 }
0x10f7   :  { %v3940_v21 = vmax.f32 %v3932_v28, %v3939_v4  ;;  %v3937_v46 = vsel %vm1192_vm12, %v9091_v51, -inf }
0x10f8   :  { %v3938_v61 = vmax.f32 %v3930_v0, %v3937_v46 }
0x10fa   :  { %v3941_v27 = vmax.f32 %v3938_v61, %v3940_v21 }
0x10fc   :  { %v3943_v50 = vmax.f32 %v3941_v27, %v3942_v39 }
0x10fe   :  { %3944 = vmax.xlane.f32.xlu0 %v3943_v50 }
0x118b   :  { %v3945_v59 = vpop.xlane.xlu0 %3944 }
0x118c   :  { %v3946_v49 = vrot.slane %v3945_v59, 4 }
0x118e   :  { %v3947_v48 = vmax.f32 %v3945_v59, %v3946_v49 }
0x1190   :  { %v3948_v33 = vrot.slane %v3947_v48, 2 }
0x1192   :  { %v3949_v55 = vmax.f32 %v3947_v48, %v3948_v33 }
0x1194   :  { %v3950_v20 = vrot.slane %v3949_v55, 1 }
0x1196   :  { %v3951_v29 = vmax.f32 %v3949_v55, %v3950_v20 }
0x1198   :  { %6729 = vpush %v3951_v29 }
0x11c9   :  { %s6730_s14 = spop %6729 }
0x11ca   :  { %v9095_v60 = vstv %s6730_s14 }
0x11cb   :  { %v3954_v17 = vsub.f32 %v9025_v3, %v9095_v60  ;;  %v3955_v46 = vsub.f32 %v9023_v57, %v9095_v60  ;;  %v3956_v50 = vsub.f32 %v9029_v7, %v9095_v60  ;;  %v3957_v27 = vsub.f32 %v9027_v34, %v9095_v60 }
0x11cc   :  { %v3958_v48 = vsub.f32 %v9037_v53, %v9095_v60  ;;  %v3959_v20 = vsub.f32 %v9031_v25, %v9095_v60  ;;  %v3960_v57 = vsub.f32 %v9049_v26, %v9095_v60  ;;  %v3961_v34 = vsub.f32 %v9043_v10, %v9095_v60 }
0x11cd   :  { %v3972_v29 = vmul.f32 1.442695, %v3954_v17  ;;  %v3974_v61 = vmul.f32 1.442695, %v3955_v46  ;;  %v3976_v28 = vmul.f32 1.442695, %v3956_v50  ;;  %v3962_v25 = vsub.f32 %v9059_v23, %v9095_v60 }
0x11ce   :  { %v3978_v0 = vmul.f32 1.442695, %v3957_v27  ;;  %v3980_v3 = vmul.f32 1.442695, %v3958_v48  ;;  %v3982_v7 = vmul.f32 1.442695, %v3959_v20  ;;  %v3963_v4 = vsub.f32 %v9055_v41, %v9095_v60 }
0x11cf   :  { %6821 = vpow2.f32 %v3972_v29  ;;  %v3984_v53 = vmul.f32 1.442695, %v3960_v57  ;;  %v3986_v44 = vmul.f32 1.442695, %v3961_v34  ;;  %v3988_v39 = vmul.f32 1.442695, %v3962_v25 }
0x11d0   :  { %6823 = vpow2.f32 %v3974_v61  ;;  %v3964_v26 = vsub.f32 %v9067_v1, %v9095_v60  ;;  %v3990_v21 = vmul.f32 1.442695, %v3963_v4  ;;  %v3965_v10 = vsub.f32 %v9063_v62, %v9095_v60  ;;  %v6958_v23 = vld [vmem:[%s9854_s11] sm:$0xff]  ;;  %v6959_v41 = vld [vmem:[%s9854_s11 + $0x8] sm:$0xff]  ;;  %v6960_v29 = vld [vmem:[%s9854_s11 + $0x10] sm:$0xff] }
0x11d1   :  { %6825 = vpow2.f32 %v3976_v28  ;;  %v3966_v62 = vsub.f32 %v9075_v30, %v9095_v60  ;;  %v3967_v27 = vsub.f32 %v9071_v12, %v9095_v60  ;;  %v6961_v30 = vld [vmem:[%s9854_s11 + $0x18] sm:$0xff]  ;;  %v6962_v25 = vld [vmem:[%s9854_s11 + $0x20] sm:$0xff] }
0x11d2   :  { %6827 = vpow2.f32 %v3978_v0  ;;  %v3992_v1 = vmul.f32 1.442695, %v3964_v26  ;;  %v3994_v50 = vmul.f32 1.442695, %v3965_v10  ;;  %v3970_v26 = vsub.f32 %v9091_v51, %v9095_v60  ;;  %v6965_v51 = vld [vmem:[%s9854_s11 + $0x38] sm:$0xff] }
0x11d3   :  { %6829 = vpow2.f32 %v3980_v3  ;;  %v3996_v12 = vmul.f32 1.442695, %v3966_v62  ;;  %v3968_v3 = vsub.f32 %v9083_v2, %v9095_v60  ;;  %v3998_v57 = vmul.f32 1.442695, %v3967_v27  ;;  %v6963_v2 = vld [vmem:[%s9854_s11 + $0x28] sm:$0xff] }
0x11d4   :  { %6831 = vpow2.f32 %v3982_v7  ;;  %v3969_v7 = vsub.f32 %v9079_v31, %v9095_v60  ;;  %v3971_v10 = vsub.f32 %v9087_v38, %v9095_v60  ;;  %v4004_v60 = vmul.f32 1.442695, %v3970_v26 }
0x11d5   :  { %6833 = vpow2.f32 %v3984_v53  ;;  %v4000_v31 = vmul.f32 1.442695, %v3968_v3 }
0x11d6   :  { %6835 = vpow2.f32 %v3986_v44  ;;  %v4006_v38 = vmul.f32 1.442695, %v3971_v10 }
0x11d7   :  { %6837 = vpow2.f32 %v3988_v39 }
0x11d8   :  { %6839 = vpow2.f32 %v3990_v21  ;;  %v4002_v21 = vmul.f32 1.442695, %v3969_v7 }
0x11d9   :  { %v6822_v59 = vpop.eup %6821  ;;  %6841 = vpow2.f32 %v3992_v1 }
0x11da   :  { %v6824_v49 = vpop.eup %6823  ;;  %v9124_v33 = vmul.f32 %v6958_v23, %v6822_v59  ;;  %6843 = vpow2.f32 %v3994_v50  ;;  %v6964_v23 = vld [vmem:[%s9854_s11 + $0x30] sm:$0xff]  ;;  %v6966_v50 = vld [vmem:[%s9854_s11 + $0x40] sm:$0xff] }
0x11db   :  { %v6826_v55 = vpop.eup %6825  ;;  %v9129_v17 = vmul.f32 %v6959_v41, %v6824_v49  ;;  %6845 = vpow2.f32 %v3996_v12  ;;  %v6968_v12 = vld [vmem:[%s9854_s11 + $0x50] sm:$0xff] }
0x11dc   :  { %v6828_v46 = vpop.eup %6827  ;;  %v9140_v61 = vmul.f32 %v6960_v29, %v6826_v55  ;;  %6847 = vpow2.f32 %v3998_v57  ;;  %v6969_v57 = vld [vmem:[%s9854_s11 + $0x58] sm:$0xff] }
0x11dd   :  { %v6830_v48 = vpop.eup %6829  ;;  %v6547_v20 = vpack.c.bf16 %v9129_v17, %v9124_v33  ;;  %v9145_v28 = vmul.f32 %v6961_v30, %v6828_v46  ;;  %6849 = vpow2.f32 %v4000_v31  ;;  %v6971_v31 = vld [vmem:[%s9854_s11 + $0x68] sm:$0xff] }
0x11de   :  { %v6832_v0 = vpop.eup %6831  ;;  %v9157_v44 = vmul.f32 %v6962_v25, %v6830_v48  ;;  %6851 = vpow2.f32 %v4002_v21  ;;  %v6967_v48 = vld [vmem:[%s9854_s11 + $0x48] sm:$0xff] }
0x11df   :  { %6548 = vmatpush1.bf16.msra.mxu1 %v6547_v20  ;;  %v6834_v34 = vpop.eup %6833  ;;  %v6550_v53 = vpack.c.bf16 %v9145_v28, %v9140_v61  ;;  %v9162_v4 = vmul.f32 %v6963_v2, %v6832_v0  ;;  %6853 = vpow2.f32 %v4004_v60  ;;  %v6970_v2 = vld [vmem:[%s9854_s11 + $0x60] sm:$0xff] }
0x11e0   :  { %6549 = vmatprep.subr.bf16.mxu1 %v9912_v13  ;;  %v6836_v39 = vpop.eup %6835  ;;  %v9174_v55 = vmul.f32 %v6964_v23, %v6834_v34  ;;  %6855 = vpow2.f32 %v4006_v38 }
0x11e1   :  { %v6838_v59 = vpop.eup %6837  ;;  %v6553_v49 = vpack.c.bf16 %v9162_v4, %v9157_v44  ;;  %v9179_v41 = vmul.f32 %v6965_v51, %v6836_v39  ;;  %v6973_v51 = vld [vmem:[%s9854_s11 + $0x78] sm:$0xff] }
0x11e2   :  { %v6840_v1 = vpop.eup %6839  ;;  %v9187_v27 = vmul.f32 %v6966_v50, %v6838_v59  ;;  %v6975_v50 = vld [vmem:[%s9854_s11 + $0x88] sm:$0xff] }
0x11e3   :  { %6551 = vmatpush1.bf16.msra.mxu1 %v6550_v53  ;;  %v6842_v62 = vpop.eup %6841  ;;  %v6556_v46 = vpack.c.bf16 %v9179_v41, %v9174_v55  ;;  %v9192_v20 = vmul.f32 %v6967_v48, %v6840_v1 }
0x11e4   :  { %6552 = vmatprep.subr.bf16.mxu1 %v9912_v13  ;;  %v6844_v29 = vpop.eup %6843  ;;  %v9200_v3 = vmul.f32 %v6968_v12, %v6842_v62  ;;  %v6974_v62 = vld [vmem:[%s9854_s11 + $0x80] sm:$0xff]  ;;  %v9265_v12 = vld [vmem:[%s9853_s3 + $0x10] sm:$0xf] }
0x11e5   :  { %v6846_v30 = vpop.eup %6845  ;;  %v6559_v0 = vpack.c.bf16 %v9192_v20, %v9187_v27  ;;  %v9205_v7 = vmul.f32 %v6969_v57, %v6844_v29 }
0x11e6   :  { %v6848_v34 = vpop.eup %6847  ;;  %v9213_v39 = vmul.f32 %v6970_v2, %v6846_v30  ;;  %v9252_v30 = vld [vmem:[%s9853_s3] sm:$0xff] }
0x11e7   :  { %6554 = vmatpush1.bf16.msra.mxu1 %v6553_v49  ;;  %v6850_v53 = vpop.eup %6849  ;;  %v6562_v25 = vpack.c.bf16 %v9205_v7, %v9200_v3  ;;  %v9218_v26 = vmul.f32 %v6971_v31, %v6848_v34  ;;  %v6972_v49 = vld [vmem:[%s9854_s11 + $0x70] sm:$0xff] }
0x11e8   :  { %6555 = vmatprep.subr.bf16.mxu1 %v9912_v13  ;;  %v6852_v21 = vpop.eup %6851  ;;  %v9226_v23 = vmul.f32 %v6972_v49, %v6850_v53 }
0x11e9   :  { %v6854_v10 = vpop.eup %6853  ;;  %v6565_v59 = vpack.c.bf16 %v9218_v26, %v9213_v39  ;;  %v9231_v1 = vmul.f32 %v6973_v51, %v6852_v21 }
0x11ea   :  { %v6856_v60 = vpop.eup %6855 }
0x11eb   :  { %6557 = vmatpush1.bf16.msra.mxu1 %v6556_v46  ;;  %v6568_v38 = vpack.c.bf16 %v9231_v1, %v9226_v23  ;;  %v9239_v46 = vmul.f32 %v6974_v62, %v6854_v10  ;;  %v9244_v48 = vmul.f32 %v6975_v50, %v6856_v60 }
0x11ec   :  { %6558 = vmatprep.subr.bf16.mxu1 %v9912_v13 }
0x11ed   :  { %v6571_v29 = vpack.c.bf16 %v9244_v48, %v9239_v46 }
0x11ef   :  { %6560 = vmatpush1.bf16.msra.mxu1 %v6559_v0  ;;  %v9258_v0 = vld [vmem:[%s9853_s3 + $0x18] sm:$0xf] }
0x11f0   :  { %6561 = vmatprep.subr.bf16.mxu1 %v9912_v13 }
0x11f3   :  { %6563 = vmatpush1.bf16.msra.mxu1 %v6562_v25 }
0x11f4   :  { %6564 = vmatprep.subr.bf16.mxu1 %v9912_v13 }
0x11f7   :  { %6566 = vmatpush1.bf16.msra.mxu1 %v6565_v59 }
0x11f8   :  { %6567 = vmatprep.subr.bf16.mxu1 %v9912_v13 }
0x11fb   :  { %6569 = vmatpush1.bf16.msra.mxu1 %v6568_v38 }
0x11fc   :  { %6570 = vmatprep.subr.bf16.mxu1 %v9912_v13 }
0x11ff   :  { %6572 = vmatpush1.bf16.msra.mxu1 %v6571_v29 }
0x1202   :  { %4091 = vmatmul.mubr.f32.vlgmr.msra.gmra.mrb[108].mxu1 %v9252_v30 }
0x1203   :  { %5515 = vmatprep.mubr.msk.f32.mxu1 %vm982_vm6, %v9258_v0 }
0x1206   :  { %4096 = vmatmul.mubr.f32.gmra.mrb[110].mxu1 %v9265_v12 }
0x1207   :  { %6258 = vmatprep.mubr.msk.f32.mxu1 %vm352_vm2, %v8718_v58 }
0x12d5   :  { %v4092_v57 = vpop.f32.mrb[108].mxu1 }
0x12d6   :  { %v4094_v34 = vpop.f32.mrb[109].mxu1  ;;  %v4101_v53 = vmax.f32 %v4092_v57, 1e-30 }
0x12d8   :  { %6857 = vrcp.f32 %v4101_v53 }
0x12d9   :  { %v4097_v25 = vpop.f32.mrb[110].mxu1 }
0x12da   :  { %v4102_v2 = vmax.f32 %v4097_v25, 1e-30  ;;  %v4099_v31 = vpop.f32.mrb[111].mxu1 }
0x12dc   :  { %6859 = vrcp.f32 %v4102_v2 }
0x12e2   :  { %v6858_v21 = vpop.eup %6857 }
0x12e6   :  { %v6860_v10 = vpop.eup %6859 }
0x12e7   :  { %v6573_v59 = vpack.c.bf16 %v6860_v10, %v6858_v21  ;;  %v9956_v10 = vld [vmem:[#allocation10_spill] sm:$0xff] }
0x12e9   :  { %6575 = vmatprep.subr.msk.bf16.mxu1 %vm7241_vm5, %v6573_v59 }
0x12ea   :  { %6578 = vmatpush3.bf16.msk.msra.mxu1 %vm7241_vm5, %v6573_v59  ;;  %vm4465_vm5 = vcmask 125952  }
0x12eb   :  { %6624 = vmatprep.subr.bf16.mxu1 %v9912_v13 }
0x12ed   :  { %6259 = vmatmul.mubr.msk.f32.vlgmr.msra.gmra.mrb[112].mxu1 %vm352_vm2, %v8745_v22 }
0x12ee   :  { %6261 = vmatprep.mubr.msk.f32.mxu1 %vm352_vm2, %v8756_v11 }
0x12f1   :  { %6262 = vmatmul.mubr.msk.f32.gmra.mrb[114].mxu1 %vm352_vm2, %v8769_v63 }
0x12f2   :  { %6264 = vmatprep.mubr.msk.f32.mxu1 %vm352_vm2, %v8780_v5 }
0x12f5   :  { %6265 = vmatmul.mubr.msk.f32.gmra.mrb[116].mxu1 %vm352_vm2, %v8791_v43 }
0x12f6   :  { %6267 = vmatprep.mubr.msk.f32.mxu1 %vm352_vm2, %v8802_v15 }
0x12f9   :  { %6268 = vmatmul.mubr.msk.f32.gmra.mrb[118].mxu1 %vm352_vm2, %v8813_v42 }
0x12fa   :  { %6270 = vmatprep.mubr.msk.f32.mxu1 %vm352_vm2, %v8824_v9 }
0x12fd   :  { %6271 = vmatmul.mubr.msk.f32.gmra.mrb[120].mxu1 %vm352_vm2, %v8835_v40 }
0x12fe   :  { %6273 = vmatprep.mubr.msk.f32.mxu1 %vm352_vm2, %v8846_v16 }
0x1301   :  { %6274 = vmatmul.mubr.msk.f32.gmra.mrb[122].mxu1 %vm352_vm2, %v8857_v37 }
0x1302   :  { %6276 = vmatprep.mubr.msk.f32.mxu1 %vm352_vm2, %v8868_v45 }
0x1305   :  { %6277 = vmatmul.mubr.msk.f32.gmra.mrb[124].mxu1 %vm352_vm2, %v8879_v6 }
0x1306   :  { %6279 = vmatprep.mubr.msk.f32.mxu1 %vm352_vm2, %v8890_v18 }
0x1309   :  { %6280 = vmatmul.mubr.msk.f32.gmra.mrb[126].mxu1 %vm352_vm2, %v8901_v56 }
0x130a   :  { %6282 = vmatprep.mubr.msk.f32.mxu1 %vm352_vm2, %v8912_v19 }
0x130d   :  { %6283 = vmatmul.mubr.msk.f32.gmra.mrb[128].mxu1 %vm352_vm2, %v8923_v36  ;;  %vm7007_vm2 = vmmov 0  }
0x13c0   :  { %v6260_v35 = vpop.f32.mrb[112].mxu1 }
0x13c1   :  { %v4264_v58 = vmul.f32 %v6260_v35, %v9129_v17  ;;  %v4174_v22 = vpop.f32.mrb[113].mxu1 }
0x13c2   :  { %v4263_v63 = vmul.f32 %v4174_v22, %v9124_v33  ;;  %v9957_v22 = vld [vmem:[#allocation18_spill] sm:$0xff] }
0x13c3   :  { %4288 = vperm.xlu1 %6740, %v4264_v58  }
0x13c4   :  { %v6263_v11 = vpop.f32.mrb[114].mxu1 }
0x13c5   :  { %v4184_v5 = vpop.f32.mrb[115].mxu1  ;;  %v4266_v15 = vmul.f32 %v6263_v11, %v9145_v28 }
0x13c6   :  { %v4265_v40 = vmul.f32 %v4184_v5, %v9140_v61 }
0x13c7   :  { %4283 = vperm.xlu1 %6740, %v4263_v63   ;;  %v9958_v63 = vld [vmem:[#allocation12_spill] sm:$0xff] }
0x13c8   :  { %v6266_v43 = vpop.f32.mrb[116].mxu1 }
0x13c9   :  { %v4194_v42 = vpop.f32.mrb[117].mxu1  ;;  %v4268_v45 = vmul.f32 %v6266_v43, %v9162_v4 }
0x13ca   :  { %v4267_v19 = vmul.f32 %v4194_v42, %v9157_v44  ;;  %v9960_v42 = vld [vmem:[#allocation30_spill] sm:$0xff] }
0x13cb   :  { %4298 = vperm.xlu1 %6740, %v4266_v15   ;;  %v9959_v15 = vld [vmem:[#allocation20_spill] sm:$0xff] }
0x13cc   :  { %v6269_v9 = vpop.f32.mrb[118].mxu1 }
0x13cd   :  { %v4204_v16 = vpop.f32.mrb[119].mxu1  ;;  %v4270_v17 = vmul.f32 %v6269_v9, %v9179_v41 }
0x13ce   :  { %v4269_v49 = vmul.f32 %v4204_v16, %v9174_v55 }
0x13cf   :  { %4293 = vperm.xlu1 %6740, %v4265_v40  }
0x13d0   :  { %v6272_v37 = vpop.f32.mrb[120].mxu1 }
0x13d1   :  { %v4214_v6 = vpop.f32.mrb[121].mxu1  ;;  %v4272_v60 = vmul.f32 %v6272_v37, %v9192_v20 }
0x13d2   :  { %v4271_v18 = vmul.f32 %v4214_v6, %v9187_v27  ;;  %v9961_v6 = vld [vmem:[#allocation31_spill] sm:$0xff] }
0x13d3   :  { %4308 = vperm.xlu1 %6740, %v4268_v45  }
0x13d4   :  { %4323 = vperm.xlu0 %6739, %v4271_v18   ;;  %v6275_v56 = vpop.f32.mrb[122].mxu1 }
0x13d5   :  { %v4224_v36 = vpop.f32.mrb[123].mxu1  ;;  %v4274_v41 = vmul.f32 %v6275_v56, %v9205_v7  ;;  %v9962_v56 = vld [vmem:[#allocation32_spill] sm:$0xff] }
0x13d6   :  { %v4273_v62 = vmul.f32 %v4224_v36, %v9200_v3 }
0x13d7   :  { %4303 = vperm.xlu1 %6740, %v4267_v19  }
0x13d8   :  { %v6278_v33 = vpop.f32.mrb[124].mxu1 }
0x13d9   :  { %v4234_v28 = vpop.f32.mrb[125].mxu1  ;;  %v4276_v55 = vmul.f32 %v6278_v33, %v9218_v26 }
0x13db   :  { %4318 = vperm.xlu1 %6740, %v4270_v17   ;;  %v9963_v17 = vld [vmem:[#allocation33_spill] sm:$0xff] }
0x13dc   :  { %v6281_v61 = vpop.f32.mrb[126].mxu1 }
0x13dd   :  { %v4278_v4 = vmul.f32 %v6281_v61, %v9231_v1  ;;  %v4244_v51 = vpop.f32.mrb[127].mxu1  ;;  %v4275_v1 = vmul.f32 %v4234_v28, %v9213_v39  ;;  %v9964_v61 = vld [vmem:[#allocation34_spill] sm:$0xff] }
0x13de   :  { %v4277_v50 = vmul.f32 %v4244_v51, %v9226_v23 }
0x13df   :  { %4313 = vperm.xlu1 %6740, %v4269_v49   ;;  %4358 = vperm.xlu0 %6739, %v4278_v4  }
0x13e0   :  { %v6284_v27 = vpop.f32.mrb[128].mxu1 }
0x13e1   :  { %v4280_v44 = vmul.f32 %v6284_v27, %v9244_v48  ;;  %v4254_v38 = vpop.f32.mrb[129].mxu1 }
0x13e2   :  { %v4279_v20 = vmul.f32 %v4254_v38, %v9239_v46  ;;  %v9966_v38 = vld [vmem:[#allocation36_spill] sm:$0xff] }
0x13e3   :  { %4328 = vperm.xlu1 %6740, %v4272_v60   ;;  %4368 = vperm.xlu0 %6739, %v4280_v44   ;;  %v9965_v60 = vld [vmem:[#allocation35_spill] sm:$0xff] }
0x13e7   :  { %4338 = vperm.xlu1 %6740, %v4274_v41  }
0x13eb   :  { %4333 = vperm.xlu1 %6740, %v4273_v62  }
0x13ef   :  { %4348 = vperm.xlu1 %6740, %v4276_v55   ;;  %v4469_v55 = vld [vmem:[%s9717_s20] sm:$0xff] }
0x13f3   :  { %4343 = vperm.xlu1 %6740, %v4275_v1   ;;  %v4470_v1 = vld [vmem:[%s9717_s20 + $0x8] sm:$0xff] }
0x13f7   :  { %4353 = vperm.xlu1 %6740, %v4277_v50   ;;  %v6607_v50 = vpack.c.bf16 %v4470_v1, %v4469_v55  ;;  %v5026_v55 = vld [vmem:[%s9721_s24 + $0x38] sm:$0xff] }
0x13fb   :  { %4363 = vperm.xlu1 %6740, %v4279_v20   ;;  %v7008_v20 = vmov 0.0  }
0x13fc   :  { %6359 = vmatprep.mubr.msk.f32.mxu1 %vm7007_vm2, %v7008_v20 }
0x1442   :  { %v4289_v48 = vpop.permute.xlu1 %4288 }
0x1443   :  { %v4372_v7 = vmul.f32 %v8929_v8, %v4289_v48 }
0x1446   :  { %v4284_v29 = vpop.permute.xlu1 %4283 }
0x1447   :  { %v4371_v57 = vmul.f32 %v4284_v29, %v8932_v14  ;;  %v4934_v29 = vld [vmem:[%s9719_s22 + $0x18] sm:$0xff] }
0x1449   :  { %v6580_v3 = vpack.c.bf16 %v4372_v7, %v4371_v57  ;;  %v4935_v57 = vld [vmem:[%s9719_s22 + $0x20] sm:$0xff] }
0x144a   :  { %v4299_v34 = vpop.permute.xlu1 %4298 }
0x144b   :  { %6581 = vmatpush1.bf16.msra.mxu0 %v6580_v3  ;;  %v4374_v39 = vmul.f32 %v8937_v24, %v4299_v34  ;;  %v4936_v3 = vld [vmem:[%s9719_s22 + $0x28] sm:$0xff] }
0x144c   :  { %6582 = vmatprep.subr.bf16.mxu0 %v9912_v13  ;;  %v6631_v34 = vpack.c.bf16 %v4936_v3, %v4935_v57  ;;  %v5030_v57 = vld [vmem:[%s9721_s24 + $0x58] sm:$0xff] }
0x144e   :  { %v4294_v26 = vpop.permute.xlu1 %4293 }
0x144f   :  { %v4373_v23 = vmul.f32 %v4294_v26, %v8940_v47  ;;  %v4937_v26 = vld [vmem:[%s9719_s22 + $0x30] sm:$0xff] }
0x1451   :  { %v6583_v53 = vpack.c.bf16 %v4374_v39, %v4373_v23  ;;  %v4938_v39 = vld [vmem:[%s9719_s22 + $0x38] sm:$0xff] }
0x1452   :  { %v4309_v25 = vpop.permute.xlu1 %4308  ;;  %v6634_v23 = vpack.c.bf16 %v4938_v39, %v4937_v26  ;;  %v5027_v26 = vld [vmem:[%s9721_s24 + $0x40] sm:$0xff]  ;;  %v5029_v39 = vld [vmem:[%s9721_s24 + $0x50] sm:$0xff] }
0x1453   :  { %6584 = vmatpush1.bf16.msra.mxu0 %v6583_v53  ;;  %v4376_v8 = vmul.f32 %v8945_v32, %v4309_v25  ;;  %v4324_v59 = vpop.permute.xlu0 %4323  ;;  %v4939_v53 = vld [vmem:[%s9719_s22 + $0x40] sm:$0xff]  ;;  %v4940_v25 = vld [vmem:[%s9719_s22 + $0x48] sm:$0xff] }
0x1454   :  { %6585 = vmatprep.subr.bf16.mxu0 %v9912_v13  ;;  %v4379_v11 = vmul.f32 %v4324_v59, %v9957_v22  ;;  %v4546_v22 = vld [vmem:[%s9717_s20 + $0x10] sm:$0xff] }
0x1456   :  { %v4304_v46 = vpop.permute.xlu1 %4303 }
0x1457   :  { %v4375_v14 = vmul.f32 %v4304_v46, %v8948_v52  ;;  %v6637_v46 = vpack.c.bf16 %v4940_v25, %v4939_v53  ;;  %v5034_v53 = vld [vmem:[%s9721_s24 + $0x78] sm:$0xff] }
0x1459   :  { %v6586_v2 = vpack.c.bf16 %v4376_v8, %v4375_v14  ;;  %v4941_v8 = vld [vmem:[%s9719_s22 + $0x50] sm:$0xff]  ;;  %v4942_v14 = vld [vmem:[%s9719_s22 + $0x58] sm:$0xff] }
0x145a   :  { %v4319_v31 = vpop.permute.xlu1 %4318 }
0x145b   :  { %6587 = vmatpush1.bf16.msra.mxu0 %v6586_v2  ;;  %v4378_v24 = vmul.f32 %v8955_v54, %v4319_v31  ;;  %v6640_v2 = vpack.c.bf16 %v4942_v14, %v4941_v8  ;;  %v4943_v31 = vld [vmem:[%s9719_s22 + $0x60] sm:$0xff]  ;;  %v5033_v8 = vld [vmem:[%s9721_s24 + $0x70] sm:$0xff]  ;;  %v5036_v14 = vld [vmem:[%s9721_s24 + $0x88] sm:$0xff] }
0x145c   :  { %6588 = vmatprep.subr.bf16.mxu0 %v9912_v13 }
0x145e   :  { %v4314_v21 = vpop.permute.xlu1 %4313  ;;  %v4359_v37 = vpop.permute.xlu0 %4358 }
0x145f   :  { %v4377_v47 = vmul.f32 %v4314_v21, %v9956_v10  ;;  %v4386_v28 = vmul.f32 %v9963_v17, %v4359_v37  ;;  %v4944_v21 = vld [vmem:[%s9719_s22 + $0x68] sm:$0xff] }
0x1461   :  { %v6589_v35 = vpack.c.bf16 %v4378_v24, %v4377_v47  ;;  %v6643_v24 = vpack.c.bf16 %v4944_v21, %v4943_v31  ;;  %v6979_v47 = vld [vmem:[%s9716_s19] ss:$0 sm:$0xff] }
0x1462   :  { %v4329_v58 = vpop.permute.xlu1 %4328  ;;  %v4369_v4 = vpop.permute.xlu0 %4368 }
0x1463   :  { %v4380_v5 = vmul.f32 %v9958_v63, %v4329_v58  ;;  %6590 = vmatpush1.bf16.msra.mxu0 %v6589_v35  ;;  %v4388_v44 = vmul.f32 %v9965_v60, %v4369_v4  ;;  %v5020_v4 = vld [vmem:[%s9721_s24 + $0x8] sm:$0xff]  ;;  %v4467_v60 = vld [vmem:[%s9718_s21] sm:$0x1] }
0x1464   :  { %6591 = vmatprep.subr.bf16.mxu0 %v9912_v13 }
0x1465   :  { %v6592_v32 = vpack.c.bf16 %v4380_v5, %v4379_v11  ;;  %v4547_v11 = vld [vmem:[%s9717_s20 + $0x18] sm:$0xff] }
0x1466   :  { %v4339_v52 = vpop.permute.xlu1 %4338 }
0x1467   :  { %6593 = vmatpush1.bf16.msra.mxu0 %v6592_v32  ;;  %v4382_v54 = vmul.f32 %v9959_v15, %v4339_v52  ;;  %v6610_v32 = vpack.c.bf16 %v4547_v11, %v4546_v22  ;;  %v4624_v15 = vld [vmem:[%s9717_s20 + $0x28] sm:$0xff]  ;;  %v5039_v22 = vld [vmem:[%s9721_s24 + $0xa0] sm:$0xff]  ;;  %v5041_v11 = vld [vmem:[%s9721_s24 + $0xb0] sm:$0xff] }
0x1468   :  { %6594 = vmatprep.subr.bf16.mxu0 %v9912_v13 }
0x146a   :  { %v4334_v43 = vpop.permute.xlu1 %4333 }
0x146b   :  { %v4381_v9 = vmul.f32 %v4334_v43, %v9960_v42  ;;  %v4623_v43 = vld [vmem:[%s9717_s20 + $0x20] sm:$0xff] }
0x146d   :  { %v6595_v40 = vpack.c.bf16 %v4382_v54, %v4381_v9  ;;  %v6613_v54 = vpack.c.bf16 %v4624_v15, %v4623_v43  ;;  %v4700_v9 = vld [vmem:[%s9717_s20 + $0x30] sm:$0xff]  ;;  %v5043_v43 = vld [vmem:[%s9721_s24 + $0xc0] sm:$0xff] }
0x146e   :  { %v4349_v16 = vpop.permute.xlu1 %4348  ;;  %v5045_v15 = vld [vmem:[%s9721_s24 + $0xd0] sm:$0xff] }
0x146f   :  { %6596 = vmatpush1.bf16.msra.mxu0 %v6595_v40  ;;  %v4384_v18 = vmul.f32 %v9961_v6, %v4349_v16  ;;  %v4701_v40 = vld [vmem:[%s9717_s20 + $0x38] sm:$0xff]  ;;  %v4778_v6 = vld [vmem:[%s9717_s20 + $0x48] sm:$0xff] }
0x1470   :  { %6597 = vmatprep.subr.bf16.mxu0 %v9912_v13  ;;  %v6616_v16 = vpack.c.bf16 %v4701_v40, %v4700_v9  ;;  %v5050_v9 = vld [vmem:[%s9721_s24 + $0xf8] sm:$0xff]  ;;  %v5047_v40 = vld [vmem:[%s9721_s24 + $0xe0] sm:$0xff] }
0x1472   :  { %v4344_v45 = vpop.permute.xlu1 %4343 }
0x1473   :  { %v4383_v19 = vmul.f32 %v4344_v45, %v9962_v56  ;;  %v4777_v45 = vld [vmem:[%s9717_s20 + $0x40] sm:$0xff] }
0x1475   :  { %v6598_v36 = vpack.c.bf16 %v4384_v18, %v4383_v19  ;;  %v6619_v18 = vpack.c.bf16 %v4778_v6, %v4777_v45  ;;  %v4854_v19 = vld [vmem:[%s9717_s20 + $0x50] sm:$0xff]  ;;  %v5152_v6 = vld [vmem:[%s9723_s26 + $0x80] sm:$0xff] }
0x1476   :  { %v4354_v33 = vpop.permute.xlu1 %4353 }
0x1477   :  { %v4385_v49 = vmul.f32 %v4354_v33, %v9964_v61  ;;  %6599 = vmatpush1.bf16.msra.mxu0 %v6598_v36  ;;  %v4855_v36 = vld [vmem:[%s9717_s20 + $0x58] sm:$0xff] }
0x1478   :  { %6600 = vmatprep.subr.bf16.mxu0 %v9912_v13  ;;  %v6622_v33 = vpack.c.bf16 %v4855_v36, %v4854_v19  ;;  %v4946_v61 = vld [vmem:[%s9719_s22 + $0x78] sm:$0xff]  ;;  %v5137_v36 = vld [vmem:[%s9723_s26 + $0x8] sm:$0xff] }
0x1479   :  { %v6601_v51 = vpack.c.bf16 %v4386_v28, %v4385_v49 }
0x147a   :  { %v4364_v27 = vpop.permute.xlu1 %4363 }
0x147b   :  { %v4387_v41 = vmul.f32 %v4364_v27, %v9966_v38  ;;  %6602 = vmatpush1.bf16.msra.mxu0 %v6601_v51  ;;  %v5022_v51 = vld [vmem:[%s9721_s24 + $0x18] sm:$0xff]  ;;  %v5021_v38 = vld [vmem:[%s9721_s24 + $0x10] sm:$0xff] }
0x147c   :  { %6603 = vmatprep.subr.bf16.mxu0 %v9912_v13  ;;  %v6648_v27 = vpack.c.bf16 %v5022_v51, %v5020_v4  ;;  %v5156_v4 = vld [vmem:[%s9723_s26 + $0xa0] sm:$0xff]  ;;  %v5157_v51 = vld [vmem:[%s9723_s26 + $0xa8] sm:$0xff] }
0x147d   :  { %v6604_v62 = vpack.c.bf16 %v4388_v44, %v4387_v41  ;;  %v5019_v44 = vld [vmem:[%s9721_s24] sm:$0xff] }
0x147f   :  { %6605 = vmatpush1.bf16.msra.mxu0 %v6604_v62  ;;  %v5024_v62 = vld [vmem:[%s9721_s24 + $0x28] sm:$0xff] }
0x1480   :  { %6606 = vmatprep.subr.bf16.mxu0 %v9912_v13 }
0x1482   :  { %4454 = vmatmul.mubr.f32.vlgmr.msra.gmra.mrb[118].mxu0 %v9252_v30  ;;  %v4931_v30 = vld [vmem:[%s9719_s22] sm:$0xff] }
0x1483   :  { %5536 = vmatprep.mubr.msk.f32.mxu0 %vm982_vm6, %v9258_v0  ;;  %6608 = vmatpush3.bf16.msra.mxu0 %v6607_v50  ;;  %v4932_v0 = vld [vmem:[%s9719_s22 + $0x8] sm:$0xff] }
0x1484   :  { %6609 = vmatprep.subr.bf16.mxu0 %v9912_v13  ;;  %v6625_v48 = vpack.c.bf16 %v4932_v0, %v4931_v30  ;;  %v6650_v30 = vpack.c.bf16 %v5021_v38, %v5019_v44  ;;  %v5140_v44 = vld [vmem:[%s9723_s26 + $0x20] sm:$0xff]  ;;  %v5141_v38 = vld [vmem:[%s9723_s26 + $0x28] sm:$0xff] }
0x1486   :  { %4459 = vmatmul.mubr.f32.gmra.mrb[120].mxu0 %v9265_v12  ;;  %v4933_v12 = vld [vmem:[%s9719_s22 + $0x10] sm:$0xff]  ;;  %6626 = vmatpush3.bf16.msra.mxu1 %v6625_v48  ;;  %v5023_v48 = vld [vmem:[%s9721_s24 + $0x20] sm:$0xff] }
0x1487   :  { %6289 = vmatprep.mubr.msk.f32.mxu0 %vm7007_vm2, %v7008_v20  ;;  %v6628_v7 = vpack.c.bf16 %v4934_v29, %v4933_v12  ;;  %6627 = vmatprep.subr.bf16.mxu1 %v9912_v13  ;;  %v6652_v12 = vpack.c.bf16 %v5026_v55, %v5024_v62  ;;  %v5025_v29 = vld [vmem:[%s9721_s24 + $0x30] sm:$0xff]  ;;  %v5159_v62 = vld [vmem:[%s9723_s26 + $0xb8] sm:$0xff]  ;;  %v6690_v55 = vpack.c.bf16 %v5141_v38, %v5140_v44 }
0x1488   :  { %v6654_v3 = vpack.c.bf16 %v5025_v29, %v5023_v48 }
0x148a   :  { %6629 = vmatpush3.bf16.msra.mxu1 %v6628_v7  ;;  %v5028_v7 = vld [vmem:[%s9721_s24 + $0x48] sm:$0xff] }
0x148b   :  { %6630 = vmatprep.subr.bf16.mxu1 %v9912_v13 }
0x148e   :  { %6632 = vmatpush3.bf16.msra.mxu1 %v6631_v34  ;;  %v6656_v34 = vpack.c.bf16 %v5030_v57, %v5028_v7  ;;  %v5144_v7 = vld [vmem:[%s9723_s26 + $0x40] sm:$0xff]  ;;  %v5145_v57 = vld [vmem:[%s9723_s26 + $0x48] sm:$0xff] }
0x148f   :  { %6633 = vmatprep.subr.bf16.mxu1 %v9912_v13 }
0x1492   :  { %6635 = vmatpush3.bf16.msra.mxu1 %v6634_v23  ;;  %v5032_v23 = vld [vmem:[%s9721_s24 + $0x68] sm:$0xff] }
0x1493   :  { %6636 = vmatprep.subr.bf16.mxu1 %v9912_v13  ;;  %v6660_v25 = vpack.c.bf16 %v5034_v53, %v5032_v23  ;;  %v5146_v23 = vld [vmem:[%s9723_s26 + $0x50] sm:$0xff]  ;;  %v5147_v53 = vld [vmem:[%s9723_s26 + $0x58] sm:$0xff] }
0x1496   :  { %6638 = vmatpush3.bf16.msra.mxu1 %v6637_v46  ;;  %v5031_v46 = vld [vmem:[%s9721_s24 + $0x60] sm:$0xff] }
0x1497   :  { %6639 = vmatprep.subr.bf16.mxu1 %v9912_v13  ;;  %v6662_v31 = vpack.c.bf16 %v5033_v8, %v5031_v46  ;;  %v6702_v46 = vpack.c.bf16 %v5147_v53, %v5146_v23 }
0x149a   :  { %6641 = vmatpush3.bf16.msra.mxu1 %v6640_v2  ;;  %v5038_v2 = vld [vmem:[%s9721_s24 + $0x98] sm:$0xff] }
0x149b   :  { %6642 = vmatprep.subr.bf16.mxu1 %v9912_v13  ;;  %v6664_v21 = vpack.c.bf16 %v5038_v2, %v5036_v14  ;;  %v4947_v14 = vld [vmem:[%s9720_s23] sm:$0x1] }
0x149e   :  { %6644 = vmatpush3.bf16.msra.mxu1 %v6643_v24  ;;  %v5035_v24 = vld [vmem:[%s9721_s24 + $0x80] sm:$0xff] }
0x149f   :  { %6645 = vmatprep.subr.bf16.mxu1 %v9912_v13 }
0x1555   :  { %v4455_v10 = vpop.f32.mrb[118].mxu0 }
0x1556   :  { %v4456_v59 = vadd.f32 %v6979_v47, %v4455_v10  ;;  %v4457_v35 = vpop.f32.mrb[119].mxu0  ;;  %v5037_v10 = vld [vmem:[%s9721_s24 + $0x90] sm:$0xff] }
0x1557   :  { %v6666_v35 = vpack.c.bf16 %v5037_v10, %v5035_v24  ;;  %v5148_v10 = vld [vmem:[%s9723_s26 + $0x60] sm:$0xff] }
0x1558   :  { %4464 = vst.msk [vmem:[#allocation2] sm:$0xff] %vm982_vm6, %v4456_v59  ;;  %v5042_v59 = vld [vmem:[%s9721_s24 + $0xb8] sm:$0xff] }
0x1559   :  { %v4460_v58 = vpop.f32.mrb[120].mxu0 }
0x155a   :  { %v4461_v63 = vadd.f32 %v6979_v47, %v4460_v58  ;;  %v4462_v5 = vpop.f32.mrb[121].mxu0  ;;  %v5040_v47 = vld [vmem:[%s9721_s24 + $0xa8] sm:$0xff] }
0x155b   :  { %v6668_v58 = vpack.c.bf16 %v5042_v59, %v5040_v47  ;;  %v5046_v5 = vld [vmem:[%s9721_s24 + $0xd8] sm:$0xff]  ;;  %v5149_v47 = vld [vmem:[%s9723_s26 + $0x68] sm:$0xff] }
0x155c   :  { %4466 = vst.msk [vmem:[#allocation2 + $0x8] sm:$0xf] %vm4465_vm5, %v4461_v63  ;;  %v5044_v63 = vld [vmem:[%s9721_s24 + $0xc8] sm:$0xff]  ;;  %v6706_v59 = vpack.c.bf16 %v5149_v47, %v5148_v10 }
0x155f   :  { %v4468_v52 = vld [vmem:[#allocation2] sm:$0x1]  ;;  %v4545_v42 = vld [vmem:[#allocation2 + $0x3] sm:$0x1]  ;;  %v4622_v37 = vld [vmem:[#allocation2 + $0x1] sm:$0x1] }
0x1560   :  { %6290 = vmatmul.mubr.msk.f32.vlgmr.msra.gmra.mrb[122].mxu0 %vm982_vm6, %v4468_v52  ;;  %v4699_v56 = vld [vmem:[#allocation2 + $0x4] sm:$0x1]  ;;  %v4776_v17 = vld [vmem:[#allocation2 + $0x7] sm:$0x1]  ;;  %v6672_v52 = vpack.c.bf16 %v5046_v5, %v5044_v63  ;;  %v5151_v63 = vld [vmem:[%s9723_s26 + $0x78] sm:$0xff] }
0x1561   :  { %6611 = vmatpush3.bf16.msra.mxu0 %v6610_v32  ;;  %6296 = vmatprep.mubr.msk.f32.mxu0 %vm7007_vm2, %v7008_v20  ;;  %v6670_v32 = vpack.c.bf16 %v5041_v11, %v5039_v22  ;;  %v5150_v22 = vld [vmem:[%s9723_s26 + $0x70] sm:$0xff] }
0x1562   :  { %6612 = vmatprep.subr.bf16.mxu0 %v9912_v13  ;;  %v6710_v5 = vpack.c.bf16 %v5151_v63, %v5150_v22 }
0x1563   :  { %v4853_v28 = vld [vmem:[#allocation2 + $0xa] sm:$0x1] }
0x1568   :  { %6297 = vmatmul.mubr.msk.f32.vlgmr.msra.gmra.mrb[122].mxu0 %vm982_vm6, %v4545_v42  ;;  %v5048_v42 = vld [vmem:[%s9721_s24 + $0xe8] sm:$0xff] }
0x1569   :  { %6614 = vmatpush3.bf16.msra.mxu0 %v6613_v54  ;;  %6303 = vmatprep.mubr.msk.f32.mxu0 %vm7007_vm2, %v7008_v20  ;;  %v6674_v54 = vpack.c.bf16 %v5045_v15, %v5043_v43  ;;  %v5051_v15 = vld [vmem:[%s9722_s25] sm:$0x3] }
0x156a   :  { %6615 = vmatprep.subr.bf16.mxu0 %v9912_v13 }
0x1570   :  { %6304 = vmatmul.mubr.msk.f32.vlgmr.msra.gmra.mrb[122].mxu0 %vm982_vm6, %v4622_v37  ;;  %v5049_v37 = vld [vmem:[%s9721_s24 + $0xf0] sm:$0xff] }
0x1571   :  { %6617 = vmatpush3.bf16.msra.mxu0 %v6616_v16  ;;  %6310 = vmatprep.mubr.msk.f32.mxu0 %vm7007_vm2, %v7008_v20  ;;  %v6676_v16 = vpack.c.bf16 %v5050_v9, %v5048_v42  ;;  %v6678_v45 = vpack.c.bf16 %v5049_v37, %v5047_v40 }
0x1572   :  { %6618 = vmatprep.subr.bf16.mxu0 %v9912_v13 }
0x1578   :  { %6311 = vmatmul.mubr.msk.f32.vlgmr.msra.gmra.mrb[122].mxu0 %vm982_vm6, %v4699_v56  ;;  %v5136_v56 = vld [vmem:[%s9723_s26] sm:$0xff] }
0x1579   :  { %6620 = vmatpush3.bf16.msra.mxu0 %v6619_v18  ;;  %6317 = vmatprep.mubr.msk.f32.mxu0 %vm7007_vm2, %v7008_v20  ;;  %v5153_v18 = vld [vmem:[%s9723_s26 + $0x88] sm:$0xff] }
0x157a   :  { %6621 = vmatprep.subr.bf16.mxu0 %v9912_v13  ;;  %v4945_v13 = vld [vmem:[%s9719_s22 + $0x70] sm:$0xff]  ;;  %v6680_v19 = vpack.c.bf16 %v5153_v18, %v5152_v6 }
0x157b   :  { %v6646_v49 = vpack.c.bf16 %v4946_v61, %v4945_v13  ;;  %v5138_v61 = vld [vmem:[%s9723_s26 + $0x10] sm:$0xff] }
0x157d   :  { %6647 = vmatpush3.bf16.msra.mxu1 %v6646_v49  ;;  %v5139_v49 = vld [vmem:[%s9723_s26 + $0x18] sm:$0xff] }
0x157e   :  { %6649 = vmatprep.subr.bf16.mxu1 %v6648_v27  ;;  %v6686_v27 = vpack.c.bf16 %v5139_v49, %v5138_v61 }
0x1580   :  { %6318 = vmatmul.mubr.msk.f32.vlgmr.msra.gmra.mrb[122].mxu0 %vm982_vm6, %v4776_v17  ;;  %v5155_v17 = vld [vmem:[%s9723_s26 + $0x98] sm:$0xff] }
0x1581   :  { %6623 = vmatpush3.bf16.msra.mxu0 %v6622_v33  ;;  %6324 = vmatprep.mubr.msk.f32.mxu0 %vm7007_vm2, %v7008_v20  ;;  %v5154_v33 = vld [vmem:[%s9723_s26 + $0x90] sm:$0xff] }
0x1582   :  { %v6684_v13 = vpack.c.bf16 %v5155_v17, %v5154_v33  ;;  %6681 = vmatprep.subr.bf16.mxu0 %v6680_v19 }
0x1588   :  { %6325 = vmatmul.mubr.msk.f32.vlgmr.msra.gmra.mrb[122].mxu0 %vm982_vm6, %v4853_v28  ;;  %v6682_v28 = vpack.c.bf16 %v5137_v36, %v5136_v56  ;;  %v5168_v36 = vld [vmem:[%s9724_s27] sm:$0x1]  ;;  %vm5247_vm6 = vcmask 24576   ;;  %s7009_s27 = smov [#allocation3]  }
0x1589   :  { %s5270_s11 = sshll.u32 %s7009_s27, 4  ;;  %s5271_s11 = int_to_ptr.vmem [resolvable:$true] %s5270_s11 }
0x158a   :  { %6683 = vmatpush3.bf16.msra.mxu0 %v6682_v28  ;;  %s6980_s2 = scalar_lea.vmem %s5271_s11, 16  ;;  %s6984_s22 = scalar_lea.vmem %s5271_s11, 32 }
0x158b   :  { %6685 = vmatprep.subr.bf16.mxu0 %v6684_v13  ;;  %p6981_p0 = scmp.ne.s32.totalorder %s5271_s11, %s6980_s2  ;;  %p6985_p1 = scmp.lt.s32.totalorder %s5271_s11, %s5271_s11 }
0x158c   :  { %p6986_p2 = scmp.lt.s32.totalorder %s6984_s22, %s6980_s2 }
0x158e   :  { %6687 = vmatpush3.bf16.msra.mxu0 %v6686_v27  ;;  %p6987_p3 = por %p6986_p2, %p6985_p1 }
0x1590   :  { %p6988_p4 = pnand %p6987_p3, %p6981_p0 }
0x165b   :  { %v4925_v41 = vpop.f32.mrb[122].mxu0 }
0x165c   :  { %v6714_v1 = vadd.f32 %v4925_v41, %v4467_v60  ;;  %v6326_v50 = vpop.f32.mrb[123].mxu0  ;;  %v6688_v60 = vpack.c.bf16 %v5157_v51, %v5156_v4  ;;  %v5158_v41 = vld [vmem:[%s9723_s26 + $0xb0] sm:$0xff] }
0x165d   :  { %v5142_v50 = vld [vmem:[%s9723_s26 + $0x30] sm:$0xff] }
0x165e   :  { %v4930_v0 = vmax.f32 %v6714_v1, 0.0  ;;  %6689 = vmatprep.subr.bf16.mxu0 %v6688_v60  ;;  %v6692_v1 = vpack.c.bf16 %v5159_v62, %v5158_v41 }
0x165f   :  { %6691 = vmatpush3.bf16.msra.mxu0 %v6690_v55 }
0x1660   :  { %6360 = vmatmul.mubr.f32.vlgmr.msra.gmra.mrb[130].mxu1 %v4930_v0  ;;  %v5160_v0 = vld [vmem:[%s9723_s26 + $0xc0] sm:$0xff]  ;;  %6693 = vmatprep.subr.bf16.mxu0 %v6692_v1 }
0x1661   :  { %6651 = vmatpush1.bf16.msra.mxu1 %v6650_v30  ;;  %5127 = vmatprep.mubr.f32.mxu1 %v7008_v20  ;;  %v6658_v20 = vpack.c.bf16 %v5029_v39, %v5027_v26  ;;  %v5143_v30 = vld [vmem:[%s9723_s26 + $0x38] sm:$0xff]  ;;  %v6698_v26 = vpack.c.bf16 %v5145_v57, %v5144_v7 }
0x1662   :  { %6653 = vmatprep.subr.bf16.mxu1 %v6652_v12  ;;  %v5161_v12 = vld [vmem:[%s9723_s26 + $0xc8] sm:$0xff]  ;;  %v6694_v48 = vpack.c.bf16 %v5143_v30, %v5142_v50 }
0x1663   :  { %v6696_v29 = vpack.c.bf16 %v5161_v12, %v5160_v0 }
0x1664   :  { %6695 = vmatpush3.bf16.msra.mxu0 %v6694_v48 }
0x1665   :  { %6655 = vmatpush1.bf16.msra.mxu1 %v6654_v3  ;;  %v5162_v3 = vld [vmem:[%s9723_s26 + $0xd0] sm:$0xff]  ;;  %6697 = vmatprep.subr.bf16.mxu0 %v6696_v29 }
0x1666   :  { %6657 = vmatprep.subr.bf16.mxu1 %v6656_v34  ;;  %v5163_v34 = vld [vmem:[%s9723_s26 + $0xd8] sm:$0xff] }
0x1667   :  { %v6700_v39 = vpack.c.bf16 %v5163_v34, %v5162_v3 }
0x1668   :  { %6699 = vmatpush3.bf16.msra.mxu0 %v6698_v26 }
0x1669   :  { %6659 = vmatpush1.bf16.msra.mxu1 %v6658_v20  ;;  %v5164_v20 = vld [vmem:[%s9723_s26 + $0xe0] sm:$0xff]  ;;  %6701 = vmatprep.subr.bf16.mxu0 %v6700_v39 }
0x166a   :  { %6661 = vmatprep.subr.bf16.mxu1 %v6660_v25  ;;  %v5165_v25 = vld [vmem:[%s9723_s26 + $0xe8] sm:$0xff] }
0x166b   :  { %v6704_v8 = vpack.c.bf16 %v5165_v25, %v5164_v20 }
0x166c   :  { %6703 = vmatpush3.bf16.msra.mxu0 %v6702_v46 }
0x166d   :  { %6663 = vmatpush1.bf16.msra.mxu1 %v6662_v31  ;;  %6705 = vmatprep.subr.bf16.mxu0 %v6704_v8 }
0x166e   :  { %6665 = vmatprep.subr.bf16.mxu1 %v6664_v21 }
0x1670   :  { %6707 = vmatpush3.bf16.msra.mxu0 %v6706_v59 }
0x1671   :  { %6667 = vmatpush1.bf16.msra.mxu1 %v6666_v35  ;;  %v5166_v35 = vld [vmem:[%s9723_s26 + $0xf0] sm:$0xff] }
0x1672   :  { %6669 = vmatprep.subr.bf16.mxu1 %v6668_v58  ;;  %v5167_v58 = vld [vmem:[%s9723_s26 + $0xf8] sm:$0xff] }
0x1673   :  { %v6708_v11 = vpack.c.bf16 %v5167_v58, %v5166_v35 }
0x1675   :  { %6671 = vmatpush1.bf16.msra.mxu1 %v6670_v32  ;;  %6709 = vmatprep.subr.bf16.mxu0 %v6708_v11  ;;  %v5053_v32 = vlaneseq }
0x1676   :  { %6673 = vmatprep.subr.bf16.mxu1 %v6672_v52  ;;  %6711 = vmatpush3.bf16.msra.mxu0 %v6710_v5 }
0x1677   :  { %v5054_v52 = vshrl.u32 %v5053_v32, 7  ;;  %v5240_v56 = vand.u32 127, %v5053_v32 }
0x1679   :  { %6675 = vmatpush1.bf16.msra.mxu1 %v6674_v54  ;;  %v5055_v43 = vsub.s32 0, %v5054_v52  ;;  %v5059_v54 = vsub.s32 1, %v5054_v52  ;;  %vm5241_vm12 = vcmp.eq.s32.totalorder %v5240_v56, 4 }
0x167a   :  { %6677 = vmatprep.subr.bf16.mxu1 %v6676_v16 }
0x167b   :  { %v5056_v42 = vrot.slane %v5051_v15, %v5055_v43  ;;  %v5060_v9 = vrot.slane %v5051_v15, %v5059_v54 }
0x167d   :  { %6679 = vmatpush1.bf16.msra.mxu1 %v6678_v45 }
0x1733   :  { %v5014_v2 = vpop.f32.mrb[130].mxu1 }
0x1734   :  { %v5015_v31 = vadd.f32 %v5014_v2, %v4947_v14  ;;  %v6361_v21 = vpop.f32.mrb[131].mxu1 }
0x1736   :  { %v5018_v24 = vmax.f32 %v5015_v31, 0.0 }
0x1738   :  { %5128 = vmatmul.mubr.f32.vlgmr.msra.gmra.mrb[132].mxu1 %v5018_v24 }
0x180b   :  { %v5129_v40 = vpop.f32.mrb[132].mxu1 }
0x180c   :  { %v5130_v16 = vadd.f32 %v5129_v40, %v5056_v42  ;;  %v5131_v37 = vpop.f32.mrb[133].mxu1 }
0x180d   :  { %v5132_v45 = vadd.f32 %v5131_v37, %v5060_v9 }
0x180e   :  { %v5134_v18 = vmax.f32 %v5130_v16, 0.0 }
0x180f   :  { %v5135_v6 = vmax.f32 %v5132_v45, 0.0 }
0x1811   :  { %5233 = vmatprep.mubr.f32.mxu0 %v5135_v6 }
0x1812   :  { %5234 = vmatmul.mubr.f32.vlgmr.msra.gmra.mrb[124].mxu0 %v5134_v18 }
0x18e5   :  { %v5872_v19 = vpop.f32.mrb[124].mxu0 }
0x18e6   :  { %v5873_v33 = vpop.f32.mrb[125].mxu0 }
0x18e7   :  { %v5874_v17 = vadd.f32 %v5873_v33, %v5872_v19 }
0x18e9   :  { %v5236_v28 = vadd.f32 %v5874_v17, %v5168_v36 }
0x18eb   :  { %v5248_v13 = vsel %vm5247_vm6, %v5236_v28, 0.0  ;;  %v5242_v61 = vsel %vm5241_vm12, %v5236_v28, 0.0 }
0x18ec   :  { %5249 = vadd.xlane.f32.xlu1 %v5248_v13  ;;  %v5244_v49 = vsel %vm5243_vm13, %v5242_v61, 0.0 }
0x18ed   :  { %5245 = vadd.xlane.f32.xlu0 %v5244_v49 }
0x1979   :  { %v5250_v4 = vpop.xlane.xlu1 %5249 }
0x197a   :  { %v5251_v51 = vrot.slane %v5250_v4, 4  ;;  %v5246_v1 = vpop.xlane.xlu0 %5245 }
0x197c   :  { %v5252_v27 = vadd.f32 %v5251_v51, %v5250_v4 }
0x197e   :  { %v5253_v60 = vrot.slane %v5252_v27, 2 }
0x1980   :  { %v5254_v44 = vadd.f32 %v5253_v60, %v5252_v27 }
0x1982   :  { %v5255_v38 = vrot.slane %v5254_v44, 1 }
0x1984   :  { %v5256_v41 = vadd.f32 %v5255_v38, %v5254_v44 }
0x1986   :  { %6731 = vpush %v5256_v41 }
0x19b7   :  { %s6732_s25 = spop %6731 }
0x19b8   :  { %v5258_v62 = vstv %s6732_s25 }
0x19b9   :  { %v5260_v55 = vmul.f32 0.25, %v5258_v62 }
0x19bb   :  { %v5261_v50 = vsub.f32 %v5246_v1, %v5260_v55 }
0x19bd   :  { %v5262_v30 = vadd.f32 %v5261_v50, %v5236_v28 }
0x19bf   :  { %5263 = vst.msk [vmem:[#allocation3] sm:$0x1] %vm5247_vm6, %v5262_v30 }
0x19c0   :  { %6991 = shalt.err (!%p6988_p4)
}
0x19c1   :  { %s6992_s12 = scalar_lea.hbm %s9725_s28, 16 }
0x19c2   :  { %p6993_p5 = scmp.ne.s32.totalorder %s9725_s28, %s6992_s12  ;;  %p6996_p6 = scmp.lt.u32.totalorder %s6992_s12, %s9725_s28 }
0x19c4   :  { %p6998_p7 = pnand %p6996_p6, %p6993_p5 }
0x19c6   :  { %7001 = shalt.err (!%p6998_p7)
}
0x19c7   :  { %5273 = dma.vmem_to_hbm [thread:$0]  %s5271_s11, 16, %s9725_s28, [#allocation4]  }
0x19c8   :  { %7002 = dma.done.wait [#allocation4], 16  }
0x19c9   :  { %7003 = vsyncadd [#allocation4], 4294967280 }
0x19ca   :  { %5277 = vsyncpa [#allocation4], 1 }

</bundles_post_ra>
